<compile_context>
chip_gen: v6e
topology: v6e:2x2x1
jax: 0.10.0
libtpu: 0.0.40
codegen_flags: <defaults>
</compile_context>

<pallas_src>
import functools

import jax
import jax.numpy as jnp
from jax.experimental import pallas as pl
from jax.experimental.pallas import tpu as pltpu

EPS = 1e-5  # nn.InstanceNorm2d default


def _resblock_kernel(x_ref, w1_ref, b1_ref, g1_ref, be1_ref,
                     w2_ref, b2_ref, g2_ref, be2_ref,
                     out_ref, pad_ref, *, H, W, C):
    """Fused ResidualBlock forward for one sample.

    x_ref:    (1, H, W, C)   input sample (original dtype)
    w*_ref:   (9*C, C)       im2col conv weights (compute dtype)
    b/g/be:   (1, C)         conv bias / InstanceNorm gamma / beta
    out_ref:  (1, H, W, C)
    pad_ref:  (H+2, W+2, C)  shared reflection-padded scratch (compute dtype)
    """
    cdt = pad_ref.dtype
    f32 = jnp.float32

    def reflect_pad_into_scratch(vals):            # vals: (H, W, C), dtype cdt
        # centre
        pad_ref[1:H + 1, 1:W + 1, :] = vals
        # top / bottom rows (reflect row 1 / row H-2)
        pad_ref[0:1, 1:W + 1, :] = vals[1:2]
        pad_ref[H + 1:H + 2, 1:W + 1, :] = vals[H - 2:H - 1]
        # left / right columns (reflect col 1 / col W-2); corners fall out free
        pad_ref[:, 0:1, :] = pad_ref[:, 2:3, :]
        pad_ref[:, W + 1:W + 2, :] = pad_ref[:, W - 1:W, :]

    def conv3x3_instnorm(w_ref, b_ref, g_ref, be_ref):
        # im2col: one lane-axis concat of the 9 taps, one reshape, ONE deep
        # (H*W, 9C) @ (9C, C) MXU matmul with f32 accumulation.
        col = jnp.concatenate(
            [pad_ref[dy:dy + H, dx:dx + W, :]
             for dy in range(3) for dx in range(3)], axis=-1)       # (H, W, 9C)
        acc = jnp.dot(col.reshape(H * W, 9 * C), w_ref[...],
                      preferred_element_type=f32)                   # (H*W, C)
        acc = acc + b_ref[...].astype(f32)
        # InstanceNorm2d: per-channel stats over spatial dims, biased variance.
        mean = jnp.mean(acc, axis=0, keepdims=True)
        var = jnp.mean((acc - mean) ** 2, axis=0, keepdims=True)
        scale = jax.lax.rsqrt(var + EPS) * g_ref[...].astype(f32)   # EUP rsqrt
        return (acc - mean) * scale + be_ref[...].astype(f32)       # (H*W, C)

    # ---- stage 1: y = relu(in1(conv1(x))) ----------------------------------
    reflect_pad_into_scratch(x_ref[0].astype(cdt))
    y = jnp.maximum(conv3x3_instnorm(w1_ref, b1_ref, g1_ref, be1_ref), 0.0)

    # ---- stage 2: out = in2(conv2(y)) + x ----------------------------------
    reflect_pad_into_scratch(y.astype(cdt).reshape(H, W, C))
    z = conv3x3_instnorm(w2_ref, b2_ref, g2_ref, be2_ref)
    residual = x_ref[0].astype(f32)                 # still resident in VMEM
    out_ref[0] = (z.reshape(H, W, C) + residual).astype(out_ref.dtype)


def _vmem_limit_bytes(H, W, C, in_dtype, compute_dtype):
    Hp, Wp = H + 2, W + 2
    isz = jnp.dtype(in_dtype).itemsize
    csz = jnp.dtype(compute_dtype).itemsize
    need = (
        2 * H * W * C * isz            # double-buffered input block
        + 2 * H * W * C * isz          # double-buffered output block
        + 2 * 2 * 9 * C * C * csz      # two im2col weight matrices
        + Hp * Wp * C * csz            # shared padded scratch
        + H * W * 9 * C * csz          # im2col operand
        + 4 * H * W * C * 4            # f32 accumulator / elementwise temps
        + (1 << 20)                    # small params + slack
    )
    # Floor above tiny-shape needs; cap below v7x's 64 MiB physical VMEM.
    return int(min(max(2 * need, 8 << 20), 48 << 20))


def residual_block(x_nchw, params, *, compute_dtype=jnp.bfloat16):
    """Forward pass of ResidualBlock. x_nchw: (B, C, H, W).

    compute_dtype is the MXU operand dtype (bf16 by default); accumulation,
    InstanceNorm statistics and the residual add are always float32.
    """
    w1, b1, g1, be1, w2, b2, g2, be2 = params
    B, C, H, W = x_nchw.shape
    x = jnp.transpose(x_nchw, (0, 2, 3, 1))        # NCHW -> NHWC

    # (3, 3, Cin, Cout) -> (9*Cin, Cout) im2col weights in the MXU dtype.
    w1m = w1.reshape(9 * C, C).astype(compute_dtype)
    w2m = w2.reshape(9 * C, C).astype(compute_dtype)

    weight_spec = pl.BlockSpec((9 * C, C), lambda b: (0, 0))
    param_spec = pl.BlockSpec((1, C), lambda b: (0, 0))

    out = pl.pallas_call(
        functools.partial(_resblock_kernel, H=H, W=W, C=C),
        out_shape=jax.ShapeDtypeStruct((B, H, W, C), x.dtype),
        grid_spec=pltpu.PrefetchScalarGridSpec(
            num_scalar_prefetch=0,
            grid=(B,),
            in_specs=[
                pl.BlockSpec((1, H, W, C), lambda b: (b, 0, 0, 0)),   # x
                weight_spec, param_spec, param_spec, param_spec,      # conv1/in1
                weight_spec, param_spec, param_spec, param_spec,      # conv2/in2
            ],
            out_specs=pl.BlockSpec((1, H, W, C), lambda b: (b, 0, 0, 0)),
            scratch_shapes=[pltpu.VMEM((H + 2, W + 2, C), compute_dtype)],
        ),
        compiler_params=pltpu.CompilerParams(
            dimension_semantics=("parallel",),      # samples independent (v7x 2 TCs)
            vmem_limit_bytes=_vmem_limit_bytes(H, W, C, x.dtype, compute_dtype)),
    )(x, w1m, b1, g1, be1, w2m, b2, g2, be2)

    return jnp.transpose(out, (0, 3, 1, 2))        # NHWC -> NCHW


# ----------------------------- reference (pure JAX) -----------------------------
def _ref_conv_in(x_nhwc, w, b):
    xpad = jnp.pad(x_nhwc, ((0, 0), (1, 1), (1, 1), (0, 0)), mode="reflect")
    y = jax.lax.conv_general_dilated(
        xpad, w, window_strides=(1, 1), padding="VALID",
        dimension_numbers=("NHWC", "HWIO", "NHWC"))
    return y + b.reshape(1, 1, 1, -1)


def _ref_instnorm(y, gamma, beta):
    mean = jnp.mean(y, axis=(1, 2), keepdims=True)
    var = jnp.mean((y - mean) ** 2, axis=(1, 2), keepdims=True)
    return (y - mean) * jax.lax.rsqrt(var + EPS) * gamma.reshape(1, 1, 1, -1) \
        + beta.reshape(1, 1, 1, -1)


def residual_block_ref(x_nchw, params):
    w1, b1, g1, be1, w2, b2, g2, be2 = params
    x = jnp.transpose(x_nchw, (0, 2, 3, 1))
    y = jnp.maximum(_ref_instnorm(_ref_conv_in(x, w1, b1[0]), g1[0], be1[0]), 0.0)
    z = _ref_instnorm(_ref_conv_in(y, w2, b2[0]), g2[0], be2[0]) + x
    return jnp.transpose(z, (0, 3, 1, 2))


# --------------------------------- main ---------------------------------
if __name__ == "__main__":
    B, C, H, W = 2, 4, 16, 16
    key = jax.random.PRNGKey(0)
    ks = jax.random.split(key, 9)

    x = jax.random.normal(ks[0], (B, C, H, W), jnp.float32)

    # Deterministic synthetic parameters (shapes follow the PyTorch module).
    # Conv weights stored (kh, kw, Cin, Cout); bias / InstanceNorm affine as (1, C).
    w1 = jax.random.normal(ks[1], (3, 3, C, C), jnp.float32) * 0.1
    b1 = jax.random.normal(ks[2], (1, C), jnp.float32) * 0.1
    g1 = 1.0 + jax.random.normal(ks[3], (1, C), jnp.float32) * 0.1
    be1 = jax.random.normal(ks[4], (1, C), jnp.float32) * 0.1
    w2 = jax.random.normal(ks[5], (3, 3, C, C), jnp.float32) * 0.1
    b2 = jax.random.normal(ks[6], (1, C), jnp.float32) * 0.1
    g2 = 1.0 + jax.random.normal(ks[7], (1, C), jnp.float32) * 0.1
    be2 = jax.random.normal(ks[8], (1, C), jnp.float32) * 0.1
    params = (w1, b1, g1, be1, w2, b2, g2, be2)

    ref = jax.block_until_ready(residual_block_ref(x, params))

    # Strict numerics gate: f32 MXU path must match the f32 reference tightly.
    out_f32 = jax.block_until_ready(
        residual_block(x, params, compute_dtype=jnp.float32))
    assert out_f32.shape == (B, C, H, W)
    err_f32 = float(jnp.max(jnp.abs(out_f32 - ref)))
    assert jnp.allclose(out_f32, ref, atol=1e-4, rtol=1e-4), \
        f"f32-path max abs err = {err_f32}"

    # Default (bf16 MXU operands, f32 accumulation): sanity bound vs f32 ref.
    out_bf16 = jax.block_until_ready(residual_block(x, params))
    err_bf16 = float(jnp.max(jnp.abs(out_bf16 - ref)))
    assert err_bf16 < 1e-1, f"bf16-path max abs err = {err_bf16}"

    print("KERNEL_OK")
</pallas_src>

<mosaic_0001>
module attributes {stable_mosaic.version = 11 : i64} {
  func.func @_resblock_kernel(%arg0: i32, %arg1: memref<1x16x16x4xf32, #tpu.memory_space<vmem>>, %arg2: memref<36x4xf32, #tpu.memory_space<vmem>>, %arg3: memref<1x4xf32, #tpu.memory_space<vmem>>, %arg4: memref<1x4xf32, #tpu.memory_space<vmem>>, %arg5: memref<1x4xf32, #tpu.memory_space<vmem>>, %arg6: memref<36x4xf32, #tpu.memory_space<vmem>>, %arg7: memref<1x4xf32, #tpu.memory_space<vmem>>, %arg8: memref<1x4xf32, #tpu.memory_space<vmem>>, %arg9: memref<1x4xf32, #tpu.memory_space<vmem>>, %arg10: memref<1x16x16x4xf32, #tpu.memory_space<vmem>>, %arg11: memref<18x18x4xf32, #tpu.memory_space<vmem>>) attributes {dimension_semantics = [#tpu.dimension_semantics<parallel>], iteration_bounds = array<i64: 2>, scalar_prefetch = 0 : i64, scratch_operands = 1 : i64, tpu.core_type = #tpu.core_type<tc>, window_params = [{transform_indices = @transform_0, window_bounds = array<i64: 1, 16, 16, 4>}, {pipeline_mode = #tpu.pipeline_mode<synchronous>, transform_indices = @transform_1, window_bounds = array<i64: 36, 4>}, {pipeline_mode = #tpu.pipeline_mode<synchronous>, transform_indices = @transform_2, window_bounds = array<i64: 1, 4>}, {pipeline_mode = #tpu.pipeline_mode<synchronous>, transform_indices = @transform_3, window_bounds = array<i64: 1, 4>}, {pipeline_mode = #tpu.pipeline_mode<synchronous>, transform_indices = @transform_4, window_bounds = array<i64: 1, 4>}, {pipeline_mode = #tpu.pipeline_mode<synchronous>, transform_indices = @transform_5, window_bounds = array<i64: 36, 4>}, {pipeline_mode = #tpu.pipeline_mode<synchronous>, transform_indices = @transform_6, window_bounds = array<i64: 1, 4>}, {pipeline_mode = #tpu.pipeline_mode<synchronous>, transform_indices = @transform_7, window_bounds = array<i64: 1, 4>}, {pipeline_mode = #tpu.pipeline_mode<synchronous>, transform_indices = @transform_8, window_bounds = array<i64: 1, 4>}, {transform_indices = @transform_9, window_bounds = array<i64: 1, 16, 16, 4>}]} {
    %c0 = arith.constant 0 : index
    %c0_0 = arith.constant 0 : index
    %c0_1 = arith.constant 0 : index
    %c0_2 = arith.constant 0 : index
    %0 = vector.load %arg1[%c0, %c0_0, %c0_1, %c0_2] : memref<1x16x16x4xf32, #tpu.memory_space<vmem>>, vector<1x16x16x4xf32>
    %1 = vector.shape_cast %0 : vector<1x16x16x4xf32> to vector<16x16x4xf32>
    %c1 = arith.constant 1 : index
    %c1_3 = arith.constant 1 : index
    %c0_4 = arith.constant 0 : index
    %2 = vector.load %arg11[%c1, %c1_3, %c0_4] : memref<18x18x4xf32, #tpu.memory_space<vmem>>, vector<16x16x4xf32>
    tpu.vector_store %arg11[%c1, %c1_3, %c0_4], %1 {strides = array<i32>} : memref<18x18x4xf32, #tpu.memory_space<vmem>>, vector<16x16x4xf32>,
    %3 = vector.extract_strided_slice %1 {offsets = [1, 0, 0], sizes = [1, 16, 4], strides = [1, 1, 1]} : vector<16x16x4xf32> to vector<1x16x4xf32>
    %c0_5 = arith.constant 0 : index
    %c1_6 = arith.constant 1 : index
    %c0_7 = arith.constant 0 : index
    %4 = vector.load %arg11[%c0_5, %c1_6, %c0_7] : memref<18x18x4xf32, #tpu.memory_space<vmem>>, vector<1x16x4xf32>
    tpu.vector_store %arg11[%c0_5, %c1_6, %c0_7], %3 {strides = array<i32>} : memref<18x18x4xf32, #tpu.memory_space<vmem>>, vector<1x16x4xf32>,
    %5 = vector.extract_strided_slice %1 {offsets = [14, 0, 0], sizes = [1, 16, 4], strides = [1, 1, 1]} : vector<16x16x4xf32> to vector<1x16x4xf32>
    %c17 = arith.constant 17 : index
    %c1_8 = arith.constant 1 : index
    %c0_9 = arith.constant 0 : index
    %6 = vector.load %arg11[%c17, %c1_8, %c0_9] : memref<18x18x4xf32, #tpu.memory_space<vmem>>, vector<1x16x4xf32>
    tpu.vector_store %arg11[%c17, %c1_8, %c0_9], %5 {strides = array<i32>} : memref<18x18x4xf32, #tpu.memory_space<vmem>>, vector<1x16x4xf32>,
    %c0_10 = arith.constant 0 : index
    %c2 = arith.constant 2 : index
    %c0_11 = arith.constant 0 : index
    %7 = vector.load %arg11[%c0_10, %c2, %c0_11] : memref<18x18x4xf32, #tpu.memory_space<vmem>>, vector<18x1x4xf32>
    %c0_12 = arith.constant 0 : index
    %c0_13 = arith.constant 0 : index
    %c0_14 = arith.constant 0 : index
    %8 = vector.load %arg11[%c0_12, %c0_13, %c0_14] : memref<18x18x4xf32, #tpu.memory_space<vmem>>, vector<18x1x4xf32>
    tpu.vector_store %arg11[%c0_12, %c0_13, %c0_14], %7 {strides = array<i32>} : memref<18x18x4xf32, #tpu.memory_space<vmem>>, vector<18x1x4xf32>,
    %c0_15 = arith.constant 0 : index
    %c15 = arith.constant 15 : index
    %c0_16 = arith.constant 0 : index
    %9 = vector.load %arg11[%c0_15, %c15, %c0_16] : memref<18x18x4xf32, #tpu.memory_space<vmem>>, vector<18x1x4xf32>
    %c0_17 = arith.constant 0 : index
    %c17_18 = arith.constant 17 : index
    %c0_19 = arith.constant 0 : index
    %10 = vector.load %arg11[%c0_17, %c17_18, %c0_19] : memref<18x18x4xf32, #tpu.memory_space<vmem>>, vector<18x1x4xf32>
    tpu.vector_store %arg11[%c0_17, %c17_18, %c0_19], %9 {strides = array<i32>} : memref<18x18x4xf32, #tpu.memory_space<vmem>>, vector<18x1x4xf32>,
    %c0_20 = arith.constant 0 : index
    %c0_21 = arith.constant 0 : index
    %c0_22 = arith.constant 0 : index
    %11 = vector.load %arg11[%c0_20, %c0_21, %c0_22] : memref<18x18x4xf32, #tpu.memory_space<vmem>>, vector<16x16x4xf32>
    %c0_23 = arith.constant 0 : index
    %c1_24 = arith.constant 1 : index
    %c0_25 = arith.constant 0 : index
    %12 = vector.load %arg11[%c0_23, %c1_24, %c0_25] : memref<18x18x4xf32, #tpu.memory_space<vmem>>, vector<16x16x4xf32>
    %c0_26 = arith.constant 0 : index
    %c2_27 = arith.constant 2 : index
    %c0_28 = arith.constant 0 : index
    %13 = vector.load %arg11[%c0_26, %c2_27, %c0_28] : memref<18x18x4xf32, #tpu.memory_space<vmem>>, vector<16x16x4xf32>
    %c1_29 = arith.constant 1 : index
    %c0_30 = arith.constant 0 : index
    %c0_31 = arith.constant 0 : index
    %14 = vector.load %arg11[%c1_29, %c0_30, %c0_31] : memref<18x18x4xf32, #tpu.memory_space<vmem>>, vector<16x16x4xf32>
    %c1_32 = arith.constant 1 : index
    %c1_33 = arith.constant 1 : index
    %c0_34 = arith.constant 0 : index
    %15 = vector.load %arg11[%c1_32, %c1_33, %c0_34] : memref<18x18x4xf32, #tpu.memory_space<vmem>>, vector<16x16x4xf32>
    %c1_35 = arith.constant 1 : index
    %c2_36 = arith.constant 2 : index
    %c0_37 = arith.constant 0 : index
    %16 = vector.load %arg11[%c1_35, %c2_36, %c0_37] : memref<18x18x4xf32, #tpu.memory_space<vmem>>, vector<16x16x4xf32>
    %c2_38 = arith.constant 2 : index
    %c0_39 = arith.constant 0 : index
    %c0_40 = arith.constant 0 : index
    %17 = vector.load %arg11[%c2_38, %c0_39, %c0_40] : memref<18x18x4xf32, #tpu.memory_space<vmem>>, vector<16x16x4xf32>
    %c2_41 = arith.constant 2 : index
    %c1_42 = arith.constant 1 : index
    %c0_43 = arith.constant 0 : index
    %18 = vector.load %arg11[%c2_41, %c1_42, %c0_43] : memref<18x18x4xf32, #tpu.memory_space<vmem>>, vector<16x16x4xf32>
    %c2_44 = arith.constant 2 : index
    %c2_45 = arith.constant 2 : index
    %c0_46 = arith.constant 0 : index
    %19 = vector.load %arg11[%c2_44, %c2_45, %c0_46] : memref<18x18x4xf32, #tpu.memory_space<vmem>>, vector<16x16x4xf32>
    %20 = tpu.concatenate %11, %12, %13, %14, %15, %16, %17, %18, %19 in 2 : vector<16x16x4xf32>, vector<16x16x4xf32>, vector<16x16x4xf32>, vector<16x16x4xf32>, vector<16x16x4xf32>, vector<16x16x4xf32>, vector<16x16x4xf32>, vector<16x16x4xf32>, vector<16x16x4xf32> -> vector<16x16x36xf32>
    %21 = vector.shape_cast %20 : vector<16x16x36xf32> to vector<256x36xf32>
    %c0_47 = arith.constant 0 : index
    %c0_48 = arith.constant 0 : index
    %22 = vector.load %arg2[%c0_47, %c0_48] : memref<36x4xf32, #tpu.memory_space<vmem>>, vector<36x4xf32>
    %cst = arith.constant dense<0.000000e+00> : vector<256x4xf32>
    %23 = tpu.matmul %21, %22, %cst {dimension_numbers = #tpu.dot_dimension_numbers<[1], [0], [0], [1], [0, 0, 1, 1], [], []>} : vector<256x36xf32>, vector<36x4xf32>, vector<256x4xf32> -> vector<256x4xf32>
    %c0_49 = arith.constant 0 : index
    %c0_50 = arith.constant 0 : index
    %24 = vector.load %arg3[%c0_49, %c0_50] : memref<1x4xf32, #tpu.memory_space<vmem>>, vector<1x4xf32>
    %25 = vector.broadcast %24 : vector<1x4xf32> to vector<256x4xf32>
    %26 = arith.addf %23, %25 : vector<256x4xf32>
    %cst_51 = arith.constant dense<0.000000e+00> : vector<4xf32>
    %27 = vector.multi_reduction <add>, %26, %cst_51 [0] : vector<256x4xf32> to vector<4xf32>
    %28 = vector.shape_cast %27 : vector<4xf32> to vector<1x4xf32>
    %cst_52 = arith.constant 2.560000e+02 : f32
    %29 = vector.broadcast %cst_52 : f32 to vector<1x4xf32>
    %30 = arith.divf %28, %29 : vector<1x4xf32>
    %31 = vector.broadcast %30 : vector<1x4xf32> to vector<256x4xf32>
    %32 = arith.subf %26, %31 : vector<256x4xf32>
    %33 = arith.mulf %32, %32 : vector<256x4xf32>
    %cst_53 = arith.constant dense<0.000000e+00> : vector<4xf32>
    %34 = vector.multi_reduction <add>, %33, %cst_53 [0] : vector<256x4xf32> to vector<4xf32>
    %35 = vector.shape_cast %34 : vector<4xf32> to vector<1x4xf32>
    %cst_54 = arith.constant 2.560000e+02 : f32
    %36 = vector.broadcast %cst_54 : f32 to vector<1x4xf32>
    %37 = arith.divf %35, %36 : vector<1x4xf32>
    %cst_55 = arith.constant 9.99999974E-6 : f32
    %38 = vector.broadcast %cst_55 : f32 to vector<1x4xf32>
    %39 = arith.addf %37, %38 : vector<1x4xf32>
    %40 = math.rsqrt %39 : vector<1x4xf32>
    %c0_56 = arith.constant 0 : index
    %c0_57 = arith.constant 0 : index
    %41 = vector.load %arg4[%c0_56, %c0_57] : memref<1x4xf32, #tpu.memory_space<vmem>>, vector<1x4xf32>
    %42 = arith.mulf %40, %41 : vector<1x4xf32>
    %43 = vector.broadcast %30 : vector<1x4xf32> to vector<256x4xf32>
    %44 = arith.subf %26, %43 : vector<256x4xf32>
    %45 = vector.broadcast %42 : vector<1x4xf32> to vector<256x4xf32>
    %46 = arith.mulf %44, %45 : vector<256x4xf32>
    %c0_58 = arith.constant 0 : index
    %c0_59 = arith.constant 0 : index
    %47 = vector.load %arg5[%c0_58, %c0_59] : memref<1x4xf32, #tpu.memory_space<vmem>>, vector<1x4xf32>
    %48 = vector.broadcast %47 : vector<1x4xf32> to vector<256x4xf32>
    %49 = arith.addf %46, %48 : vector<256x4xf32>
    %cst_60 = arith.constant 0.000000e+00 : f32
    %50 = vector.broadcast %cst_60 : f32 to vector<256x4xf32>
    %51 = arith.maximumf %49, %50 : vector<256x4xf32>
    %52 = vector.shape_cast %51 : vector<256x4xf32> to vector<16x16x4xf32>
    %c1_61 = arith.constant 1 : index
    %c1_62 = arith.constant 1 : index
    %c0_63 = arith.constant 0 : index
    %53 = vector.load %arg11[%c1_61, %c1_62, %c0_63] : memref<18x18x4xf32, #tpu.memory_space<vmem>>, vector<16x16x4xf32>
    tpu.vector_store %arg11[%c1_61, %c1_62, %c0_63], %52 {strides = array<i32>} : memref<18x18x4xf32, #tpu.memory_space<vmem>>, vector<16x16x4xf32>,
    %54 = vector.extract_strided_slice %52 {offsets = [1, 0, 0], sizes = [1, 16, 4], strides = [1, 1, 1]} : vector<16x16x4xf32> to vector<1x16x4xf32>
    %c0_64 = arith.constant 0 : index
    %c1_65 = arith.constant 1 : index
    %c0_66 = arith.constant 0 : index
    %55 = vector.load %arg11[%c0_64, %c1_65, %c0_66] : memref<18x18x4xf32, #tpu.memory_space<vmem>>, vector<1x16x4xf32>
    tpu.vector_store %arg11[%c0_64, %c1_65, %c0_66], %54 {strides = array<i32>} : memref<18x18x4xf32, #tpu.memory_space<vmem>>, vector<1x16x4xf32>,
    %56 = vector.extract_strided_slice %52 {offsets = [14, 0, 0], sizes = [1, 16, 4], strides = [1, 1, 1]} : vector<16x16x4xf32> to vector<1x16x4xf32>
    %c17_67 = arith.constant 17 : index
    %c1_68 = arith.constant 1 : index
    %c0_69 = arith.constant 0 : index
    %57 = vector.load %arg11[%c17_67, %c1_68, %c0_69] : memref<18x18x4xf32, #tpu.memory_space<vmem>>, vector<1x16x4xf32>
    tpu.vector_store %arg11[%c17_67, %c1_68, %c0_69], %56 {strides = array<i32>} : memref<18x18x4xf32, #tpu.memory_space<vmem>>, vector<1x16x4xf32>,
    %c0_70 = arith.constant 0 : index
    %c2_71 = arith.constant 2 : index
    %c0_72 = arith.constant 0 : index
    %58 = vector.load %arg11[%c0_70, %c2_71, %c0_72] : memref<18x18x4xf32, #tpu.memory_space<vmem>>, vector<18x1x4xf32>
    %c0_73 = arith.constant 0 : index
    %c0_74 = arith.constant 0 : index
    %c0_75 = arith.constant 0 : index
    %59 = vector.load %arg11[%c0_73, %c0_74, %c0_75] : memref<18x18x4xf32, #tpu.memory_space<vmem>>, vector<18x1x4xf32>
    tpu.vector_store %arg11[%c0_73, %c0_74, %c0_75], %58 {strides = array<i32>} : memref<18x18x4xf32, #tpu.memory_space<vmem>>, vector<18x1x4xf32>,
    %c0_76 = arith.constant 0 : index
    %c15_77 = arith.constant 15 : index
    %c0_78 = arith.constant 0 : index
    %60 = vector.load %arg11[%c0_76, %c15_77, %c0_78] : memref<18x18x4xf32, #tpu.memory_space<vmem>>, vector<18x1x4xf32>
    %c0_79 = arith.constant 0 : index
    %c17_80 = arith.constant 17 : index
    %c0_81 = arith.constant 0 : index
    %61 = vector.load %arg11[%c0_79, %c17_80, %c0_81] : memref<18x18x4xf32, #tpu.memory_space<vmem>>, vector<18x1x4xf32>
    tpu.vector_store %arg11[%c0_79, %c17_80, %c0_81], %60 {strides = array<i32>} : memref<18x18x4xf32, #tpu.memory_space<vmem>>, vector<18x1x4xf32>,
    %c0_82 = arith.constant 0 : index
    %c0_83 = arith.constant 0 : index
    %c0_84 = arith.constant 0 : index
    %62 = vector.load %arg11[%c0_82, %c0_83, %c0_84] : memref<18x18x4xf32, #tpu.memory_space<vmem>>, vector<16x16x4xf32>
    %c0_85 = arith.constant 0 : index
    %c1_86 = arith.constant 1 : index
    %c0_87 = arith.constant 0 : index
    %63 = vector.load %arg11[%c0_85, %c1_86, %c0_87] : memref<18x18x4xf32, #tpu.memory_space<vmem>>, vector<16x16x4xf32>
    %c0_88 = arith.constant 0 : index
    %c2_89 = arith.constant 2 : index
    %c0_90 = arith.constant 0 : index
    %64 = vector.load %arg11[%c0_88, %c2_89, %c0_90] : memref<18x18x4xf32, #tpu.memory_space<vmem>>, vector<16x16x4xf32>
    %c1_91 = arith.constant 1 : index
    %c0_92 = arith.constant 0 : index
    %c0_93 = arith.constant 0 : index
    %65 = vector.load %arg11[%c1_91, %c0_92, %c0_93] : memref<18x18x4xf32, #tpu.memory_space<vmem>>, vector<16x16x4xf32>
    %c1_94 = arith.constant 1 : index
    %c1_95 = arith.constant 1 : index
    %c0_96 = arith.constant 0 : index
    %66 = vector.load %arg11[%c1_94, %c1_95, %c0_96] : memref<18x18x4xf32, #tpu.memory_space<vmem>>, vector<16x16x4xf32>
    %c1_97 = arith.constant 1 : index
    %c2_98 = arith.constant 2 : index
    %c0_99 = arith.constant 0 : index
    %67 = vector.load %arg11[%c1_97, %c2_98, %c0_99] : memref<18x18x4xf32, #tpu.memory_space<vmem>>, vector<16x16x4xf32>
    %c2_100 = arith.constant 2 : index
    %c0_101 = arith.constant 0 : index
    %c0_102 = arith.constant 0 : index
    %68 = vector.load %arg11[%c2_100, %c0_101, %c0_102] : memref<18x18x4xf32, #tpu.memory_space<vmem>>, vector<16x16x4xf32>
    %c2_103 = arith.constant 2 : index
    %c1_104 = arith.constant 1 : index
    %c0_105 = arith.constant 0 : index
    %69 = vector.load %arg11[%c2_103, %c1_104, %c0_105] : memref<18x18x4xf32, #tpu.memory_space<vmem>>, vector<16x16x4xf32>
    %c2_106 = arith.constant 2 : index
    %c2_107 = arith.constant 2 : index
    %c0_108 = arith.constant 0 : index
    %70 = vector.load %arg11[%c2_106, %c2_107, %c0_108] : memref<18x18x4xf32, #tpu.memory_space<vmem>>, vector<16x16x4xf32>
    %71 = tpu.concatenate %62, %63, %64, %65, %66, %67, %68, %69, %70 in 2 : vector<16x16x4xf32>, vector<16x16x4xf32>, vector<16x16x4xf32>, vector<16x16x4xf32>, vector<16x16x4xf32>, vector<16x16x4xf32>, vector<16x16x4xf32>, vector<16x16x4xf32>, vector<16x16x4xf32> -> vector<16x16x36xf32>
    %72 = vector.shape_cast %71 : vector<16x16x36xf32> to vector<256x36xf32>
    %c0_109 = arith.constant 0 : index
    %c0_110 = arith.constant 0 : index
    %73 = vector.load %arg6[%c0_109, %c0_110] : memref<36x4xf32, #tpu.memory_space<vmem>>, vector<36x4xf32>
    %cst_111 = arith.constant dense<0.000000e+00> : vector<256x4xf32>
    %74 = tpu.matmul %72, %73, %cst_111 {dimension_numbers = #tpu.dot_dimension_numbers<[1], [0], [0], [1], [0, 0, 1, 1], [], []>} : vector<256x36xf32>, vector<36x4xf32>, vector<256x4xf32> -> vector<256x4xf32>
    %c0_112 = arith.constant 0 : index
    %c0_113 = arith.constant 0 : index
    %75 = vector.load %arg7[%c0_112, %c0_113] : memref<1x4xf32, #tpu.memory_space<vmem>>, vector<1x4xf32>
    %76 = vector.broadcast %75 : vector<1x4xf32> to vector<256x4xf32>
    %77 = arith.addf %74, %76 : vector<256x4xf32>
    %cst_114 = arith.constant dense<0.000000e+00> : vector<4xf32>
    %78 = vector.multi_reduction <add>, %77, %cst_114 [0] : vector<256x4xf32> to vector<4xf32>
    %79 = vector.shape_cast %78 : vector<4xf32> to vector<1x4xf32>
    %cst_115 = arith.constant 2.560000e+02 : f32
    %80 = vector.broadcast %cst_115 : f32 to vector<1x4xf32>
    %81 = arith.divf %79, %80 : vector<1x4xf32>
    %82 = vector.broadcast %81 : vector<1x4xf32> to vector<256x4xf32>
    %83 = arith.subf %77, %82 : vector<256x4xf32>
    %84 = arith.mulf %83, %83 : vector<256x4xf32>
    %cst_116 = arith.constant dense<0.000000e+00> : vector<4xf32>
    %85 = vector.multi_reduction <add>, %84, %cst_116 [0] : vector<256x4xf32> to vector<4xf32>
    %86 = vector.shape_cast %85 : vector<4xf32> to vector<1x4xf32>
    %cst_117 = arith.constant 2.560000e+02 : f32
    %87 = vector.broadcast %cst_117 : f32 to vector<1x4xf32>
    %88 = arith.divf %86, %87 : vector<1x4xf32>
    %cst_118 = arith.constant 9.99999974E-6 : f32
    %89 = vector.broadcast %cst_118 : f32 to vector<1x4xf32>
    %90 = arith.addf %88, %89 : vector<1x4xf32>
    %91 = math.rsqrt %90 : vector<1x4xf32>
    %c0_119 = arith.constant 0 : index
    %c0_120 = arith.constant 0 : index
    %92 = vector.load %arg8[%c0_119, %c0_120] : memref<1x4xf32, #tpu.memory_space<vmem>>, vector<1x4xf32>
    %93 = arith.mulf %91, %92 : vector<1x4xf32>
    %94 = vector.broadcast %81 : vector<1x4xf32> to vector<256x4xf32>
    %95 = arith.subf %77, %94 : vector<256x4xf32>
    %96 = vector.broadcast %93 : vector<1x4xf32> to vector<256x4xf32>
    %97 = arith.mulf %95, %96 : vector<256x4xf32>
    %c0_121 = arith.constant 0 : index
    %c0_122 = arith.constant 0 : index
    %98 = vector.load %arg9[%c0_121, %c0_122] : memref<1x4xf32, #tpu.memory_space<vmem>>, vector<1x4xf32>
    %99 = vector.broadcast %98 : vector<1x4xf32> to vector<256x4xf32>
    %100 = arith.addf %97, %99 : vector<256x4xf32>
    %c0_123 = arith.constant 0 : index
    %c0_124 = arith.constant 0 : index
    %c0_125 = arith.constant 0 : index
    %c0_126 = arith.constant 0 : index
    %101 = vector.load %arg1[%c0_123, %c0_124, %c0_125, %c0_126] : memref<1x16x16x4xf32, #tpu.memory_space<vmem>>, vector<1x16x16x4xf32>
    %102 = vector.shape_cast %101 : vector<1x16x16x4xf32> to vector<16x16x4xf32>
    %103 = vector.shape_cast %100 : vector<256x4xf32> to vector<16x16x4xf32>
    %104 = arith.addf %103, %102 : vector<16x16x4xf32>
    %c0_127 = arith.constant 0 : index
    %c0_128 = arith.constant 0 : index
    %c0_129 = arith.constant 0 : index
    %c0_130 = arith.constant 0 : index
    %105 = vector.load %arg10[%c0_127, %c0_128, %c0_129, %c0_130] : memref<1x16x16x4xf32, #tpu.memory_space<vmem>>, vector<1x16x16x4xf32>
    %106 = vector.shape_cast %105 : vector<1x16x16x4xf32> to vector<16x16x4xf32>
    %107 = vector.shape_cast %104 : vector<16x16x4xf32> to vector<1x16x16x4xf32>
    tpu.vector_store %arg10[%c0_127, %c0_128, %c0_129, %c0_130], %107 {strides = array<i32>} : memref<1x16x16x4xf32, #tpu.memory_space<vmem>>, vector<1x16x16x4xf32>,
    return
  }
  func.func @transform_0(%arg0: i32) -> (i32, i32, i32, i32) {
    %c0_i32 = arith.constant 0 : i32
    %c0_i32_0 = arith.constant 0 : i32
    %c0_i32_1 = arith.constant 0 : i32
    %c0_i32_2 = arith.constant 0 : i32
    return %arg0, %c0_i32, %c0_i32_0, %c0_i32_1 : i32, i32, i32, i32
  }
  func.func @transform_1(%arg0: i32) -> (i32, i32) {
    %c0_i32 = arith.constant 0 : i32
    %c0_i32_0 = arith.constant 0 : i32
    %c0_i32_1 = arith.constant 0 : i32
    return %c0_i32, %c0_i32_0 : i32, i32
  }
  func.func @transform_2(%arg0: i32) -> (i32, i32) {
    %c0_i32 = arith.constant 0 : i32
    %c0_i32_0 = arith.constant 0 : i32
    %c0_i32_1 = arith.constant 0 : i32
    return %c0_i32, %c0_i32_0 : i32, i32
  }
  func.func @transform_3(%arg0: i32) -> (i32, i32) {
    %c0_i32 = arith.constant 0 : i32
    %c0_i32_0 = arith.constant 0 : i32
    %c0_i32_1 = arith.constant 0 : i32
    return %c0_i32, %c0_i32_0 : i32, i32
  }
  func.func @transform_4(%arg0: i32) -> (i32, i32) {
    %c0_i32 = arith.constant 0 : i32
    %c0_i32_0 = arith.constant 0 : i32
    %c0_i32_1 = arith.constant 0 : i32
    return %c0_i32, %c0_i32_0 : i32, i32
  }
  func.func @transform_5(%arg0: i32) -> (i32, i32) {
    %c0_i32 = arith.constant 0 : i32
    %c0_i32_0 = arith.constant 0 : i32
    %c0_i32_1 = arith.constant 0 : i32
    return %c0_i32, %c0_i32_0 : i32, i32
  }
  func.func @transform_6(%arg0: i32) -> (i32, i32) {
    %c0_i32 = arith.constant 0 : i32
    %c0_i32_0 = arith.constant 0 : i32
    %c0_i32_1 = arith.constant 0 : i32
    return %c0_i32, %c0_i32_0 : i32, i32
  }
  func.func @transform_7(%arg0: i32) -> (i32, i32) {
    %c0_i32 = arith.constant 0 : i32
    %c0_i32_0 = arith.constant 0 : i32
    %c0_i32_1 = arith.constant 0 : i32
    return %c0_i32, %c0_i32_0 : i32, i32
  }
  func.func @transform_8(%arg0: i32) -> (i32, i32) {
    %c0_i32 = arith.constant 0 : i32
    %c0_i32_0 = arith.constant 0 : i32
    %c0_i32_1 = arith.constant 0 : i32
    return %c0_i32, %c0_i32_0 : i32, i32
  }
  func.func @transform_9(%arg0: i32) -> (i32, i32, i32, i32) {
    %c0_i32 = arith.constant 0 : i32
    %c0_i32_0 = arith.constant 0 : i32
    %c0_i32_1 = arith.constant 0 : i32
    %c0_i32_2 = arith.constant 0 : i32
    return %arg0, %c0_i32, %c0_i32_0, %c0_i32_1 : i32, i32, i32, i32
  }
}

</mosaic_0001>

<bundles_post_ra>
// kernel: tpu_custom_call.1
= control target key start
LH: loop header
LB: loop body
LE: loop exit
PB: predicated region body
PF: predicated region fallthrough
CT: control target
= control target key end

     0   :  { %s5512_s30 = smov 0   ;;  %s8830_s0 = inlined_call_operand.vmem [shape: f32[2,16,16,4], index: 0, kind: input, shape index: {}]   ;;  %s8831_s1 = inlined_call_operand.vmem [shape: f32[36,4], index: 1, kind: input, shape index: {}]   ;;  %s8832_s2 = inlined_call_operand.vmem [shape: f32[1,4], index: 2, kind: input, shape index: {}]   ;;  %s8833_s3 = inlined_call_operand.vmem [shape: f32[1,4], index: 3, kind: input, shape index: {}]   ;;  %s8834_s4 = inlined_call_operand.vmem [shape: f32[1,4], index: 4, kind: input, shape index: {}]   ;;  %s8835_s5 = inlined_call_operand.vmem [shape: f32[36,4], index: 5, kind: input, shape index: {}]   ;;  %s8836_s6 = inlined_call_operand.vmem [shape: f32[1,4], index: 6, kind: input, shape index: {}]   ;;  %s8837_s7 = inlined_call_operand.vmem [shape: f32[1,4], index: 7, kind: input, shape index: {}]   ;;  %s8838_s8 = inlined_call_operand.vmem [shape: f32[1,4], index: 8, kind: input, shape index: {}]   ;;  %s8839_s9 = inlined_call_operand.vmem [shape: f32[2,16,16,4], index: 9, kind: output, shape index: {}]  }
   0x1 LB: > { %s5153_s10 = sadd.s32 4294967295, %s5452_s30   ;;  %p5157_p0 = scmp.ge.s32.totalorder %s5452_s30, 1  ;;  %s5452_s30 = sphi %s5512_s30, %s19_s30  }
   0x2   : > { %p287_p1 = scmp.lt.s32.totalorder %s5452_s30, 3 }
   0x4   : > { %p288_p2 = pnand %p5157_p0, %p287_p1 }
   0x6   : > { %291 = sbr.rel (%p288_p2) target bundleno = 1973 (0x7b5), region = 56 }
   0xb   : > { %p323_p3 = scmp.lt.s32.totalorder %s5153_s10, 1  ;;  %vm366_vm0 = vcmask 31744   ;;  %s5454_s15 = smov 4   ;;  %vm422_vm1 = vcmask 24576   ;;  %vm2162_vm2 = vcmask 1043456   ;;  %vm1822_vm3 = vcmask 64512  }
   0xc   : > { %s5455_s16 = smov 8   ;;  %s5456_s17 = smov 12   ;;  %vm1855_vm4 = vcmask 97280   ;;  %vm1888_vm5 = vcmask 130048   ;;  %vm1921_vm6 = vcmask 162816   ;;  %vm1954_vm7 = vcmask 195584  }
   0xd   : > { %s8923_s10 = smov (!%p323_p3, %s5153_s10), 1  ;;  %s5457_s18 = smov 16   ;;  %vm1987_vm8 = vcmask 228352   ;;  %vm2020_vm9 = vcmask 261120   ;;  %vm2065_vm10 = vcmask 293888  }
   0xe   : > { %s5234_s11 = sshll.u32 %s8923_s10, 8  ;;  %s5458_s19 = smov 20  }
   0xf   : > { %s5528_s14 = scalar_lea.vmem %s8830_s0, %s5234_s11  ;;  %s5459_s24 = smov 24  }
  0x10   : > { %v335_v0 = vld [vmem:[%s5528_s14 + $0x10] sm:$0xff]  ;;  %v333_v1 = vld [vmem:[%s5528_s14] sm:$0xff]  ;;  %v336_v2 = vld [vmem:[%s5528_s14 + $0x18] sm:$0xff]  ;;  %s5460_s29 = smov 28   ;;  %s5461_s20 = smov 32  }
  0x11   : > { %399 = vst.msk [vmem:[#allocation2 + $0x1] sm:$0xff] %vm366_vm0, %v335_v0  ;;  %369 = vst.msk [vmem:[#allocation2 + $0x31] sm:$0xff] %vm366_vm0, %v335_v0  ;;  %v334_v3 = vld [vmem:[%s5528_s14 + $0x8] sm:$0xff]  ;;  %v337_v4 = vld [vmem:[%s5528_s14 + $0x20] sm:$0xff]  ;;  %s8715_s28 = scalar_lea.vmem %s8839_s9, %s5234_s11 }
  0x12   : > { %367 = vst.msk [vmem:[#allocation2 + $0x19] sm:$0xff] %vm366_vm0, %v333_v1  ;;  %400 = vst.msk [vmem:[#allocation2 + $0x9] sm:$0xff] %vm366_vm0, %v336_v2  ;;  %v338_v5 = vld [vmem:[%s5528_s14 + $0x28] sm:$0xff]  ;;  %v339_v6 = vld [vmem:[%s5528_s14 + $0x30] sm:$0xff] }
  0x13   : > { %370 = vst.msk [vmem:[#allocation2 + $0x39] sm:$0xff] %vm366_vm0, %v336_v2  ;;  %368 = vst.msk [vmem:[#allocation2 + $0x21] sm:$0xff] %vm366_vm0, %v334_v3  ;;  %v340_v7 = vld [vmem:[%s5528_s14 + $0x38] sm:$0xff]  ;;  %v341_v8 = vld [vmem:[%s5528_s14 + $0x40] sm:$0xff] }
  0x14   : > { %371 = vst.msk [vmem:[#allocation2 + $0x49] sm:$0xff] %vm366_vm0, %v337_v4  ;;  %372 = vst.msk [vmem:[#allocation2 + $0x51] sm:$0xff] %vm366_vm0, %v338_v5  ;;  %v342_v9 = vld [vmem:[%s5528_s14 + $0x48] sm:$0xff]  ;;  %v343_v10 = vld [vmem:[%s5528_s14 + $0x50] sm:$0xff] }
  0x15   : > { %373 = vst.msk [vmem:[#allocation2 + $0x61] sm:$0xff] %vm366_vm0, %v339_v6  ;;  %374 = vst.msk [vmem:[#allocation2 + $0x69] sm:$0xff] %vm366_vm0, %v340_v7  ;;  %v344_v11 = vld [vmem:[%s5528_s14 + $0x58] sm:$0xff]  ;;  %v345_v12 = vld [vmem:[%s5528_s14 + $0x60] sm:$0xff] }
  0x16   : > { %375 = vst.msk [vmem:[#allocation2 + $0x79] sm:$0xff] %vm366_vm0, %v341_v8  ;;  %376 = vst.msk [vmem:[#allocation2 + $0x81] sm:$0xff] %vm366_vm0, %v342_v9  ;;  %v346_v13 = vld [vmem:[%s5528_s14 + $0x68] sm:$0xff]  ;;  %v347_v14 = vld [vmem:[%s5528_s14 + $0x70] sm:$0xff] }
  0x17   : > { %377 = vst.msk [vmem:[#allocation2 + $0x91] sm:$0xff] %vm366_vm0, %v343_v10  ;;  %378 = vst.msk [vmem:[#allocation2 + $0x99] sm:$0xff] %vm366_vm0, %v344_v11  ;;  %v348_v15 = vld [vmem:[%s5528_s14 + $0x78] sm:$0xff]  ;;  %v349_v16 = vld [vmem:[%s5528_s14 + $0x80] sm:$0xff] }
  0x18   : > { %379 = vst.msk [vmem:[#allocation2 + $0xa9] sm:$0xff] %vm366_vm0, %v345_v12  ;;  %380 = vst.msk [vmem:[#allocation2 + $0xb1] sm:$0xff] %vm366_vm0, %v346_v13  ;;  %v350_v17 = vld [vmem:[%s5528_s14 + $0x88] sm:$0xff]  ;;  %v351_v18 = vld [vmem:[%s5528_s14 + $0x90] sm:$0xff] }
  0x19   : > { %381 = vst.msk [vmem:[#allocation2 + $0xc1] sm:$0xff] %vm366_vm0, %v347_v14  ;;  %382 = vst.msk [vmem:[#allocation2 + $0xc9] sm:$0xff] %vm366_vm0, %v348_v15  ;;  %v352_v19 = vld [vmem:[%s5528_s14 + $0x98] sm:$0xff]  ;;  %v353_v20 = vld [vmem:[%s5528_s14 + $0xa0] sm:$0xff] }
  0x1a   : > { %383 = vst.msk [vmem:[#allocation2 + $0xd9] sm:$0xff] %vm366_vm0, %v349_v16  ;;  %384 = vst.msk [vmem:[#allocation2 + $0xe1] sm:$0xff] %vm366_vm0, %v350_v17  ;;  %v354_v21 = vld [vmem:[%s5528_s14 + $0xa8] sm:$0xff]  ;;  %v355_v22 = vld [vmem:[%s5528_s14 + $0xb0] sm:$0xff] }
  0x1b   : > { %385 = vst.msk [vmem:[#allocation2 + $0xf1] sm:$0xff] %vm366_vm0, %v351_v18  ;;  %386 = vst.msk [vmem:[#allocation2 + $0xf9] sm:$0xff] %vm366_vm0, %v352_v19  ;;  %v356_v23 = vld [vmem:[%s5528_s14 + $0xb8] sm:$0xff]  ;;  %v509_v24 = vld [vmem:[#allocation2 + $0x1] sm:$0xff] }
  0x1c   : > { %387 = vst.msk [vmem:[#allocation2 + $0x109] sm:$0xff] %vm366_vm0, %v353_v20  ;;  %v5577_v25 = vld [vmem:[#allocation2 + $0x19] sm:$0xff]  ;;  %388 = vst.msk [vmem:[#allocation2 + $0x111] sm:$0xff] %vm366_vm0, %v354_v21  ;;  %798 = vrot.lane.b32.xlu0 %v509_v24, %s5454_s15  ;;  %v510_v26 = vld [vmem:[#allocation2 + $0x9] sm:$0xff] }
  0x1d   : > { %389 = vst.msk [vmem:[#allocation2 + $0x121] sm:$0xff] %vm366_vm0, %v355_v22  ;;  %390 = vst.msk [vmem:[#allocation2 + $0x129] sm:$0xff] %vm366_vm0, %v356_v23  ;;  %802 = vrot.lane.b32.xlu1 %v5577_v25, %s5454_s15  ;;  %v5585_v27 = vld [vmem:[#allocation2 + $0x21] sm:$0xff]  ;;  %v5590_v28 = vld [vmem:[#allocation2 + $0x31] sm:$0xff] }
  0x1e   : > { %v5592_v29 = vld [vmem:[#allocation2 + $0x39] sm:$0xff]  ;;  %v5594_v30 = vld [vmem:[#allocation2 + $0x49] sm:$0xff]  ;;  %v5601_v32 = vld [vmem:[#allocation2 + $0x51] sm:$0xff] }
  0x1f   : > { %v357_v31 = vld [vmem:[%s5528_s14 + $0xc0] sm:$0xff]  ;;  %v358_v33 = vld [vmem:[%s5528_s14 + $0xc8] sm:$0xff]  ;;  %v359_v34 = vld [vmem:[%s5528_s14 + $0xd0] sm:$0xff] }
  0x20   : > { %800 = vrot.lane.b32.xlu0 %v510_v26, %s5454_s15  ;;  %391 = vst.msk [vmem:[#allocation2 + $0x139] sm:$0xff] %vm366_vm0, %v357_v31  ;;  %392 = vst.msk [vmem:[#allocation2 + $0x141] sm:$0xff] %vm366_vm0, %v358_v33  ;;  %v360_v35 = vld [vmem:[%s5528_s14 + $0xd8] sm:$0xff]  ;;  %v361_v36 = vld [vmem:[%s5528_s14 + $0xe0] sm:$0xff] }
  0x21   : > { %804 = vrot.lane.b32.xlu1 %v5585_v27, %s5454_s15  ;;  %393 = vst.msk [vmem:[#allocation2 + $0x151] sm:$0xff] %vm366_vm0, %v359_v34  ;;  %v362_v37 = vld [vmem:[%s5528_s14 + $0xe8] sm:$0xff]  ;;  %394 = vst.msk [vmem:[#allocation2 + $0x159] sm:$0xff] %vm366_vm0, %v360_v35  ;;  %v442_v39 = vld [vmem:[#allocation2 + $0x27] sm:$0x1] }
  0x22   : > { %395 = vst.msk [vmem:[#allocation2 + $0x169] sm:$0xff] %vm366_vm0, %v361_v36  ;;  %402 = vst.msk [vmem:[#allocation2 + $0x199] sm:$0xff] %vm366_vm0, %v361_v36  ;;  %v441_v38 = vld [vmem:[#allocation2 + $0xf] sm:$0x1]  ;;  %v443_v40 = vld [vmem:[#allocation2 + $0x3f] sm:$0x1] }
  0x23   : > { %396 = vst.msk [vmem:[#allocation2 + $0x171] sm:$0xff] %vm366_vm0, %v362_v37  ;;  %403 = vst.msk [vmem:[#allocation2 + $0x1a1] sm:$0xff] %vm366_vm0, %v362_v37  ;;  %v444_v41 = vld [vmem:[#allocation2 + $0x57] sm:$0x1]  ;;  %v445_v42 = vld [vmem:[#allocation2 + $0x6f] sm:$0x1] }
  0x24   : > { %806 = vrot.lane.b32.xlu0 %v5590_v28, %s5454_s15  ;;  %459 = vst.msk [vmem:[#allocation2 + $0x11] sm:$0x1] %vm422_vm1, %v441_v38  ;;  %460 = vst.msk [vmem:[#allocation2 + $0x29] sm:$0x1] %vm422_vm1, %v442_v39  ;;  %v5623_v43 = vld [vmem:[#allocation2 + $0x61] sm:$0xff]  ;;  %v5625_v44 = vld [vmem:[#allocation2 + $0x69] sm:$0xff] }
  0x25   : > { %808 = vrot.lane.b32.xlu1 %v5592_v29, %s5454_s15  ;;  %461 = vst.msk [vmem:[#allocation2 + $0x41] sm:$0x1] %vm422_vm1, %v443_v40  ;;  %462 = vst.msk [vmem:[#allocation2 + $0x59] sm:$0x1] %vm422_vm1, %v444_v41  ;;  %v446_v45 = vld [vmem:[#allocation2 + $0x87] sm:$0x1] }
  0x26   : > { %463 = vst.msk [vmem:[#allocation2 + $0x71] sm:$0x1] %vm422_vm1, %v445_v42  ;;  %464 = vst.msk [vmem:[#allocation2 + $0x89] sm:$0x1] %vm422_vm1, %v446_v45  ;;  %v447_v46 = vld [vmem:[#allocation2 + $0x9f] sm:$0x1] }
  0x27   : > { %v448_v47 = vld [vmem:[#allocation2 + $0xb7] sm:$0x1]  ;;  %465 = vst.msk [vmem:[#allocation2 + $0xa1] sm:$0x1] %vm422_vm1, %v447_v46  ;;  %v449_v48 = vld [vmem:[#allocation2 + $0xcf] sm:$0x1] }
  0x28   : > { %810 = vrot.lane.b32.xlu0 %v5594_v30, %s5454_s15  ;;  %466 = vst.msk [vmem:[#allocation2 + $0xb9] sm:$0x1] %vm422_vm1, %v448_v47  ;;  %467 = vst.msk [vmem:[#allocation2 + $0xd1] sm:$0x1] %vm422_vm1, %v449_v48  ;;  %v5637_v49 = vld [vmem:[#allocation2 + $0x79] sm:$0xff]  ;;  %v5639_v50 = vld [vmem:[#allocation2 + $0x81] sm:$0xff] }
  0x29   : > { %812 = vrot.lane.b32.xlu1 %v5601_v32, %s5454_s15  ;;  %v450_v51 = vld [vmem:[#allocation2 + $0xe7] sm:$0x1]  ;;  %v451_v52 = vld [vmem:[#allocation2 + $0xff] sm:$0x1]  ;;  %v5647_v53 = vld [vmem:[#allocation2 + $0x91] sm:$0xff] }
  0x2a   : > { %468 = vst.msk [vmem:[#allocation2 + $0xe9] sm:$0x1] %vm422_vm1, %v450_v51  ;;  %469 = vst.msk [vmem:[#allocation2 + $0x101] sm:$0x1] %vm422_vm1, %v451_v52  ;;  %v5649_v54 = vld [vmem:[#allocation2 + $0x99] sm:$0xff]  ;;  %v5658_v60 = vld [vmem:[#allocation2 + $0xa9] sm:$0xff] }
  0x2b   : > { %v452_v55 = vld [vmem:[#allocation2 + $0x117] sm:$0x1]  ;;  %v405_v56 = vld [vmem:[#allocation2 + $0x1a] sm:$0x1]  ;;  %v404_v57 = vld [vmem:[#allocation2 + $0x2] sm:$0x1] }
  0x2c   : > { %814 = vrot.lane.b32.xlu0 %v5623_v43, %s5454_s15  ;;  %470 = vst.msk [vmem:[#allocation2 + $0x119] sm:$0x1] %vm422_vm1, %v452_v55  ;;  %424 = vst.msk [vmem:[#allocation2 + $0x18] sm:$0x1] %vm422_vm1, %v405_v56  ;;  %v406_v58 = vld [vmem:[#allocation2 + $0x32] sm:$0x1] }
  0x2d   : > { %816 = vrot.lane.b32.xlu1 %v5625_v44, %s5454_s15  ;;  %423 = vst.msk [vmem:[#allocation2] sm:$0x1] %vm422_vm1, %v404_v57  ;;  %v407_v59 = vld [vmem:[#allocation2 + $0x4a] sm:$0x1]  ;;  %v524_v61 = vld [vmem:[#allocation2 + $0xb1] sm:$0xff]  ;;  %v525_v3 = vld [vmem:[#allocation2 + $0xc1] sm:$0xff] }
  0x2e   : > { %425 = vst.msk [vmem:[#allocation2 + $0x30] sm:$0x1] %vm422_vm1, %v406_v58  ;;  %426 = vst.msk [vmem:[#allocation2 + $0x48] sm:$0x1] %vm422_vm1, %v407_v59  ;;  %v408_v62 = vld [vmem:[#allocation2 + $0x62] sm:$0x1] }
  0x2f   : > { %427 = vst.msk [vmem:[#allocation2 + $0x60] sm:$0x1] %vm422_vm1, %v408_v62  ;;  %v409_v63 = vld [vmem:[#allocation2 + $0x7a] sm:$0x1]  ;;  %v410_v0 = vld [vmem:[#allocation2 + $0x92] sm:$0x1] }
  0x30   : > { %818 = vrot.lane.b32.xlu0 %v5637_v49, %s5454_s15  ;;  %428 = vst.msk [vmem:[#allocation2 + $0x78] sm:$0x1] %vm422_vm1, %v409_v63  ;;  %429 = vst.msk [vmem:[#allocation2 + $0x90] sm:$0x1] %vm422_vm1, %v410_v0  ;;  %v411_v1 = vld [vmem:[#allocation2 + $0xaa] sm:$0x1] }
  0x31   : > { %820 = vrot.lane.b32.xlu1 %v5639_v50, %s5454_s15  ;;  %v412_v2 = vld [vmem:[#allocation2 + $0xc2] sm:$0x1]  ;;  %v526_v4 = vld [vmem:[#allocation2 + $0xc9] sm:$0xff]  ;;  %430 = vst.msk [vmem:[#allocation2 + $0xa8] sm:$0x1] %vm422_vm1, %v411_v1  ;;  %v527_v8 = vld [vmem:[#allocation2 + $0xd9] sm:$0xff] }
  0x32   : > { %431 = vst.msk [vmem:[#allocation2 + $0xc0] sm:$0x1] %vm422_vm1, %v412_v2  ;;  %v413_v5 = vld [vmem:[#allocation2 + $0xda] sm:$0x1]  ;;  %v414_v6 = vld [vmem:[#allocation2 + $0xf2] sm:$0x1] }
  0x33   : > { %432 = vst.msk [vmem:[#allocation2 + $0xd8] sm:$0x1] %vm422_vm1, %v413_v5  ;;  %433 = vst.msk [vmem:[#allocation2 + $0xf0] sm:$0x1] %vm422_vm1, %v414_v6  ;;  %v415_v7 = vld [vmem:[#allocation2 + $0x10a] sm:$0x1] }
  0x34   : > { %822 = vrot.lane.b32.xlu0 %v5647_v53, %s5454_s15  ;;  %434 = vst.msk [vmem:[#allocation2 + $0x108] sm:$0x1] %vm422_vm1, %v415_v7  ;;  %v528_v9 = vld [vmem:[#allocation2 + $0xe1] sm:$0xff]  ;;  %v417_v11 = vld [vmem:[#allocation2 + $0x13a] sm:$0x1]  ;;  %v529_v13 = vld [vmem:[#allocation2 + $0xf1] sm:$0xff] }
  0x35   : > { %824 = vrot.lane.b32.xlu1 %v5649_v54, %s5454_s15  ;;  %v416_v10 = vld [vmem:[#allocation2 + $0x122] sm:$0x1]  ;;  %436 = vst.msk [vmem:[#allocation2 + $0x138] sm:$0x1] %vm422_vm1, %v417_v11  ;;  %v418_v12 = vld [vmem:[#allocation2 + $0x152] sm:$0x1] }
  0x36   : > { %435 = vst.msk [vmem:[#allocation2 + $0x120] sm:$0x1] %vm422_vm1, %v416_v10  ;;  %437 = vst.msk [vmem:[#allocation2 + $0x150] sm:$0x1] %vm422_vm1, %v418_v12  ;;  %v530_v14 = vld [vmem:[#allocation2 + $0xf9] sm:$0xff]  ;;  %v531_v16 = vld [vmem:[#allocation2 + $0x109] sm:$0xff] }
  0x37   : > { %v419_v15 = vld [vmem:[#allocation2 + $0x16a] sm:$0x1]  ;;  %v532_v17 = vld [vmem:[#allocation2 + $0x111] sm:$0xff]  ;;  %v533_v18 = vld [vmem:[#allocation2 + $0x121] sm:$0xff] }
  0x38   : > { %826 = vrot.lane.b32.xlu0 %v5658_v60, %s5454_s15  ;;  %438 = vst.msk [vmem:[#allocation2 + $0x168] sm:$0x1] %vm422_vm1, %v419_v15  ;;  %v534_v19 = vld [vmem:[#allocation2 + $0x129] sm:$0xff]  ;;  %v535_v20 = vld [vmem:[#allocation2 + $0x139] sm:$0xff]  ;;  %v536_v21 = vld [vmem:[#allocation2 + $0x141] sm:$0xff] }
  0x39   : > { %828 = vrot.lane.b32.xlu1 %v524_v61, %s5454_s15  ;;  %v537_v22 = vld [vmem:[#allocation2 + $0x151] sm:$0xff]  ;;  %v538_v23 = vld [vmem:[#allocation2 + $0x159] sm:$0xff]  ;;  %v539_v24 = vld [vmem:[#allocation2 + $0x169] sm:$0xff] }
  0x3a   : > { %v540_v26 = vld [vmem:[#allocation2 + $0x171] sm:$0xff]  ;;  %v541_v31 = vld [vmem:[#allocation2 + $0x2] sm:$0xff]  ;;  %v543_v34 = vld [vmem:[#allocation2 + $0x1a] sm:$0xff] }
  0x3b   : > { %v542_v33 = vld [vmem:[#allocation2 + $0xa] sm:$0xff]  ;;  %v544_v35 = vld [vmem:[#allocation2 + $0x22] sm:$0xff]  ;;  %v5697_v36 = vld [vmem:[#allocation2 + $0x32] sm:$0xff] }
  0x3c   : > { %830 = vrot.lane.b32.xlu0 %v525_v3, %s5454_s15  ;;  %v5699_v37 = vld [vmem:[#allocation2 + $0x3a] sm:$0xff]  ;;  %v5705_v38 = vld [vmem:[#allocation2 + $0x4a] sm:$0xff]  ;;  %v5707_v39 = vld [vmem:[#allocation2 + $0x52] sm:$0xff] }
  0x3d   : > { %832 = vrot.lane.b32.xlu1 %v526_v4, %s5454_s15  ;;  %v5713_v40 = vld [vmem:[#allocation2 + $0x62] sm:$0xff]  ;;  %v5715_v41 = vld [vmem:[#allocation2 + $0x6a] sm:$0xff]  ;;  %v5721_v42 = vld [vmem:[#allocation2 + $0x7a] sm:$0xff] }
  0x3e   : > { %v5723_v45 = vld [vmem:[#allocation2 + $0x82] sm:$0xff]  ;;  %v5729_v46 = vld [vmem:[#allocation2 + $0x92] sm:$0xff]  ;;  %v5731_v47 = vld [vmem:[#allocation2 + $0x9a] sm:$0xff] }
  0x3f   : > { %v5737_v48 = vld [vmem:[#allocation2 + $0xaa] sm:$0xff]  ;;  %v5739_v51 = vld [vmem:[#allocation2 + $0xb2] sm:$0xff]  ;;  %v5745_v52 = vld [vmem:[#allocation2 + $0xc2] sm:$0xff] }
  0x40   : > { %834 = vrot.lane.b32.xlu0 %v527_v8, %s5454_s15  ;;  %v5747_v55 = vld [vmem:[#allocation2 + $0xca] sm:$0xff]  ;;  %v5753_v56 = vld [vmem:[#allocation2 + $0xda] sm:$0xff]  ;;  %v560_v57 = vld [vmem:[#allocation2 + $0xe2] sm:$0xff] }
  0x41   : > { %836 = vrot.lane.b32.xlu1 %v528_v9, %s5454_s15  ;;  %v561_v58 = vld [vmem:[#allocation2 + $0xf2] sm:$0xff]  ;;  %v562_v59 = vld [vmem:[#allocation2 + $0xfa] sm:$0xff]  ;;  %v563_v61 = vld [vmem:[#allocation2 + $0x10a] sm:$0xff] }
  0x42   : > { %v564_v62 = vld [vmem:[#allocation2 + $0x112] sm:$0xff]  ;;  %v5762_v63 = vld [vmem:[#allocation2 + $0x20] sm:$0xff]  ;;  %v2054_v12 = vld [vmem:[%s8831_s1 + $0x8] sm:$0xff] }
  0x43   : > { %v5764_v0 = vld [vmem:[#allocation2 + $0x18] sm:$0xff]  ;;  %v2057_v5 = vld [vmem:[%s8831_s1 + $0x20] sm:$0xf]  ;;  %v5787_v6 = vld [vmem:[#allocation2 + $0x30] sm:$0xff] }
  0x44   : > { %838 = vrot.lane.b32.xlu0 %v529_v13, %s5454_s15  ;;  %5310 = vmatprep.subr.msk.mxu0 %vm2162_vm2, %v2057_v5  ;;  %v2056_v7 = vld [vmem:[%s8831_s1 + $0x18] sm:$0xff]  ;;  %v2055_v8 = vld [vmem:[%s8831_s1 + $0x10] sm:$0xff]  ;;  %v2053_v15 = vld [vmem:[%s8831_s1] sm:$0xff] }
  0x45   : > { %840 = vrot.lane.b32.xlu1 %v530_v14, %s5454_s15  ;;  %5311 = vmatpush3.msk.msra.mxu0 %vm2162_vm2, %v2057_v5  ;;  %v5809_v11 = vld [vmem:[#allocation2 + $0x38] sm:$0xff] }
  0x46   : > { %5312 = vmatprep.subr.mxu0 %v2056_v7 }
  0x47   : > { %5313 = vmatpush3.msra.mxu0 %v2056_v7 }
  0x48   : > { %842 = vrot.lane.b32.xlu0 %v531_v16, %s5454_s15  ;;  %5314 = vmatprep.subr.mxu0 %v2055_v8 }
  0x49   : > { %844 = vrot.lane.b32.xlu1 %v532_v17, %s5454_s15  ;;  %5315 = vmatpush3.msra.mxu0 %v2055_v8 }
  0x4a   : > { %5316 = vmatprep.subr.mxu0 %v2054_v12 }
  0x4b   : > { %5317 = vmatpush3.msra.mxu0 %v2054_v12 }
  0x4c   : > { %846 = vrot.lane.b32.xlu0 %v533_v18, %s5454_s15  ;;  %5318 = vmatprep.subr.mxu0 %v2053_v15 }
  0x4d   : > { %848 = vrot.lane.b32.xlu1 %v534_v19, %s5454_s15  ;;  %5319 = vmatpush3.msra.mxu0 %v2053_v15 }
  0x50   : > { %850 = vrot.lane.b32.xlu0 %v535_v20, %s5454_s15 }
  0x51   : > { %852 = vrot.lane.b32.xlu1 %v536_v21, %s5454_s15 }
  0x54   : > { %854 = vrot.lane.b32.xlu0 %v537_v22, %s5454_s15 }
  0x55   : > { %856 = vrot.lane.b32.xlu1 %v538_v23, %s5454_s15  ;;  %v5857_v23 = vld [vmem:[#allocation2 + $0x48] sm:$0xff] }
  0x58   : > { %858 = vrot.lane.b32.xlu0 %v539_v24, %s5454_s15 }
  0x59   : > { %860 = vrot.lane.b32.xlu1 %v540_v26, %s5454_s15  ;;  %v5867_v26 = vld [vmem:[#allocation2 + $0x50] sm:$0xff] }
  0x5c   : > { %926 = vrot.lane.b32.xlu0 %v541_v31, %s5455_s16 }
  0x5d   : > { %928 = vrot.lane.b32.xlu1 %v542_v33, %s5455_s16 }
  0x60   : > { %930 = vrot.lane.b32.xlu0 %v543_v34, %s5455_s16 }
  0x61   : > { %932 = vrot.lane.b32.xlu1 %v544_v35, %s5455_s16 }
  0x64   : > { %934 = vrot.lane.b32.xlu0 %v5697_v36, %s5455_s16 }
  0x65   : > { %936 = vrot.lane.b32.xlu1 %v5699_v37, %s5455_s16 }
  0x68   : > { %938 = vrot.lane.b32.xlu0 %v5705_v38, %s5455_s16 }
  0x69   : > { %940 = vrot.lane.b32.xlu1 %v5707_v39, %s5455_s16 }
  0x6c   : > { %942 = vrot.lane.b32.xlu0 %v5713_v40, %s5455_s16 }
  0x6d   : > { %944 = vrot.lane.b32.xlu1 %v5715_v41, %s5455_s16 }
  0x70   : > { %946 = vrot.lane.b32.xlu0 %v5721_v42, %s5455_s16 }
  0x71   : > { %948 = vrot.lane.b32.xlu1 %v5723_v45, %s5455_s16 }
  0x74   : > { %950 = vrot.lane.b32.xlu0 %v5729_v46, %s5455_s16 }
  0x75   : > { %952 = vrot.lane.b32.xlu1 %v5731_v47, %s5455_s16 }
  0x78   : > { %954 = vrot.lane.b32.xlu0 %v5737_v48, %s5455_s16 }
  0x79   : > { %956 = vrot.lane.b32.xlu1 %v5739_v51, %s5455_s16 }
  0x7c   : > { %958 = vrot.lane.b32.xlu0 %v5745_v52, %s5455_s16 }
  0x7d   : > { %960 = vrot.lane.b32.xlu1 %v5747_v55, %s5455_s16 }
  0x80   : > { %962 = vrot.lane.b32.xlu0 %v5753_v56, %s5455_s16 }
  0x81   : > { %964 = vrot.lane.b32.xlu1 %v560_v57, %s5455_s16 }
  0x84   : > { %966 = vrot.lane.b32.xlu0 %v561_v58, %s5455_s16 }
  0x85   : > { %968 = vrot.lane.b32.xlu1 %v562_v59, %s5455_s16 }
  0x88   : > { %970 = vrot.lane.b32.xlu0 %v563_v61, %s5455_s16  ;;  %v5909_v61 = vld [vmem:[#allocation2 + $0x60] sm:$0xff] }
  0x89   : > { %972 = vrot.lane.b32.xlu1 %v564_v62, %s5455_s16  ;;  %v5919_v62 = vld [vmem:[#allocation2 + $0x68] sm:$0xff] }
  0x8c   : > { %1054 = vrot.lane.b32.xlu0 %v5764_v0, %s5456_s17 }
  0x8d   : > { %1056 = vrot.lane.b32.xlu1 %v5762_v63, %s5456_s17 }
  0x8e   : > { %v5770_v1 = vpop.permute.xlu0 %798 }
  0x8f   : > { %v5772_v2 = vpop.permute.xlu1 %802 }
  0x90   : > { %1182 = vrot.lane.b32.xlu0 %v5577_v25, %s5457_s18 }
  0x91   : > { %1184 = vrot.lane.b32.xlu1 %v5585_v27, %s5457_s18 }
  0x92   : > { %v5778_v3 = vpop.permute.xlu0 %800 }
  0x93   : > { %v5780_v4 = vpop.permute.xlu1 %804 }
  0x94   : > { %1310 = vrot.lane.b32.xlu0 %v543_v34, %s5458_s19 }
  0x95   : > { %1312 = vrot.lane.b32.xlu1 %v544_v35, %s5458_s19 }
  0x96   : > { %v5790_v27 = vpop.permute.xlu0 %806 }
  0x97   : > { %v5792_v25 = vpop.permute.xlu1 %808 }
  0x98   : > { %1438 = vrot.lane.b32.xlu0 %v5787_v6, %s5459_s24 }
  0x99   : > { %1058 = vrot.lane.b32.xlu1 %v5787_v6, %s5456_s17 }
  0x9a   : > { %v5805_v9 = vpop.permute.xlu0 %810 }
  0x9b   : > { %v5807_v10 = vpop.permute.xlu1 %812 }
  0x9c   : > { %1440 = vrot.lane.b32.xlu0 %v5809_v11, %s5459_s24 }
  0x9d   : > { %1566 = vrot.lane.b32.xlu1 %v5590_v28, %s5460_s29 }
  0x9e   : > { %v5818_v13 = vpop.permute.xlu0 %814 }
  0x9f   : > { %v5820_v14 = vpop.permute.xlu1 %816 }
  0xa0   : > { %1060 = vrot.lane.b32.xlu0 %v5809_v11, %s5456_s17 }
  0xa1   : > { %1186 = vrot.lane.b32.xlu1 %v5590_v28, %s5457_s18 }
  0xa2   : > { %v5829_v16 = vpop.permute.xlu0 %818 }
  0xa3   : > { %v5831_v17 = vpop.permute.xlu1 %820 }
  0xa4   : > { %1568 = vrot.lane.b32.xlu0 %v5592_v29, %s5460_s29 }
  0xa5   : > { %1694 = vrot.lane.b32.xlu1 %v5697_v36, %s5461_s20 }
  0xa6   : > { %v5837_v18 = vpop.permute.xlu0 %822 }
  0xa7   : > { %v5839_v19 = vpop.permute.xlu1 %824 }
  0xa8   : > { %1188 = vrot.lane.b32.xlu0 %v5592_v29, %s5457_s18 }
  0xa9   : > { %1314 = vrot.lane.b32.xlu1 %v5697_v36, %s5458_s19 }
  0xaa   : > { %v5845_v28 = vpop.permute.xlu0 %826 }
  0xab   : > { %8843 = vst [vmem:[#allocation3_spill] sm:$0xff] %v5845_v28  ;;  %v5847_v20 = vpop.permute.xlu1 %828  ;;  %v6060_v28 = vld [vmem:[#allocation2 + $0xb0] sm:$0xff] }
  0xac   : > { %8844 = vst [vmem:[#allocation4_spill] sm:$0xff] %v5847_v20  ;;  %1696 = vrot.lane.b32.xlu0 %v5699_v37, %s5461_s20 }
  0xad   : > { %1316 = vrot.lane.b32.xlu1 %v5699_v37, %s5458_s19 }
  0xae   : > { %v5853_v21 = vpop.permute.xlu0 %830 }
  0xaf   : > { %8845 = vst [vmem:[#allocation5_spill] sm:$0xff] %v5853_v21  ;;  %v5855_v22 = vpop.permute.xlu1 %832 }
  0xb0   : > { %8846 = vst [vmem:[#allocation6_spill] sm:$0xff] %v5855_v22  ;;  %1442 = vrot.lane.b32.xlu0 %v5857_v23, %s5459_s24  ;;  %v477_v22 = vld [vmem:[#allocation2] sm:$0xff] }
  0xb1   : > { %1062 = vrot.lane.b32.xlu1 %v5857_v23, %s5456_s17 }
  0xb2   : > { %v5863_v29 = vpop.permute.xlu0 %834 }
  0xb3   : > { %8847 = vst [vmem:[#allocation7_spill] sm:$0xff] %v5863_v29  ;;  %v5865_v24 = vpop.permute.xlu1 %836  ;;  %v6013_v29 = vld [vmem:[#allocation2 + $0x90] sm:$0xff] }
  0xb4   : > { %8848 = vst [vmem:[#allocation8_spill] sm:$0xff] %v5865_v24  ;;  %1444 = vrot.lane.b32.xlu0 %v5867_v26, %s5459_s24 }
  0xb5   : > { %1570 = vrot.lane.b32.xlu1 %v5594_v30, %s5460_s29 }
  0xb6   : > { %v5873_v31 = vpop.permute.xlu0 %838 }
  0xb7   : > { %8849 = vst [vmem:[#allocation9_spill] sm:$0xff] %v5873_v31  ;;  %v5875_v33 = vpop.permute.xlu1 %840 }
  0xb8   : > { %8850 = vst [vmem:[#allocation10_spill] sm:$0xff] %v5875_v33  ;;  %1064 = vrot.lane.b32.xlu0 %v5867_v26, %s5456_s17 }
  0xb9   : > { %1190 = vrot.lane.b32.xlu1 %v5594_v30, %s5457_s18 }
  0xba   : > { %v5881_v34 = vpop.permute.xlu0 %842 }
  0xbb   : > { %8851 = vst [vmem:[#allocation11_spill] sm:$0xff] %v5881_v34  ;;  %v5883_v35 = vpop.permute.xlu1 %844 }
  0xbc   : > { %8852 = vst [vmem:[#allocation12_spill] sm:$0xff] %v5883_v35  ;;  %1572 = vrot.lane.b32.xlu0 %v5601_v32, %s5460_s29 }
  0xbd   : > { %1698 = vrot.lane.b32.xlu1 %v5705_v38, %s5461_s20 }
  0xbe   : > { %v5889_v36 = vpop.permute.xlu0 %846 }
  0xbf   : > { %8853 = vst [vmem:[#allocation13_spill] sm:$0xff] %v5889_v36  ;;  %v5891_v37 = vpop.permute.xlu1 %848 }
  0xc0   : > { %8854 = vst [vmem:[#allocation14_spill] sm:$0xff] %v5891_v37  ;;  %1192 = vrot.lane.b32.xlu0 %v5601_v32, %s5457_s18 }
  0xc1   : > { %1318 = vrot.lane.b32.xlu1 %v5705_v38, %s5458_s19 }
  0xc2   : > { %v5897_v30 = vpop.permute.xlu0 %850 }
  0xc3   : > { %8855 = vst [vmem:[#allocation15_spill] sm:$0xff] %v5897_v30  ;;  %v5899_v57 = vpop.permute.xlu1 %852 }
  0xc4   : > { %8856 = vst [vmem:[#allocation16_spill] sm:$0xff] %v5899_v57  ;;  %1700 = vrot.lane.b32.xlu0 %v5707_v39, %s5461_s20  ;;  %v5971_v57 = vld [vmem:[#allocation2 + $0x80] sm:$0xff] }
  0xc5   : > { %1320 = vrot.lane.b32.xlu1 %v5707_v39, %s5458_s19 }
  0xc6   : > { %v5905_v58 = vpop.permute.xlu0 %854 }
  0xc7   : > { %8857 = vst [vmem:[#allocation17_spill] sm:$0xff] %v5905_v58  ;;  %v5907_v59 = vpop.permute.xlu1 %856  ;;  %v5961_v58 = vld [vmem:[#allocation2 + $0x78] sm:$0xff] }
  0xc8   : > { %8858 = vst [vmem:[#allocation18_spill] sm:$0xff] %v5907_v59  ;;  %1446 = vrot.lane.b32.xlu0 %v5909_v61, %s5459_s24 }
  0xc9   : > { %1066 = vrot.lane.b32.xlu1 %v5909_v61, %s5456_s17 }
  0xca   : > { %v5915_v32 = vpop.permute.xlu0 %858 }
  0xcb   : > { %8859 = vst [vmem:[#allocation19_spill] sm:$0xff] %v5915_v32  ;;  %v5917_v38 = vpop.permute.xlu1 %860 }
  0xcc   : > { %8860 = vst [vmem:[#allocation20_spill] sm:$0xff] %v5917_v38  ;;  %1448 = vrot.lane.b32.xlu0 %v5919_v62, %s5459_s24 }
  0xcd   : > { %1574 = vrot.lane.b32.xlu1 %v5623_v43, %s5460_s29 }
  0xce   : > { %v5925_v39 = vpop.permute.xlu0 %926 }
  0xcf   : > { %v5927_v5 = vpop.permute.xlu1 %928 }
  0xd0   : > { %1068 = vrot.lane.b32.xlu0 %v5919_v62, %s5456_s17 }
  0xd1   : > { %1194 = vrot.lane.b32.xlu1 %v5623_v43, %s5457_s18 }
  0xd2   : > { %v5933_v7 = vpop.permute.xlu0 %930 }
  0xd3   : > { %v5935_v8 = vpop.permute.xlu1 %932 }
  0xd4   : > { %1576 = vrot.lane.b32.xlu0 %v5625_v44, %s5460_s29 }
  0xd5   : > { %1702 = vrot.lane.b32.xlu1 %v5713_v40, %s5461_s20 }
  0xd6   : > { %v5941_v12 = vpop.permute.xlu0 %934 }
  0xd7   : > { %v5943_v15 = vpop.permute.xlu1 %936 }
  0xd8   : > { %1196 = vrot.lane.b32.xlu0 %v5625_v44, %s5457_s18 }
  0xd9   : > { %1322 = vrot.lane.b32.xlu1 %v5713_v40, %s5458_s19 }
  0xda   : > { %v5949_v43 = vpop.permute.xlu0 %938 }
  0xdb   : > { %v5951_v38 = vpop.permute.xlu1 %940 }
  0xdc   : > { %1704 = vrot.lane.b32.xlu0 %v5715_v41, %s5461_s20 }
  0xdd   : > { %1324 = vrot.lane.b32.xlu1 %v5715_v41, %s5458_s19 }
  0xde   : > { %v5957_v32 = vpop.permute.xlu0 %942 }
  0xdf   : > { %v5959_v59 = vpop.permute.xlu1 %944 }
  0xe0   : > { %1450 = vrot.lane.b32.xlu0 %v5961_v58, %s5459_s24 }
  0xe1   : > { %1070 = vrot.lane.b32.xlu1 %v5961_v58, %s5456_s17 }
  0xe2   : > { %v5967_v44 = vpop.permute.xlu0 %946 }
  0xe3   : > { %v5969_v40 = vpop.permute.xlu1 %948 }
  0xe4   : > { %1452 = vrot.lane.b32.xlu0 %v5971_v57, %s5459_s24 }
  0xe5   : > { %1578 = vrot.lane.b32.xlu1 %v5637_v49, %s5460_s29 }
  0xe6   : > { %v5977_v41 = vpop.permute.xlu0 %950 }
  0xe7   : > { %v5979_v30 = vpop.permute.xlu1 %952 }
  0xe8   : > { %1072 = vrot.lane.b32.xlu0 %v5971_v57, %s5456_s17 }
  0xe9   : > { %1198 = vrot.lane.b32.xlu1 %v5637_v49, %s5457_s18 }
  0xea   : > { %v5985_v37 = vpop.permute.xlu0 %954 }
  0xeb   : > { %8861 = vst [vmem:[#allocation21_spill] sm:$0xff] %v5985_v37  ;;  %v5987_v36 = vpop.permute.xlu1 %956 }
  0xec   : > { %8862 = vst [vmem:[#allocation22_spill] sm:$0xff] %v5987_v36  ;;  %1580 = vrot.lane.b32.xlu0 %v5639_v50, %s5460_s29  ;;  %v6047_v36 = vld [vmem:[#allocation2 + $0xa8] sm:$0xff] }
  0xed   : > { %1706 = vrot.lane.b32.xlu1 %v5721_v42, %s5461_s20  ;;  %8871 = vst [vmem:[#allocation31_spill] sm:$0xff] %v6047_v36 }
  0xee   : > { %v5993_v35 = vpop.permute.xlu0 %958 }
  0xef   : > { %8863 = vst [vmem:[#allocation23_spill] sm:$0xff] %v5993_v35  ;;  %v5995_v34 = vpop.permute.xlu1 %960 }
  0xf0   : > { %8864 = vst [vmem:[#allocation24_spill] sm:$0xff] %v5995_v34  ;;  %1200 = vrot.lane.b32.xlu0 %v5639_v50, %s5457_s18 }
  0xf1   : > { %1326 = vrot.lane.b32.xlu1 %v5721_v42, %s5458_s19 }
  0xf2   : > { %v6001_v49 = vpop.permute.xlu0 %962 }
  0xf3   : > { %8865 = vst [vmem:[#allocation25_spill] sm:$0xff] %v6001_v49  ;;  %v6003_v33 = vpop.permute.xlu1 %964 }
  0xf4   : > { %8866 = vst [vmem:[#allocation26_spill] sm:$0xff] %v6003_v33  ;;  %1708 = vrot.lane.b32.xlu0 %v5723_v45, %s5461_s20  ;;  %v6023_v33 = vld [vmem:[#allocation2 + $0x98] sm:$0xff] }
  0xf5   : > { %1328 = vrot.lane.b32.xlu1 %v5723_v45, %s5458_s19 }
  0xf6   : > { %v6009_v31 = vpop.permute.xlu0 %966 }
  0xf7   : > { %8867 = vst [vmem:[#allocation27_spill] sm:$0xff] %v6009_v31  ;;  %v6011_v24 = vpop.permute.xlu1 %968 }
  0xf8   : > { %8868 = vst [vmem:[#allocation28_spill] sm:$0xff] %v6011_v24  ;;  %1454 = vrot.lane.b32.xlu0 %v6013_v29, %s5459_s24 }
  0xf9   : > { %1074 = vrot.lane.b32.xlu1 %v6013_v29, %s5456_s17 }
  0xfa   : > { %v6019_v50 = vpop.permute.xlu0 %970 }
  0xfb   : > { %8869 = vst [vmem:[#allocation29_spill] sm:$0xff] %v6019_v50  ;;  %v6021_v42 = vpop.permute.xlu1 %972 }
  0xfc   : > { %8870 = vst [vmem:[#allocation30_spill] sm:$0xff] %v6021_v42  ;;  %1456 = vrot.lane.b32.xlu0 %v6023_v33, %s5459_s24 }
  0xfd   : > { %1582 = vrot.lane.b32.xlu1 %v5647_v53, %s5460_s29 }
  0xfe   : > { %v1055_v24 = vpop.permute.xlu0 %1054 }
  0xff   : > { %v1057_v45 = vpop.permute.xlu1 %1056 }
 0x100   : > { %1076 = vrot.lane.b32.xlu0 %v6023_v33, %s5456_s17 }
 0x101   : > { %1202 = vrot.lane.b32.xlu1 %v5647_v53, %s5457_s18 }
 0x102   : > { %v1183_v50 = vpop.permute.xlu0 %1182 }
 0x103   : > { %v1185_v31 = vpop.permute.xlu1 %1184 }
 0x104   : > { %1584 = vrot.lane.b32.xlu0 %v5649_v54, %s5460_s29 }
 0x105   : > { %1710 = vrot.lane.b32.xlu1 %v5729_v46, %s5461_s20 }
 0x106   : > { %v1311_v49 = vpop.permute.xlu0 %1310 }
 0x107   : > { %v1313_v42 = vpop.permute.xlu1 %1312 }
 0x108   : > { %1204 = vrot.lane.b32.xlu0 %v5649_v54, %s5457_s18 }
 0x109   : > { %1330 = vrot.lane.b32.xlu1 %v5729_v46, %s5458_s19  ;;  %v1790_v46 = vsel %vm366_vm0, %v477_v22, %v5770_v1 }
 0x10a   : > { %v1439_v34 = vpop.permute.xlu0 %1438  ;;  %v1823_v54 = vsel %vm1822_vm3, %v1790_v46, %v5925_v39  ;;  %v453_v39 = vld [vmem:[#allocation2 + $0x12f] sm:$0x1] }
 0x10b   : > { %v6041_v53 = vpop.permute.xlu1 %1058  ;;  %471 = vst.msk [vmem:[#allocation2 + $0x131] sm:$0x1] %vm422_vm1, %v453_v39 }
 0x10c   : > { %1712 = vrot.lane.b32.xlu0 %v5731_v47, %s5461_s20 }
 0x10d   : > { %1332 = vrot.lane.b32.xlu1 %v5731_v47, %s5458_s19  ;;  %v1856_v47 = vsel %vm1855_vm4, %v1823_v54, %v1055_v24  ;;  %v478_v24 = vld [vmem:[#allocation2 + $0x8] sm:$0xff] }
 0x10e   : > { %v1441_v21 = vpop.permute.xlu0 %1440  ;;  %v1889_v1 = vsel %vm1888_vm5, %v1856_v47, %v1183_v50  ;;  %v1791_v47 = vsel %vm366_vm0, %v478_v24, %v5778_v3 }
 0x10f   : > { %v1567_v35 = vpop.permute.xlu1 %1566  ;;  %v1922_v22 = vsel %vm1921_vm6, %v1889_v1, %v1311_v49 }
 0x110   : > { %1458 = vrot.lane.b32.xlu0 %v6047_v36, %s5459_s24  ;;  %v1955_v46 = vsel %vm1954_vm7, %v1922_v22, %v1439_v34  ;;  %v1824_v34 = vsel %vm1822_vm3, %v1791_v47, %v5927_v5  ;;  %v714_v47 = vld [vmem:[#allocation2 + $0xc1] sm:$0xff] }
 0x111   : > { %1078 = vrot.lane.b32.xlu1 %v6047_v36, %s5456_s17  ;;  %v1988_v54 = vsel %vm1987_vm8, %v1955_v46, %v1567_v35  ;;  %v713_v35 = vld [vmem:[#allocation2 + $0xb1] sm:$0xff]  ;;  %v1857_v1 = vsel %vm1855_vm4, %v1824_v34, %v1057_v45 }
 0x112   : > { %v6058_v37 = vpop.permute.xlu0 %1060 }
 0x113   : > { %v1187_v20 = vpop.permute.xlu1 %1186 }
 0x114   : > { %1460 = vrot.lane.b32.xlu0 %v6060_v28, %s5459_s24 }
 0x115   : > { %1586 = vrot.lane.b32.xlu1 %v5658_v60, %s5460_s29 }
 0x116   : > { %v1569_v50 = vpop.permute.xlu0 %1568 }
 0x117   : > { %v1695_v36 = vpop.permute.xlu1 %1694 }
 0x118   : > { %v2021_v49 = vsel %vm2020_vm9, %v1988_v54, %v1695_v36  ;;  %1080 = vrot.lane.b32.xlu0 %v6060_v28, %s5456_s17  ;;  %v1890_v36 = vsel %vm1888_vm5, %v1857_v1, %v1185_v31  ;;  %v6113_v1 = vld [vmem:[#allocation2 + $0xc8] sm:$0xff] }
 0x119   : > { %1206 = vrot.lane.b32.xlu1 %v5658_v60, %s5457_s18  ;;  %5320 = vmatprep.mubr.msk.f32.mxu0 %vm2065_vm10, %v2021_v49  ;;  %v1923_v3 = vsel %vm1921_vm6, %v1890_v36, %v1313_v42 }
 0x11a   : > { %v1189_v39 = vpop.permute.xlu0 %1188  ;;  %v1956_v60 = vsel %vm1954_vm7, %v1923_v3, %v1441_v21 }
 0x11b   : > { %v1315_v22 = vpop.permute.xlu1 %1314  ;;  %v1989_v5 = vsel %vm1987_vm8, %v1956_v60, %v1569_v50  ;;  %v6098_v50 = vld [vmem:[#allocation2 + $0xc0] sm:$0xff] }
 0x11c   : > { %1588 = vrot.lane.b32.xlu0 %v713_v35, %s5460_s29 }
 0x11d   : > { %1714 = vrot.lane.b32.xlu1 %v5737_v48, %s5461_s20 }
 0x11e   : > { %v1697_v46 = vpop.permute.xlu0 %1696 }
 0x11f   : > { %v1317_v24 = vpop.permute.xlu1 %1316  ;;  %v2022_v54 = vsel %vm2020_vm9, %v1989_v5, %v1697_v46  ;;  %v1793_v5 = vsel %vm366_vm0, %v5762_v63, %v5780_v4  ;;  %v715_v46 = vld [vmem:[#allocation2 + $0xc9] sm:$0xff] }
 0x120   : > { %1208 = vrot.lane.b32.xlu0 %v713_v35, %s5457_s18  ;;  %5321 = vmatmul.mubr.msk.f32.vlgmr.msra.gmra.mxu0 %vm2065_vm10, %v2022_v54 }
 0x121   : > { %1334 = vrot.lane.b32.xlu1 %v5737_v48, %s5458_s19  ;;  %v1792_v48 = vsel %vm366_vm0, %v5764_v0, %v5772_v2 }
 0x122   : > { %v1443_v42 = vpop.permute.xlu0 %1442  ;;  %v1825_v49 = vsel %vm1822_vm3, %v1792_v48, %v5933_v7 }
 0x123   : > { %v1063_v31 = vpop.permute.xlu1 %1062 }
 0x124   : > { %1716 = vrot.lane.b32.xlu0 %v5739_v51, %s5461_s20 }
 0x125   : > { %1336 = vrot.lane.b32.xlu1 %v5739_v51, %s5458_s19  ;;  %v1858_v51 = vsel %vm1855_vm4, %v1825_v49, %v6041_v53 }
 0x126   : > { %v1445_v45 = vpop.permute.xlu0 %1444  ;;  %v1891_v0 = vsel %vm1888_vm5, %v1858_v51, %v1187_v20  ;;  %v454_v20 = vld [vmem:[#allocation2 + $0x147] sm:$0x1] }
 0x127   : > { %v1571_v21 = vpop.permute.xlu1 %1570  ;;  %v1924_v2 = vsel %vm1921_vm6, %v1891_v0, %v1315_v22  ;;  %v1826_v22 = vsel %vm1822_vm3, %v1793_v5, %v5935_v8  ;;  %472 = vst.msk [vmem:[#allocation2 + $0x149] sm:$0x1] %vm422_vm1, %v454_v20  ;;  %v6151_v0 = vld [vmem:[#allocation2 + $0xd8] sm:$0xff] }
 0x128   : > { %1462 = vrot.lane.b32.xlu0 %v6098_v50, %s5459_s24  ;;  %v1957_v7 = vsel %vm1954_vm7, %v1924_v2, %v1443_v42  ;;  %v1859_v54 = vsel %vm1855_vm4, %v1826_v22, %v6058_v37  ;;  %v1795_v22 = vsel %vm366_vm0, %v5809_v11, %v5792_v25  ;;  %v455_v11 = vld [vmem:[#allocation2 + $0x15f] sm:$0x1] }
 0x129   : > { %1082 = vrot.lane.b32.xlu1 %v6098_v50, %s5456_s17  ;;  %v1990_v36 = vsel %vm1987_vm8, %v1957_v7, %v1571_v21  ;;  %v1892_v63 = vsel %vm1888_vm5, %v1859_v54, %v1189_v39  ;;  %v716_v7 = vld [vmem:[#allocation2 + $0xd9] sm:$0xff]  ;;  %473 = vst.msk [vmem:[#allocation2 + $0x161] sm:$0x1] %vm422_vm1, %v455_v11 }
 0x12a   : > { %v6111_v35 = vpop.permute.xlu0 %1064  ;;  %v1925_v4 = vsel %vm1921_vm6, %v1892_v63, %v1317_v24 }
 0x12b   : > { %v1191_v34 = vpop.permute.xlu1 %1190  ;;  %v1958_v8 = vsel %vm1954_vm7, %v1925_v4, %v1445_v45 }
 0x12c   : > { %1464 = vrot.lane.b32.xlu0 %v6113_v1, %s5459_s24 }
 0x12d   : > { %1590 = vrot.lane.b32.xlu1 %v714_v47, %s5460_s29 }
 0x12e   : > { %v1573_v53 = vpop.permute.xlu0 %1572 }
 0x12f   : > { %v1699_v3 = vpop.permute.xlu1 %1698  ;;  %v1991_v48 = vsel %vm1987_vm8, %v1958_v8, %v1573_v53  ;;  %v6165_v53 = vld [vmem:[#allocation2 + $0xe0] sm:$0xff] }
 0x130   : > { %v2023_v60 = vsel %vm2020_vm9, %v1990_v36, %v1699_v3  ;;  %1084 = vrot.lane.b32.xlu0 %v6113_v1, %s5456_s17 }
 0x131   : > { %1210 = vrot.lane.b32.xlu1 %v714_v47, %s5457_s18  ;;  %5323 = vmatprep.mubr.msk.f32.mxu0 %vm2065_vm10, %v2023_v60 }
 0x132   : > { %v1193_v21 = vpop.permute.xlu0 %1192 }
 0x133   : > { %v1319_v42 = vpop.permute.xlu1 %1318 }
 0x134   : > { %1592 = vrot.lane.b32.xlu0 %v715_v46, %s5460_s29 }
 0x135   : > { %1718 = vrot.lane.b32.xlu1 %v5745_v52, %s5461_s20 }
 0x136   : > { %v1701_v47 = vpop.permute.xlu0 %1700 }
 0x137   : > { %v1321_v49 = vpop.permute.xlu1 %1320  ;;  %v2024_v51 = vsel %vm2020_vm9, %v1991_v48, %v1701_v47 }
 0x138   : > { %1212 = vrot.lane.b32.xlu0 %v715_v46, %s5457_s18  ;;  %5324 = vmatmul.mubr.msk.f32.gmra.mxu0 %vm2065_vm10, %v2024_v51  ;;  %v717_v46 = vld [vmem:[#allocation2 + $0xe1] sm:$0xff] }
 0x139   : > { %1338 = vrot.lane.b32.xlu1 %v5745_v52, %s5458_s19  ;;  %v1794_v52 = vsel %vm366_vm0, %v5787_v6, %v5790_v27 }
 0x13a   : > { %v1447_v39 = vpop.permute.xlu0 %1446  ;;  %v1827_v2 = vsel %vm1822_vm3, %v1794_v52, %v5941_v12 }
 0x13b   : > { %v1067_v37 = vpop.permute.xlu1 %1066 }
 0x13c   : > { %1720 = vrot.lane.b32.xlu0 %v5747_v55, %s5461_s20 }
 0x13d   : > { %1340 = vrot.lane.b32.xlu1 %v5747_v55, %s5458_s19  ;;  %v1860_v55 = vsel %vm1855_vm4, %v1827_v2, %v1063_v31  ;;  %v718_v2 = vld [vmem:[#allocation2 + $0xf1] sm:$0xff] }
 0x13e   : > { %v1449_v45 = vpop.permute.xlu0 %1448  ;;  %v1893_v60 = vsel %vm1888_vm5, %v1860_v55, %v1191_v34  ;;  %v1828_v34 = vsel %vm1822_vm3, %v1795_v22, %v5943_v15  ;;  %v719_v22 = vld [vmem:[#allocation2 + $0xf9] sm:$0xff] }
 0x13f   : > { %v1575_v24 = vpop.permute.xlu1 %1574  ;;  %v1926_v6 = vsel %vm1921_vm6, %v1893_v60, %v1319_v42  ;;  %v1861_v54 = vsel %vm1855_vm4, %v1828_v34, %v6111_v35 }
 0x140   : > { %1466 = vrot.lane.b32.xlu0 %v6151_v0, %s5459_s24  ;;  %v1959_v27 = vsel %vm1954_vm7, %v1926_v6, %v1447_v39  ;;  %v1894_v4 = vsel %vm1888_vm5, %v1861_v54, %v1193_v21  ;;  %v654_v21 = vld [vmem:[#allocation2 + $0xe2] sm:$0xff]  ;;  %v6217_v6 = vld [vmem:[#allocation2 + $0xf8] sm:$0xff] }
 0x141   : > { %1086 = vrot.lane.b32.xlu1 %v6151_v0, %s5456_s17  ;;  %v1992_v12 = vsel %vm1987_vm8, %v1959_v27, %v1575_v24  ;;  %v1927_v25 = vsel %vm1921_vm6, %v1894_v4, %v1321_v49 }
 0x142   : > { %v6163_v3 = vpop.permute.xlu0 %1068  ;;  %v1960_v15 = vsel %vm1954_vm7, %v1927_v25, %v1449_v45  ;;  %v6203_v45 = vld [vmem:[#allocation2 + $0xf0] sm:$0xff] }
 0x143   : > { %v1195_v36 = vpop.permute.xlu1 %1194 }
 0x144   : > { %1468 = vrot.lane.b32.xlu0 %v6165_v53, %s5459_s24 }
 0x145   : > { %1594 = vrot.lane.b32.xlu1 %v716_v7, %s5460_s29 }
 0x146   : > { %v1577_v31 = vpop.permute.xlu0 %1576 }
 0x147   : > { %v1703_v5 = vpop.permute.xlu1 %1702  ;;  %v1993_v8 = vsel %vm1987_vm8, %v1960_v15, %v1577_v31  ;;  %v656_v15 = vld [vmem:[#allocation2 + $0xfa] sm:$0xff] }
 0x148   : > { %v2025_v20 = vsel %vm2020_vm9, %v1992_v12, %v1703_v5  ;;  %1088 = vrot.lane.b32.xlu0 %v6165_v53, %s5456_s17 }
 0x149   : > { %1214 = vrot.lane.b32.xlu1 %v716_v7, %s5457_s18  ;;  %5326 = vmatprep.mubr.msk.f32.mxu0 %vm2065_vm10, %v2025_v20  ;;  %v750_v20 = vld [vmem:[#allocation2 + $0xf2] sm:$0xff] }
 0x14a   : > { %v1197_v63 = vpop.permute.xlu0 %1196 }
 0x14b   : > { %v1323_v42 = vpop.permute.xlu1 %1322 }
 0x14c   : > { %1596 = vrot.lane.b32.xlu0 %v717_v46, %s5460_s29 }
 0x14d   : > { %1722 = vrot.lane.b32.xlu1 %v5753_v56, %s5461_s20 }
 0x14e   : > { %v1705_v35 = vpop.permute.xlu0 %1704 }
 0x14f   : > { %v1325_v48 = vpop.permute.xlu1 %1324  ;;  %v2026_v47 = vsel %vm2020_vm9, %v1993_v8, %v1705_v35 }
 0x150   : > { %1216 = vrot.lane.b32.xlu0 %v717_v46, %s5457_s18  ;;  %5327 = vmatmul.mubr.msk.f32.gmra.mxu0 %vm2065_vm10, %v2026_v47 }
 0x151   : > { %1342 = vrot.lane.b32.xlu1 %v5753_v56, %s5458_s19  ;;  %v1796_v56 = vsel %vm366_vm0, %v5857_v23, %v5805_v9 }
 0x152   : > { %v1451_v51 = vpop.permute.xlu0 %1450  ;;  %v1829_v52 = vsel %vm1822_vm3, %v1796_v56, %v5949_v43  ;;  %v720_v56 = vld [vmem:[#allocation2 + $0x109] sm:$0xff] }
 0x153   : > { %v6199_v49 = vpop.permute.xlu1 %1070  ;;  %v1862_v7 = vsel %vm1855_vm4, %v1829_v52, %v1067_v37 }
 0x154   : > { %1724 = vrot.lane.b32.xlu0 %v654_v21, %s5461_s20  ;;  %v1895_v27 = vsel %vm1888_vm5, %v1862_v7, %v1195_v36  ;;  %v1797_v36 = vsel %vm366_vm0, %v5867_v26, %v5807_v10  ;;  %v363_v26 = vld [vmem:[%s5528_s14 + $0xf0] sm:$0xff] }
 0x155   : > { %1344 = vrot.lane.b32.xlu1 %v654_v21, %s5458_s19  ;;  %v1928_v9 = vsel %vm1921_vm6, %v1895_v27, %v1323_v42  ;;  %v1830_v31 = vsel %vm1822_vm3, %v1797_v36, %v5951_v38  ;;  %397 = vst.msk [vmem:[#allocation2 + $0x181] sm:$0xff] %vm366_vm0, %v363_v26  ;;  %v6271_v27 = vld [vmem:[#allocation2 + $0x110] sm:$0xff] }
 0x156   : > { %v1453_v24 = vpop.permute.xlu0 %1452  ;;  %v1961_v23 = vsel %vm1954_vm7, %v1928_v9, %v1451_v51  ;;  %v1863_v34 = vsel %vm1855_vm4, %v1830_v31, %v6163_v3  ;;  %v6256_v51 = vld [vmem:[#allocation2 + $0x108] sm:$0xff]  ;;  %v364_v9 = vld [vmem:[%s5528_s14 + $0xf8] sm:$0xff] }
 0x157   : > { %v1579_v39 = vpop.permute.xlu1 %1578  ;;  %v1896_v42 = vsel %vm1888_vm5, %v1863_v34, %v1197_v63  ;;  %v456_v63 = vld [vmem:[#allocation2 + $0x177] sm:$0x1]  ;;  %398 = vst.msk [vmem:[#allocation2 + $0x189] sm:$0xff] %vm366_vm0, %v364_v9  ;;  %v754_v9 = vld [vmem:[#allocation2 + $0x122] sm:$0xff] }
 0x158   : > { %1470 = vrot.lane.b32.xlu0 %v6203_v45, %s5459_s24  ;;  %v1994_v43 = vsel %vm1987_vm8, %v1961_v23, %v1579_v39  ;;  %v1929_v10 = vsel %vm1921_vm6, %v1896_v42, %v1325_v48  ;;  %474 = vst.msk [vmem:[#allocation2 + $0x179] sm:$0x1] %vm422_vm1, %v456_v63  ;;  %v1798_v39 = vsel %vm366_vm0, %v5909_v61, %v5818_v13  ;;  %v721_v36 = vld [vmem:[#allocation2 + $0x111] sm:$0xff]  ;;  %v421_v63 = vld [vmem:[#allocation2 + $0x19a] sm:$0x1] }
 0x159   : > { %1090 = vrot.lane.b32.xlu1 %v6203_v45, %s5456_s17  ;;  %v1962_v38 = vsel %vm1954_vm7, %v1929_v10, %v1453_v24  ;;  %v1831_v24 = vsel %vm1822_vm3, %v1798_v39, %v5957_v32  ;;  %440 = vst.msk [vmem:[#allocation2 + $0x198] sm:$0x1] %vm422_vm1, %v421_v63  ;;  %v598_v63 = vld [vmem:[#allocation2 + $0x140] sm:$0xff] }
 0x15a   : > { %v6215_v60 = vpop.permute.xlu0 %1072  ;;  %v1864_v52 = vsel %vm1855_vm4, %v1831_v24, %v6199_v49 }
 0x15b   : > { %v1199_v55 = vpop.permute.xlu1 %1198 }
 0x15c   : > { %1472 = vrot.lane.b32.xlu0 %v6217_v6, %s5459_s24  ;;  %v420_v35 = vld [vmem:[#allocation2 + $0x182] sm:$0x1]  ;;  %v1897_v13 = vsel %vm1888_vm5, %v1864_v52, %v1199_v55  ;;  %v1799_v55 = vsel %vm366_vm0, %v5919_v62, %v5820_v14 }
 0x15d   : > { %1598 = vrot.lane.b32.xlu1 %v718_v2, %s5460_s29  ;;  %439 = vst.msk [vmem:[#allocation2 + $0x180] sm:$0x1] %vm422_vm1, %v420_v35 }
 0x15e   : > { %v1581_v37 = vpop.permute.xlu0 %1580 }
 0x15f   : > { %v1707_v12 = vpop.permute.xlu1 %1706  ;;  %v1995_v4 = vsel %vm1987_vm8, %v1962_v38, %v1581_v37  ;;  %v1832_v37 = vsel %vm1822_vm3, %v1799_v55, %v5959_v59  ;;  %v457_v38 = vld [vmem:[#allocation2 + $0x18f] sm:$0x1] }
 0x160   : > { %v2027_v5 = vsel %vm2020_vm9, %v1994_v43, %v1707_v12  ;;  %1092 = vrot.lane.b32.xlu0 %v6217_v6, %s5456_s17  ;;  %v1865_v31 = vsel %vm1855_vm4, %v1832_v37, %v6215_v60  ;;  %v658_v60 = vld [vmem:[#allocation2 + $0x112] sm:$0xff]  ;;  %475 = vst.msk [vmem:[#allocation2 + $0x191] sm:$0x1] %vm422_vm1, %v457_v38 }
 0x161   : > { %1218 = vrot.lane.b32.xlu1 %v718_v2, %s5457_s18  ;;  %5329 = vmatprep.mubr.msk.f32.mxu0 %vm2065_vm10, %v2027_v5  ;;  %v752_v5 = vld [vmem:[#allocation2 + $0x10a] sm:$0xff] }
 0x162   : > { %v1201_v54 = vpop.permute.xlu0 %1200 }
 0x163   : > { %v1327_v46 = vpop.permute.xlu1 %1326  ;;  %v1898_v34 = vsel %vm1888_vm5, %v1865_v31, %v1201_v54 }
 0x164   : > { %1600 = vrot.lane.b32.xlu0 %v719_v22, %s5460_s29  ;;  %v1930_v61 = vsel %vm1921_vm6, %v1897_v13, %v1327_v46  ;;  %v1801_v13 = vsel %vm366_vm0, %v5971_v57, %v5831_v17 }
 0x165   : > { %1726 = vrot.lane.b32.xlu1 %v750_v20, %s5461_s20 }
 0x166   : > { %v1709_v11 = vpop.permute.xlu0 %1708 }
 0x167   : > { %v1329_v25 = vpop.permute.xlu1 %1328  ;;  %v2028_v3 = vsel %vm2020_vm9, %v1995_v4, %v1709_v11  ;;  %v6309_v11 = vld [vmem:[#allocation2 + $0x120] sm:$0xff] }
 0x168   : > { %1220 = vrot.lane.b32.xlu0 %v719_v22, %s5457_s18  ;;  %5330 = vmatmul.mubr.msk.f32.gmra.mxu0 %vm2065_vm10, %v2028_v3  ;;  %v1931_v14 = vsel %vm1921_vm6, %v1898_v34, %v1329_v25  ;;  %v1800_v3 = vsel %vm366_vm0, %v5961_v58, %v5829_v16  ;;  %v6325_v16 = vld [vmem:[#allocation2 + $0x128] sm:$0xff]  ;;  %v6359_v34 = vld [vmem:[#allocation2 + $0x138] sm:$0xff] }
 0x169   : > { %1346 = vrot.lane.b32.xlu1 %v750_v20, %s5458_s19 }
 0x16a   : > { %v1455_v48 = vpop.permute.xlu0 %1454 }
 0x16b   : > { %v6251_v8 = vpop.permute.xlu1 %1074  ;;  %v1963_v32 = vsel %vm1954_vm7, %v1930_v61, %v1455_v48  ;;  %v722_v48 = vld [vmem:[#allocation2 + $0x121] sm:$0xff]  ;;  %v1834_v61 = vsel %vm1822_vm3, %v1801_v13, %v5969_v40 }
 0x16c   : > { %1728 = vrot.lane.b32.xlu0 %v656_v15, %s5461_s20 }
 0x16d   : > { %1348 = vrot.lane.b32.xlu1 %v656_v15, %s5458_s19  ;;  %v1833_v15 = vsel %vm1822_vm3, %v1800_v3, %v5967_v44 }
 0x16e   : > { %v1457_v21 = vpop.permute.xlu0 %1456  ;;  %v1866_v35 = vsel %vm1855_vm4, %v1833_v15, %v6251_v8 }
 0x16f   : > { %v1583_v47 = vpop.permute.xlu1 %1582  ;;  %v1964_v62 = vsel %vm1954_vm7, %v1931_v14, %v1457_v21  ;;  %v1802_v14 = vsel %vm366_vm0, %v6013_v29, %v5837_v18  ;;  %v724_v29 = vld [vmem:[#allocation2 + $0x139] sm:$0xff] }
 0x170   : > { %1474 = vrot.lane.b32.xlu0 %v6256_v51, %s5459_s24  ;;  %v1996_v49 = vsel %vm1987_vm8, %v1963_v32, %v1583_v47  ;;  %v723_v32 = vld [vmem:[#allocation2 + $0x129] sm:$0xff] }
 0x171   : > { %1094 = vrot.lane.b32.xlu1 %v6256_v51, %s5456_s17 }
 0x172   : > { %v6269_v7 = vpop.permute.xlu0 %1076 }
 0x173   : > { %v1203_v2 = vpop.permute.xlu1 %1202 }
 0x174   : > { %1476 = vrot.lane.b32.xlu0 %v6271_v27, %s5459_s24  ;;  %v1899_v58 = vsel %vm1888_vm5, %v1866_v35, %v1203_v2  ;;  %v458_v2 = vld [vmem:[#allocation2 + $0x1a7] sm:$0x1] }
 0x175   : > { %1602 = vrot.lane.b32.xlu1 %v720_v56, %s5460_s29  ;;  %476 = vst.msk [vmem:[#allocation2 + $0x1a9] sm:$0x1] %vm422_vm1, %v458_v2 }
 0x176   : > { %v1585_v43 = vpop.permute.xlu0 %1584 }
 0x177   : > { %v1711_v23 = vpop.permute.xlu1 %1710  ;;  %v1997_v59 = vsel %vm1987_vm8, %v1964_v62, %v1585_v43  ;;  %v1835_v62 = vsel %vm1822_vm3, %v1802_v14, %v5977_v41  ;;  %v8876_v14 = vld [vmem:[#allocation22_spill] sm:$0xff] }
 0x178   : > { %v2029_v12 = vsel %vm2020_vm9, %v1996_v49, %v1711_v23  ;;  %1096 = vrot.lane.b32.xlu0 %v6271_v27, %s5456_s17  ;;  %v1867_v49 = vsel %vm1855_vm4, %v1834_v61, %v6269_v7  ;;  %v755_v7 = vld [vmem:[#allocation2 + $0x12a] sm:$0xff] }
 0x179   : > { %1222 = vrot.lane.b32.xlu1 %v720_v56, %s5457_s18  ;;  %5332 = vmatprep.mubr.msk.f32.mxu0 %vm2065_vm10, %v2029_v12  ;;  %v8872_v61 = vld [vmem:[#allocation3_spill] sm:$0xff] }
 0x17a   : > { %v1205_v22 = vpop.permute.xlu0 %1204 }
 0x17b   : > { %v1331_v20 = vpop.permute.xlu1 %1330  ;;  %v1900_v57 = vsel %vm1888_vm5, %v1867_v49, %v1205_v22  ;;  %v8874_v49 = vld [vmem:[#allocation21_spill] sm:$0xff] }
 0x17c   : > { %1604 = vrot.lane.b32.xlu0 %v721_v36, %s5460_s29  ;;  %v1932_v39 = vsel %vm1921_vm6, %v1899_v58, %v1331_v20  ;;  %v756_v58 = vld [vmem:[#allocation2 + $0x13a] sm:$0xff] }
 0x17d   : > { %1730 = vrot.lane.b32.xlu1 %v752_v5, %s5461_s20 }
 0x17e   : > { %v1713_v42 = vpop.permute.xlu0 %1712 }
 0x17f   : > { %v1333_v46 = vpop.permute.xlu1 %1332  ;;  %v2030_v10 = vsel %vm2020_vm9, %v1997_v59, %v1713_v42 }
 0x180   : > { %1224 = vrot.lane.b32.xlu0 %v721_v36, %s5457_s18  ;;  %5333 = vmatmul.mubr.msk.f32.gmra.mxu0 %vm2065_vm10, %v2030_v10  ;;  %v1933_v43 = vsel %vm1921_vm6, %v1900_v57, %v1333_v46 }
 0x181   : > { %1350 = vrot.lane.b32.xlu1 %v752_v5, %s5458_s19 }
 0x182   : > { %v1459_v26 = vpop.permute.xlu0 %1458 }
 0x183   : > { %v6304_v54 = vpop.permute.xlu1 %1078  ;;  %v1965_v44 = vsel %vm1954_vm7, %v1932_v39, %v1459_v26 }
 0x184   : > { %1732 = vrot.lane.b32.xlu0 %v658_v60, %s5461_s20  ;;  %v1868_v59 = vsel %vm1855_vm4, %v1835_v62, %v6304_v54  ;;  %v6380_v54 = vld [vmem:[#allocation2 + $0x140] sm:$0xff] }
 0x185   : > { %1352 = vrot.lane.b32.xlu1 %v658_v60, %s5458_s19 }
 0x186   : > { %v1461_v25 = vpop.permute.xlu0 %1460 }
 0x187   : > { %v1587_v4 = vpop.permute.xlu1 %1586  ;;  %v1966_v40 = vsel %vm1954_vm7, %v1933_v43, %v1461_v25  ;;  %v1803_v25 = vsel %vm366_vm0, %v6023_v33, %v5839_v19 }
 0x188   : > { %1478 = vrot.lane.b32.xlu0 %v6309_v11, %s5459_s24  ;;  %v1998_v24 = vsel %vm1987_vm8, %v1965_v44, %v1587_v4  ;;  %v1836_v3 = vsel %vm1822_vm3, %v1803_v25, %v5979_v30  ;;  %v725_v30 = vld [vmem:[#allocation2 + $0x141] sm:$0xff] }
 0x189   : > { %1098 = vrot.lane.b32.xlu1 %v6309_v11, %s5456_s17 }
 0x18a   : > { %v6323_v21 = vpop.permute.xlu0 %1080 }
 0x18b   : > { %v1207_v47 = vpop.permute.xlu1 %1206  ;;  %v1869_v15 = vsel %vm1855_vm4, %v1836_v3, %v6323_v21  ;;  %v727_v3 = vld [vmem:[#allocation2 + $0x159] sm:$0xff] }
 0x18c   : > { %1480 = vrot.lane.b32.xlu0 %v6325_v16, %s5459_s24  ;;  %v1901_v10 = vsel %vm1888_vm5, %v1868_v59, %v1207_v47  ;;  %v726_v59 = vld [vmem:[#allocation2 + $0x151] sm:$0xff] }
 0x18d   : > { %1606 = vrot.lane.b32.xlu1 %v722_v48, %s5460_s29 }
 0x18e   : > { %v1589_v8 = vpop.permute.xlu0 %1588 }
 0x18f   : > { %v1715_v56 = vpop.permute.xlu1 %1714  ;;  %v1999_v12 = vsel %vm1987_vm8, %v1966_v40, %v1589_v8 }
 0x190   : > { %v2031_v52 = vsel %vm2020_vm9, %v1998_v24, %v1715_v56  ;;  %1100 = vrot.lane.b32.xlu0 %v6325_v16, %s5456_s17 }
 0x191   : > { %1226 = vrot.lane.b32.xlu1 %v722_v48, %s5457_s18  ;;  %5335 = vmatprep.mubr.msk.f32.mxu0 %vm2065_vm10, %v2031_v52  ;;  %v757_v52 = vld [vmem:[#allocation2 + $0x142] sm:$0xff] }
 0x192   : > { %v1209_v17 = vpop.permute.xlu0 %1208 }
 0x193   : > { %v1335_v23 = vpop.permute.xlu1 %1334  ;;  %v1902_v47 = vsel %vm1888_vm5, %v1869_v15, %v1209_v17  ;;  %v694_v17 = vld [vmem:[#allocation2 + $0x150] sm:$0xff] }
 0x194   : > { %1608 = vrot.lane.b32.xlu0 %v723_v32, %s5460_s29  ;;  %v1934_v60 = vsel %vm1921_vm6, %v1901_v10, %v1335_v23 }
 0x195   : > { %1734 = vrot.lane.b32.xlu1 %v754_v9, %s5461_s20 }
 0x196   : > { %v1717_v37 = vpop.permute.xlu0 %1716 }
 0x197   : > { %v1337_v55 = vpop.permute.xlu1 %1336  ;;  %v2032_v5 = vsel %vm2020_vm9, %v1999_v12, %v1717_v37 }
 0x198   : > { %1228 = vrot.lane.b32.xlu0 %v723_v32, %s5457_s18  ;;  %5336 = vmatmul.mubr.msk.f32.gmra.mxu0 %vm2065_vm10, %v2032_v5  ;;  %v1935_v19 = vsel %vm1921_vm6, %v1902_v47, %v1337_v55  ;;  %v8877_v47 = vld [vmem:[#allocation5_spill] sm:$0xff] }
 0x199   : > { %1354 = vrot.lane.b32.xlu1 %v754_v9, %s5458_s19 }
 0x19a   : > { %v1463_v31 = vpop.permute.xlu0 %1462 }
 0x19b   : > { %v1083_v36 = vpop.permute.xlu1 %1082  ;;  %v1967_v18 = vsel %vm1954_vm7, %v1934_v60, %v1463_v31 }
 0x19c   : > { %1736 = vrot.lane.b32.xlu0 %v755_v7, %s5461_s20 }
 0x19d   : > { %974 = vrot.lane.b32.xlu1 %v754_v9, %s5455_s16  ;;  %v8873_v9 = vld [vmem:[#allocation31_spill] sm:$0xff] }
 0x19e   : > { %v1465_v22 = vpop.permute.xlu0 %1464  ;;  %v1804_v32 = vsel %vm366_vm0, %v8873_v9, %v8872_v61  ;;  %v8879_v9 = vld [vmem:[#allocation6_spill] sm:$0xff] }
 0x19f   : > { %v1591_v20 = vpop.permute.xlu1 %1590  ;;  %v1968_v33 = vsel %vm1954_vm7, %v1935_v19, %v1465_v22  ;;  %v1837_v23 = vsel %vm1822_vm3, %v1804_v32, %v8874_v49  ;;  %v1806_v19 = vsel %vm366_vm0, %v6098_v50, %v8877_v47  ;;  %v1807_v32 = vsel %vm366_vm0, %v6113_v1, %v8879_v9  ;;  %v8880_v49 = vld [vmem:[#allocation24_spill] sm:$0xff]  ;;  %v8884_v47 = vld [vmem:[#allocation26_spill] sm:$0xff] }
 0x1a0   : > { %1356 = vrot.lane.b32.xlu0 %v755_v7, %s5458_s19  ;;  %v2000_v41 = vsel %vm1987_vm8, %v1967_v18, %v1591_v20  ;;  %v1870_v57 = vsel %vm1855_vm4, %v1837_v23, %v1083_v36  ;;  %v8875_v36 = vld [vmem:[#allocation4_spill] sm:$0xff]  ;;  %v1840_v23 = vsel %vm1822_vm3, %v1807_v32, %v8880_v49  ;;  %v8885_v49 = vld [vmem:[#allocation9_spill] sm:$0xff] }
 0x1a1   : > { %1482 = vrot.lane.b32.xlu1 %v6359_v34, %s5459_s24  ;;  %v1805_v22 = vsel %vm366_vm0, %v6060_v28, %v8875_v36 }
 0x1a2   : > { %v6371_v42 = vpop.permute.xlu0 %1084  ;;  %v1838_v62 = vsel %vm1822_vm3, %v1805_v22, %v8876_v14  ;;  %v760_v14 = vld [vmem:[#allocation2 + $0x16a] sm:$0xff] }
 0x1a3   : > { %v1211_v46 = vpop.permute.xlu1 %1210  ;;  %v1871_v10 = vsel %vm1855_vm4, %v1838_v62, %v6371_v42  ;;  %v758_v42 = vld [vmem:[#allocation2 + $0x152] sm:$0xff] }
 0x1a4   : > { %976 = vrot.lane.b32.xlu0 %v755_v7, %s5455_s16  ;;  %v1903_v12 = vsel %vm1888_vm5, %v1870_v57, %v1211_v46  ;;  %v695_v46 = vld [vmem:[#allocation2 + $0x158] sm:$0xff] }
 0x1a5   : > { %1102 = vrot.lane.b32.xlu1 %v6359_v34, %s5456_s17  ;;  %v729_v62 = vld [vmem:[#allocation2 + $0x171] sm:$0xff] }
 0x1a6   : > { %v1593_v38 = vpop.permute.xlu0 %1592 }
 0x1a7   : > { %v1719_v26 = vpop.permute.xlu1 %1718  ;;  %v2001_v39 = vsel %vm1987_vm8, %v1968_v33, %v1593_v38  ;;  %v8878_v33 = vld [vmem:[#allocation23_spill] sm:$0xff] }
 0x1a8   : > { %v2033_v4 = vsel %vm2020_vm9, %v2000_v41, %v1719_v26  ;;  %1484 = vrot.lane.b32.xlu0 %v6380_v54, %s5459_s24 }
 0x1a9   : > { %1610 = vrot.lane.b32.xlu1 %v724_v29, %s5460_s29  ;;  %5338 = vmatprep.mubr.msk.f32.mxu0 %vm2065_vm10, %v2033_v4 }
 0x1aa   : > { %v1213_v35 = vpop.permute.xlu0 %1212 }
 0x1ab   : > { %v1339_v48 = vpop.permute.xlu1 %1338 }
 0x1ac   : > { %1104 = vrot.lane.b32.xlu0 %v598_v63, %s5456_s17  ;;  %v1936_v55 = vsel %vm1921_vm6, %v1903_v12, %v1339_v48 }
 0x1ad   : > { %1230 = vrot.lane.b32.xlu1 %v724_v29, %s5457_s18  ;;  %v1904_v29 = vsel %vm1888_vm5, %v1871_v10, %v1213_v35  ;;  %v8881_v10 = vld [vmem:[#allocation7_spill] sm:$0xff] }
 0x1ae   : > { %v1721_v24 = vpop.permute.xlu0 %1720 }
 0x1af   : > { %v1341_v44 = vpop.permute.xlu1 %1340  ;;  %v2034_v21 = vsel %vm2020_vm9, %v2001_v39, %v1721_v24 }
 0x1b0   : > { %1612 = vrot.lane.b32.xlu0 %v725_v30, %s5460_s29  ;;  %5339 = vmatmul.mubr.msk.f32.gmra.mxu0 %vm2065_vm10, %v2034_v21  ;;  %v1937_v28 = vsel %vm1921_vm6, %v1904_v29, %v1341_v44 }
 0x1b1   : > { %1738 = vrot.lane.b32.xlu1 %v756_v58, %s5461_s20 }
 0x1b2   : > { %v1467_v8 = vpop.permute.xlu0 %1466 }
 0x1b3   : > { %v1087_v56 = vpop.permute.xlu1 %1086  ;;  %v1969_v37 = vsel %vm1954_vm7, %v1936_v55, %v1467_v8 }
 0x1b4   : > { %1232 = vrot.lane.b32.xlu0 %v725_v30, %s5457_s18  ;;  %v759_v30 = vld [vmem:[#allocation2 + $0x15a] sm:$0xff] }
 0x1b5   : > { %1358 = vrot.lane.b32.xlu1 %v756_v58, %s5458_s19 }
 0x1b6   : > { %v1469_v2 = vpop.permute.xlu0 %1468 }
 0x1b7   : > { %v1595_v13 = vpop.permute.xlu1 %1594  ;;  %v1970_v41 = vsel %vm1954_vm7, %v1937_v28, %v1469_v2 }
 0x1b8   : > { %1740 = vrot.lane.b32.xlu0 %v757_v52, %s5461_s20  ;;  %v2002_v5 = vsel %vm1987_vm8, %v1969_v37, %v1595_v13  ;;  %v728_v37 = vld [vmem:[#allocation2 + $0x169] sm:$0xff] }
 0x1b9   : > { %978 = vrot.lane.b32.xlu1 %v756_v58, %s5455_s16  ;;  %v1839_v58 = vsel %vm1822_vm3, %v1806_v19, %v8878_v33  ;;  %v698_v33 = vld [vmem:[#allocation2 + $0x180] sm:$0xff] }
 0x1ba   : > { %v6414_v40 = vpop.permute.xlu0 %1088  ;;  %v1872_v39 = vsel %vm1855_vm4, %v1839_v58, %v1087_v56 }
 0x1bb   : > { %v1215_v43 = vpop.permute.xlu1 %1214 }
 0x1bc   : > { %1360 = vrot.lane.b32.xlu0 %v757_v52, %s5458_s19  ;;  %v1905_v21 = vsel %vm1888_vm5, %v1872_v39, %v1215_v43 }
 0x1bd   : > { %1486 = vrot.lane.b32.xlu1 %v694_v17, %s5459_s24 }
 0x1be   : > { %v1597_v31 = vpop.permute.xlu0 %1596 }
 0x1bf   : > { %v1723_v7 = vpop.permute.xlu1 %1722  ;;  %v2003_v26 = vsel %vm1987_vm8, %v1970_v41, %v1597_v31 }
 0x1c0   : > { %v2035_v20 = vsel %vm2020_vm9, %v2002_v5, %v1723_v7  ;;  %980 = vrot.lane.b32.xlu0 %v757_v52, %s5455_s16  ;;  %v696_v52 = vld [vmem:[#allocation2 + $0x168] sm:$0xff]  ;;  %v697_v5 = vld [vmem:[#allocation2 + $0x170] sm:$0xff] }
 0x1c1   : > { %1106 = vrot.lane.b32.xlu1 %v694_v17, %s5456_s17  ;;  %5341 = vmatprep.mubr.msk.f32.mxu0 %vm2065_vm10, %v2035_v20  ;;  %v1873_v17 = vsel %vm1855_vm4, %v1840_v23, %v6414_v40  ;;  %v1810_v23 = vsel %vm366_vm0, %v6203_v45, %v8885_v49 }
 0x1c2   : > { %v1217_v18 = vpop.permute.xlu0 %1216 }
 0x1c3   : > { %v1343_v60 = vpop.permute.xlu1 %1342  ;;  %v1906_v12 = vsel %vm1888_vm5, %v1873_v17, %v1217_v18  ;;  %v8882_v18 = vld [vmem:[#allocation25_spill] sm:$0xff]  ;;  %v8886_v17 = vld [vmem:[#allocation27_spill] sm:$0xff] }
 0x1c4   : > { %1488 = vrot.lane.b32.xlu0 %v695_v46, %s5459_s24  ;;  %v1938_v8 = vsel %vm1921_vm6, %v1905_v21, %v1343_v60  ;;  %v1808_v60 = vsel %vm366_vm0, %v6151_v0, %v8881_v10 }
 0x1c5   : > { %1614 = vrot.lane.b32.xlu1 %v726_v59, %s5460_s29  ;;  %v1841_v29 = vsel %vm1822_vm3, %v1808_v60, %v8882_v18 }
 0x1c6   : > { %v1725_v4 = vpop.permute.xlu0 %1724 }
 0x1c7   : > { %v1345_v38 = vpop.permute.xlu1 %1344  ;;  %v2036_v25 = vsel %vm2020_vm9, %v2003_v26, %v1725_v4 }
 0x1c8   : > { %1108 = vrot.lane.b32.xlu0 %v695_v46, %s5456_s17  ;;  %5342 = vmatmul.mubr.msk.f32.gmra.mxu0 %vm2065_vm10, %v2036_v25  ;;  %v1939_v55 = vsel %vm1921_vm6, %v1906_v12, %v1345_v38  ;;  %v761_v25 = vld [vmem:[#allocation2 + $0x172] sm:$0xff]  ;;  %v731_v12 = vld [vmem:[#allocation2 + $0x189] sm:$0xff] }
 0x1c9   : > { %1234 = vrot.lane.b32.xlu1 %v726_v59, %s5457_s18 }
 0x1ca   : > { %v1471_v15 = vpop.permute.xlu0 %1470 }
 0x1cb   : > { %v1091_v63 = vpop.permute.xlu1 %1090  ;;  %v1971_v50 = vsel %vm1954_vm7, %v1938_v8, %v1471_v15 }
 0x1cc   : > { %1616 = vrot.lane.b32.xlu0 %v727_v3, %s5460_s29  ;;  %v1874_v28 = vsel %vm1855_vm4, %v1841_v29, %v1091_v63 }
 0x1cd   : > { %1742 = vrot.lane.b32.xlu1 %v758_v42, %s5461_s20 }
 0x1ce   : > { %v1473_v35 = vpop.permute.xlu0 %1472 }
 0x1cf   : > { %v1599_v48 = vpop.permute.xlu1 %1598  ;;  %v1972_v1 = vsel %vm1954_vm7, %v1939_v55, %v1473_v35 }
 0x1d0   : > { %1236 = vrot.lane.b32.xlu0 %v727_v3, %s5457_s18  ;;  %v2004_v13 = vsel %vm1987_vm8, %v1971_v50, %v1599_v48  ;;  %v8883_v48 = vld [vmem:[#allocation8_spill] sm:$0xff] }
 0x1d1   : > { %1362 = vrot.lane.b32.xlu1 %v758_v42, %s5458_s19  ;;  %v1809_v35 = vsel %vm366_vm0, %v6165_v53, %v8883_v48  ;;  %v765_v48 = vld [vmem:[#allocation2 + $0x1a2] sm:$0xff] }
 0x1d2   : > { %v6453_v24 = vpop.permute.xlu0 %1092  ;;  %v1842_v19 = vsel %vm1822_vm3, %v1809_v35, %v8884_v47  ;;  %v764_v35 = vld [vmem:[#allocation2 + $0x19a] sm:$0xff] }
 0x1d3   : > { %v1219_v44 = vpop.permute.xlu1 %1218  ;;  %v1875_v58 = vsel %vm1855_vm4, %v1842_v19, %v6453_v24  ;;  %v730_v24 = vld [vmem:[#allocation2 + $0x181] sm:$0xff] }
 0x1d4   : > { %1744 = vrot.lane.b32.xlu0 %v759_v30, %s5461_s20  ;;  %v1907_v38 = vsel %vm1888_vm5, %v1874_v28, %v1219_v44 }
 0x1d5   : > { %982 = vrot.lane.b32.xlu1 %v758_v42, %s5455_s16 }
 0x1d6   : > { %v1601_v61 = vpop.permute.xlu0 %1600 }
 0x1d7   : > { %v1727_v2 = vpop.permute.xlu1 %1726  ;;  %v2005_v7 = vsel %vm1987_vm8, %v1972_v1, %v1601_v61 }
 0x1d8   : > { %v2037_v56 = vsel %vm2020_vm9, %v2004_v13, %v1727_v2  ;;  %1364 = vrot.lane.b32.xlu0 %v759_v30, %s5458_s19  ;;  %v699_v2 = vld [vmem:[#allocation2 + $0x188] sm:$0xff] }
 0x1d9   : > { %1490 = vrot.lane.b32.xlu1 %v696_v52, %s5459_s24  ;;  %5344 = vmatprep.mubr.msk.f32.mxu0 %vm2065_vm10, %v2037_v56 }
 0x1da   : > { %v1221_v43 = vpop.permute.xlu0 %1220 }
 0x1db   : > { %v1347_v57 = vpop.permute.xlu1 %1346  ;;  %v1908_v44 = vsel %vm1888_vm5, %v1875_v58, %v1221_v43  ;;  %v762_v43 = vld [vmem:[#allocation2 + $0x182] sm:$0xff] }
 0x1dc   : > { %984 = vrot.lane.b32.xlu0 %v759_v30, %s5455_s16  ;;  %v1940_v4 = vsel %vm1921_vm6, %v1907_v38, %v1347_v57  ;;  %v1843_v57 = vsel %vm1822_vm3, %v1810_v23, %v8886_v17  ;;  %v700_v38 = vld [vmem:[#allocation2 + $0x198] sm:$0xff] }
 0x1dd   : > { %1110 = vrot.lane.b32.xlu1 %v696_v52, %s5456_s17 }
 0x1de   : > { %v1729_v20 = vpop.permute.xlu0 %1728 }
 0x1df   : > { %v1349_v31 = vpop.permute.xlu1 %1348  ;;  %v2038_v40 = vsel %vm2020_vm9, %v2005_v7, %v1729_v20 }
 0x1e0   : > { %1492 = vrot.lane.b32.xlu0 %v697_v5, %s5459_s24  ;;  %5345 = vmatmul.mubr.msk.f32.gmra.mxu0 %vm2065_vm10, %v2038_v40  ;;  %v1941_v21 = vsel %vm1921_vm6, %v1908_v44, %v1349_v31  ;;  %v8890_v44 = vld [vmem:[#allocation29_spill] sm:$0xff] }
 0x1e1   : > { %1618 = vrot.lane.b32.xlu1 %v728_v37, %s5460_s29 }
 0x1e2   : > { %v1475_v22 = vpop.permute.xlu0 %1474 }
 0x1e3   : > { %v1095_v36 = vpop.permute.xlu1 %1094  ;;  %v1973_v0 = vsel %vm1954_vm7, %v1940_v4, %v1475_v22 }
 0x1e4   : > { %1112 = vrot.lane.b32.xlu0 %v697_v5, %s5456_s17  ;;  %v1876_v55 = vsel %vm1855_vm4, %v1843_v57, %v1095_v36  ;;  %v8887_v36 = vld [vmem:[#allocation10_spill] sm:$0xff] }
 0x1e5   : > { %1238 = vrot.lane.b32.xlu1 %v728_v37, %s5457_s18 }
 0x1e6   : > { %v1477_v46 = vpop.permute.xlu0 %1476 }
 0x1e7   : > { %v1603_v59 = vpop.permute.xlu1 %1602  ;;  %v1974_v53 = vsel %vm1954_vm7, %v1941_v21, %v1477_v46  ;;  %v668_v46 = vld [vmem:[#allocation2 + $0x18a] sm:$0xff] }
 0x1e8   : > { %1620 = vrot.lane.b32.xlu0 %v729_v62, %s5460_s29  ;;  %v2006_v42 = vsel %vm1987_vm8, %v1973_v0, %v1603_v59 }
 0x1e9   : > { %1746 = vrot.lane.b32.xlu1 %v760_v14, %s5461_s20 }
 0x1ea   : > { %v6492_v26 = vpop.permute.xlu0 %1096 }
 0x1eb   : > { %v1223_v41 = vpop.permute.xlu1 %1222 }
 0x1ec   : > { %1240 = vrot.lane.b32.xlu0 %v729_v62, %s5457_s18  ;;  %v1909_v5 = vsel %vm1888_vm5, %v1876_v55, %v1223_v41  ;;  %v8888_v62 = vld [vmem:[#allocation28_spill] sm:$0xff]  ;;  %v701_v41 = vld [vmem:[#allocation2 + $0x1a0] sm:$0xff] }
 0x1ed   : > { %1366 = vrot.lane.b32.xlu1 %v760_v14, %s5458_s19 }
 0x1ee   : > { %v1605_v15 = vpop.permute.xlu0 %1604 }
 0x1ef   : > { %v1731_v3 = vpop.permute.xlu1 %1730  ;;  %v2007_v8 = vsel %vm1987_vm8, %v1974_v53, %v1605_v15 }
 0x1f0   : > { %v2039_v63 = vsel %vm2020_vm9, %v2006_v42, %v1731_v3  ;;  %1748 = vrot.lane.b32.xlu0 %v761_v25, %s5461_s20  ;;  %v733_v42 = vld [vmem:[#allocation2 + $0x1a1] sm:$0xff]  ;;  %v732_v3 = vld [vmem:[#allocation2 + $0x199] sm:$0xff] }
 0x1f1   : > { %986 = vrot.lane.b32.xlu1 %v760_v14, %s5455_s16  ;;  %5347 = vmatprep.mubr.msk.f32.mxu0 %vm2065_vm10, %v2039_v63  ;;  %v1811_v14 = vsel %vm366_vm0, %v6217_v6, %v8887_v36 }
 0x1f2   : > { %v1225_v39 = vpop.permute.xlu0 %1224  ;;  %v1844_v59 = vsel %vm1822_vm3, %v1811_v14, %v8888_v62  ;;  %v8893_v14 = vld [vmem:[#allocation13_spill] sm:$0xff] }
 0x1f3   : > { %v1351_v30 = vpop.permute.xlu1 %1350  ;;  %v1877_v10 = vsel %vm1855_vm4, %v1844_v59, %v6492_v26  ;;  %v1814_v62 = vsel %vm366_vm0, %v6309_v11, %v8893_v14 }
 0x1f4   : > { %1368 = vrot.lane.b32.xlu0 %v761_v25, %s5458_s19  ;;  %v1942_v7 = vsel %vm1921_vm6, %v1909_v5, %v1351_v30  ;;  %v1910_v29 = vsel %vm1888_vm5, %v1877_v10, %v1225_v39  ;;  %v8889_v30 = vld [vmem:[#allocation11_spill] sm:$0xff] }
 0x1f5   : > { %1494 = vrot.lane.b32.xlu1 %v698_v33, %s5459_s24  ;;  %v1812_v39 = vsel %vm366_vm0, %v6256_v51, %v8889_v30 }
 0x1f6   : > { %v1733_v52 = vpop.permute.xlu0 %1732  ;;  %v1845_v21 = vsel %vm1822_vm3, %v1812_v39, %v8890_v44 }
 0x1f7   : > { %v1353_v50 = vpop.permute.xlu1 %1352  ;;  %v2040_v13 = vsel %vm2020_vm9, %v2007_v8, %v1733_v52 }
 0x1f8   : > { %988 = vrot.lane.b32.xlu0 %v761_v25, %s5455_s16  ;;  %5348 = vmatmul.mubr.msk.f32.gmra.mxu0 %vm2065_vm10, %v2040_v13  ;;  %v1943_v28 = vsel %vm1921_vm6, %v1910_v29, %v1353_v50 }
 0x1f9   : > { %1114 = vrot.lane.b32.xlu1 %v698_v33, %s5456_s17 }
 0x1fa   : > { %v1479_v56 = vpop.permute.xlu0 %1478 }
 0x1fb   : > { %v6521_v61 = vpop.permute.xlu1 %1098  ;;  %v1975_v45 = vsel %vm1954_vm7, %v1942_v7, %v1479_v56 }
 0x1fc   : > { %1496 = vrot.lane.b32.xlu0 %v699_v2, %s5459_s24  ;;  %v1878_v53 = vsel %vm1855_vm4, %v1845_v21, %v6521_v61  ;;  %v8892_v61 = vld [vmem:[#allocation30_spill] sm:$0xff] }
 0x1fd   : > { %1622 = vrot.lane.b32.xlu1 %v730_v24, %s5460_s29 }
 0x1fe   : > { %v1481_v32 = vpop.permute.xlu0 %1480 }
 0x1ff   : > { %v1607_v9 = vpop.permute.xlu1 %1606  ;;  %v1976_v6 = vsel %vm1954_vm7, %v1943_v28, %v1481_v32  ;;  %v8891_v32 = vld [vmem:[#allocation12_spill] sm:$0xff] }
 0x200   : > { %1116 = vrot.lane.b32.xlu0 %v699_v2, %s5456_s17  ;;  %v2008_v31 = vsel %vm1987_vm8, %v1975_v45, %v1607_v9  ;;  %v1813_v49 = vsel %vm366_vm0, %v6271_v27, %v8891_v32 }
 0x201   : > { %1242 = vrot.lane.b32.xlu1 %v730_v24, %s5457_s18  ;;  %v1846_v23 = vsel %vm1822_vm3, %v1813_v49, %v8892_v61 }
 0x202   : > { %v6533_v37 = vpop.permute.xlu0 %1100 }
 0x203   : > { %v1227_v1 = vpop.permute.xlu1 %1226  ;;  %v1879_v17 = vsel %vm1855_vm4, %v1846_v23, %v6533_v37  ;;  %v8896_v23 = vld [vmem:[#allocation16_spill] sm:$0xff] }
 0x204   : > { %1624 = vrot.lane.b32.xlu0 %v731_v12, %s5460_s29  ;;  %v1911_v52 = vsel %vm1888_vm5, %v1878_v53, %v1227_v1  ;;  %v8895_v53 = vld [vmem:[#allocation15_spill] sm:$0xff] }
 0x205   : > { %1750 = vrot.lane.b32.xlu1 %v762_v43, %s5461_s20 }
 0x206   : > { %v1609_v40 = vpop.permute.xlu0 %1608 }
 0x207   : > { %v1735_v20 = vpop.permute.xlu1 %1734  ;;  %v2009_v4 = vsel %vm1987_vm8, %v1976_v6, %v1609_v40 }
 0x208   : > { %v2041_v22 = vsel %vm2020_vm9, %v2008_v31, %v1735_v20  ;;  %1244 = vrot.lane.b32.xlu0 %v731_v12, %s5457_s18 }
 0x209   : > { %1370 = vrot.lane.b32.xlu1 %v762_v43, %s5458_s19  ;;  %5350 = vmatprep.mubr.msk.f32.mxu0 %vm2065_vm10, %v2041_v22 }
 0x20a   : > { %v1229_v18 = vpop.permute.xlu0 %1228 }
 0x20b   : > { %v1355_v60 = vpop.permute.xlu1 %1354  ;;  %v1912_v12 = vsel %vm1888_vm5, %v1879_v17, %v1229_v18 }
 0x20c   : > { %1752 = vrot.lane.b32.xlu0 %v668_v46, %s5461_s20  ;;  %v1944_v13 = vsel %vm1921_vm6, %v1911_v52, %v1355_v60 }
 0x20d   : > { %1372 = vrot.lane.b32.xlu1 %v668_v46, %s5458_s19 }
 0x20e   : > { %v1737_v25 = vpop.permute.xlu0 %1736 }
 0x20f   : > { %v975_v0 = vpop.permute.xlu1 %974  ;;  %v2042_v26 = vsel %vm2020_vm9, %v2009_v4, %v1737_v25  ;;  %v8894_v25 = vld [vmem:[#allocation14_spill] sm:$0xff] }
 0x210   : > { %1498 = vrot.lane.b32.xlu0 %v700_v38, %s5459_s24  ;;  %5351 = vmatmul.mubr.msk.f32.gmra.mxu0 %vm2065_vm10, %v2042_v26  ;;  %v1847_v59 = vsel %vm1822_vm3, %v1814_v62, %v975_v0  ;;  %v1815_v11 = vsel %vm366_vm0, %v6325_v16, %v8894_v25  ;;  %v8897_v62 = vld [vmem:[#allocation17_spill] sm:$0xff] }
 0x211   : > { %1500 = vrot.lane.b32.xlu1 %v701_v41, %s5459_s24 }
 0x212   : > { %v1357_v63 = vpop.permute.xlu0 %1356 }
 0x213   : > { %v1483_v15 = vpop.permute.xlu1 %1482  ;;  %v1945_v55 = vsel %vm1921_vm6, %v1912_v12, %v1357_v63 }
 0x214   : > { %1626 = vrot.lane.b32.xlu0 %v732_v3, %s5460_s29  ;;  %v1977_v24 = vsel %vm1954_vm7, %v1944_v13, %v1483_v15 }
 0x215   : > { %1628 = vrot.lane.b32.xlu1 %v733_v42, %s5460_s29 }
 0x216   : > { %v977_v19 = vpop.permute.xlu0 %976 }
 0x217   : > { %v1103_v47 = vpop.permute.xlu1 %1102  ;;  %v1848_v0 = vsel %vm1822_vm3, %v1815_v11, %v977_v19 }
 0x218   : > { %1754 = vrot.lane.b32.xlu0 %v764_v35, %s5461_s20  ;;  %v1880_v46 = vsel %vm1855_vm4, %v1847_v59, %v1103_v47 }
 0x219   : > { %1756 = vrot.lane.b32.xlu1 %v765_v48, %s5461_s20 }
 0x21a   : > { %v1485_v58 = vpop.permute.xlu0 %1484 }
 0x21b   : > { %v1611_v33 = vpop.permute.xlu1 %1610  ;;  %v1978_v1 = vsel %vm1954_vm7, %v1945_v55, %v1485_v58 }
 0x21c   : > { %v2010_v2 = vsel %vm1987_vm8, %v1977_v24, %v1611_v33 }
 0x21e   : > { %v1105_v50 = vpop.permute.xlu0 %1104 }
 0x21f   : > { %v1231_v8 = vpop.permute.xlu1 %1230  ;;  %v1881_v26 = vsel %vm1855_vm4, %v1848_v0, %v1105_v50  ;;  %v8898_v0 = vld [vmem:[#allocation18_spill] sm:$0xff] }
 0x220   : > { %v1913_v18 = vsel %vm1888_vm5, %v1880_v46, %v1231_v8  ;;  %v1816_v8 = vsel %vm366_vm0, %v6359_v34, %v8895_v53  ;;  %v1817_v34 = vsel %vm366_vm0, %v6380_v54, %v8896_v23  ;;  %v8899_v53 = vld [vmem:[#allocation19_spill] sm:$0xff] }
 0x222   : > { %v1613_v9 = vpop.permute.xlu0 %1612 }
 0x223   : > { %v1739_v56 = vpop.permute.xlu1 %1738  ;;  %v2011_v5 = vsel %vm1987_vm8, %v1978_v1, %v1613_v9 }
 0x224   : > { %v2043_v51 = vsel %vm2020_vm9, %v2010_v2, %v1739_v56 }
 0x225   : > { %5353 = vmatprep.mubr.msk.f32.mxu0 %vm2065_vm10, %v2043_v51 }
 0x226   : > { %v1233_v43 = vpop.permute.xlu0 %1232 }
 0x227   : > { %v1359_v57 = vpop.permute.xlu1 %1358  ;;  %v1914_v15 = vsel %vm1888_vm5, %v1881_v26, %v1233_v43 }
 0x228   : > { %v1946_v29 = vsel %vm1921_vm6, %v1913_v18, %v1359_v57 }
 0x22a   : > { %v1741_v27 = vpop.permute.xlu0 %1740 }
 0x22b   : > { %v979_v7 = vpop.permute.xlu1 %978  ;;  %v2044_v45 = vsel %vm2020_vm9, %v2011_v5, %v1741_v27 }
 0x22c   : > { %5354 = vmatmul.mubr.msk.f32.gmra.mxu0 %vm2065_vm10, %v2044_v45  ;;  %v1849_v50 = vsel %vm1822_vm3, %v1816_v8, %v979_v7 }
 0x22e   : > { %v1361_v20 = vpop.permute.xlu0 %1360 }
 0x22f   : > { %v1487_v31 = vpop.permute.xlu1 %1486  ;;  %v1947_v63 = vsel %vm1921_vm6, %v1914_v15, %v1361_v20 }
 0x230   : > { %v1979_v28 = vsel %vm1954_vm7, %v1946_v29, %v1487_v31 }
 0x232   : > { %v981_v37 = vpop.permute.xlu0 %980 }
 0x233   : > { %v1107_v40 = vpop.permute.xlu1 %1106  ;;  %v1850_v17 = vsel %vm1822_vm3, %v1817_v34, %v981_v37 }
 0x234   : > { %v1882_v52 = vsel %vm1855_vm4, %v1849_v50, %v1107_v40  ;;  %v8900_v50 = vld [vmem:[#allocation20_spill] sm:$0xff] }
 0x236   : > { %v1489_v36 = vpop.permute.xlu0 %1488 }
 0x237   : > { %v1615_v22 = vpop.permute.xlu1 %1614  ;;  %v1980_v48 = vsel %vm1954_vm7, %v1947_v63, %v1489_v36 }
 0x238   : > { %v2012_v6 = vsel %vm1987_vm8, %v1979_v28, %v1615_v22  ;;  %v505_v22 = vld [vmem:[#allocation2 + $0x150] sm:$0xff] }
 0x239   : > { %v1818_v59 = vsel %vm366_vm0, %v505_v22, %v8897_v62 }
 0x23a   : > { %v1109_v60 = vpop.permute.xlu0 %1108 }
 0x23b   : > { %v1235_v10 = vpop.permute.xlu1 %1234  ;;  %v1883_v57 = vsel %vm1855_vm4, %v1850_v17, %v1109_v60 }
 0x23c   : > { %v1915_v2 = vsel %vm1888_vm5, %v1882_v52, %v1235_v10 }
 0x23e   : > { %v1617_v38 = vpop.permute.xlu0 %1616 }
 0x23f   : > { %v1743_v41 = vpop.permute.xlu1 %1742  ;;  %v2013_v35 = vsel %vm1987_vm8, %v1980_v48, %v1617_v38 }
 0x240   : > { %v2045_v4 = vsel %vm2020_vm9, %v2012_v6, %v1743_v41  ;;  %v506_v6 = vld [vmem:[#allocation2 + $0x158] sm:$0xff] }
 0x241   : > { %5356 = vmatprep.mubr.msk.f32.mxu0 %vm2065_vm10, %v2045_v4  ;;  %v1819_v26 = vsel %vm366_vm0, %v506_v6, %v8898_v0 }
 0x242   : > { %v1237_v3 = vpop.permute.xlu0 %1236 }
 0x243   : > { %v1363_v42 = vpop.permute.xlu1 %1362  ;;  %v1916_v55 = vsel %vm1888_vm5, %v1883_v57, %v1237_v3 }
 0x244   : > { %v1948_v56 = vsel %vm1921_vm6, %v1915_v2, %v1363_v42 }
 0x246   : > { %v1745_v33 = vpop.permute.xlu0 %1744 }
 0x247   : > { %v983_v47 = vpop.permute.xlu1 %982  ;;  %v2046_v16 = vsel %vm2020_vm9, %v2013_v35, %v1745_v33 }
 0x248   : > { %5357 = vmatmul.mubr.msk.f32.gmra.mxu0 %vm2065_vm10, %v2046_v16  ;;  %v1851_v46 = vsel %vm1822_vm3, %v1818_v59, %v983_v47 }
 0x24a   : > { %v1365_v19 = vpop.permute.xlu0 %1364 }
 0x24b   : > { %v1491_v58 = vpop.permute.xlu1 %1490  ;;  %v1949_v1 = vsel %vm1921_vm6, %v1916_v55, %v1365_v19 }
 0x24c   : > { %v1981_v9 = vsel %vm1954_vm7, %v1948_v56, %v1491_v58 }
 0x24e   : > { %v985_v39 = vpop.permute.xlu0 %984 }
 0x24f   : > { %v1111_v30 = vpop.permute.xlu1 %1110  ;;  %v1852_v42 = vsel %vm1822_vm3, %v1819_v26, %v985_v39  ;;  %v508_v39 = vld [vmem:[#allocation2 + $0x170] sm:$0xff] }
 0x250   : > { %v1884_v10 = vsel %vm1855_vm4, %v1851_v46, %v1111_v30  ;;  %v507_v30 = vld [vmem:[#allocation2 + $0x168] sm:$0xff]  ;;  %v1821_v52 = vsel %vm366_vm0, %v508_v39, %v8900_v50 }
 0x251   : > { %v1820_v8 = vsel %vm366_vm0, %v507_v30, %v8899_v53 }
 0x252   : > { %v1493_v21 = vpop.permute.xlu0 %1492 }
 0x253   : > { %v1619_v44 = vpop.permute.xlu1 %1618  ;;  %v1982_v5 = vsel %vm1954_vm7, %v1949_v1, %v1493_v21 }
 0x254   : > { %v2014_v51 = vsel %vm1987_vm8, %v1981_v9, %v1619_v44 }
 0x256   : > { %v1113_v24 = vpop.permute.xlu0 %1112 }
 0x257   : > { %v1239_v13 = vpop.permute.xlu1 %1238  ;;  %v1885_v3 = vsel %vm1855_vm4, %v1852_v42, %v1113_v24 }
 0x258   : > { %v1917_v29 = vsel %vm1888_vm5, %v1884_v10, %v1239_v13 }
 0x25a   : > { %v1621_v49 = vpop.permute.xlu0 %1620 }
 0x25b   : > { %v1747_v32 = vpop.permute.xlu1 %1746  ;;  %v2015_v7 = vsel %vm1987_vm8, %v1982_v5, %v1621_v49 }
 0x25c   : > { %v2047_v61 = vsel %vm2020_vm9, %v2014_v51, %v1747_v32 }
 0x25d   : > { %5359 = vmatprep.mubr.msk.f32.mxu0 %vm2065_vm10, %v2047_v61 }
 0x25e   : > { %v1241_v12 = vpop.permute.xlu0 %1240 }
 0x25f   : > { %v1367_v43 = vpop.permute.xlu1 %1366  ;;  %v1918_v48 = vsel %vm1888_vm5, %v1885_v3, %v1241_v12 }
 0x260   : > { %v1950_v28 = vsel %vm1921_vm6, %v1917_v29, %v1367_v43 }
 0x262   : > { %v1749_v45 = vpop.permute.xlu0 %1748 }
 0x263   : > { %v987_v27 = vpop.permute.xlu1 %986  ;;  %v2048_v54 = vsel %vm2020_vm9, %v2015_v7, %v1749_v45  ;;  %v5322_v7 = vpop.f32.mrf.mxu0 }
 0x264   : > { %5360 = vmatmul.mubr.msk.f32.gmra.mxu0 %vm2065_vm10, %v2048_v54  ;;  %v1853_v13 = vsel %vm1822_vm3, %v1820_v8, %v987_v27  ;;  %v6679_v54 = vld [vmem:[%s8832_s2] ss:$0 sm:$0xff] }
 0x265   : > { %v2232_v27 = vpop.f32.mrf.mxu0 }
 0x266   : > { %v1369_v20 = vpop.permute.xlu0 %1368 }
 0x267   : > { %v1495_v31 = vpop.permute.xlu1 %1494  ;;  %v1951_v35 = vsel %vm1921_vm6, %v1918_v48, %v1369_v20  ;;  %v5325_v45 = vpop.f32.mrf.mxu0  ;;  %v6682_v20 = vadd.f32 %v6679_v54, %v2232_v27 }
 0x268   : > { %v1983_v41 = vsel %vm1954_vm7, %v1950_v28, %v1495_v31 }
 0x269   : > { %v2242_v31 = vpop.f32.mrf.mxu0 }
 0x26a   : > { %v989_v37 = vpop.permute.xlu0 %988  ;;  %v6688_v22 = vadd.f32 %v6679_v54, %v2242_v31 }
 0x26b   : > { %v1115_v40 = vpop.permute.xlu1 %1114  ;;  %v1854_v24 = vsel %vm1822_vm3, %v1821_v52, %v989_v37  ;;  %v6685_v37 = vadd.f32 %v5322_v7, %v6679_v54 }
 0x26c   : > { %v1886_v2 = vsel %vm1855_vm4, %v1853_v13, %v1115_v40  ;;  %v5328_v40 = vpop.f32.mrf.mxu0  ;;  %v2394_v59 = vsel %vm366_vm0, %v6688_v22, 0.0 }
 0x26d   : > { %v2392_v62 = vsel %vm366_vm0, %v6685_v37, 0.0 }
 0x26e   : > { %v1497_v14 = vpop.permute.xlu0 %1496 }
 0x26f   : > { %v1623_v36 = vpop.permute.xlu1 %1622  ;;  %v1984_v47 = vsel %vm1954_vm7, %v1951_v35, %v1497_v14  ;;  %v2252_v14 = vpop.f32.mrf.mxu0 }
 0x270   : > { %v2016_v38 = vsel %vm1987_vm8, %v1983_v41, %v1623_v36  ;;  %v2391_v36 = vsel %vm366_vm0, %v6682_v20, 0.0 }
 0x271   : > { %v2393_v46 = vadd.f32 %v2392_v62, %v2391_v36  ;;  %v5331_v10 = vpop.f32.mrf.mxu0 }
 0x272   : > { %v1117_v18 = vpop.permute.xlu0 %1116  ;;  %v6717_v48 = vadd.f32 %v5331_v10, %v6679_v54 }
 0x273   : > { %v1243_v60 = vpop.permute.xlu1 %1242  ;;  %v1887_v56 = vsel %vm1855_vm4, %v1854_v24, %v1117_v18  ;;  %v6700_v18 = vadd.f32 %v6679_v54, %v2252_v14  ;;  %v2395_v29 = vadd.f32 %v2394_v59, %v2393_v46  ;;  %v2262_v28 = vpop.f32.mrf.mxu0 }
 0x274   : > { %v1919_v32 = vsel %vm1888_vm5, %v1886_v2, %v1243_v60  ;;  %v6697_v60 = vadd.f32 %v5325_v45, %v6679_v54 }
 0x275   : > { %v2398_v41 = vsel %vm366_vm0, %v6700_v18, 0.0 }
 0x276   : > { %v1625_v25 = vpop.permute.xlu0 %1624  ;;  %v2396_v6 = vsel %vm366_vm0, %v6697_v60, 0.0 }
 0x277   : > { %v1751_v4 = vpop.permute.xlu1 %1750  ;;  %v2017_v33 = vsel %vm1987_vm8, %v1984_v47, %v1625_v25  ;;  %v6707_v25 = vadd.f32 %v5328_v40, %v6679_v54 }
 0x278   : > { %v2049_v11 = vsel %vm2020_vm9, %v2016_v38, %v1751_v4  ;;  %v2397_v38 = vadd.f32 %v2396_v6, %v2395_v29  ;;  %v5334_v4 = vpop.f32.mrf.mxu0 }
 0x279   : > { %5362 = vmatprep.mubr.msk.f32.mxu0 %vm2065_vm10, %v2049_v11  ;;  %v6710_v11 = vadd.f32 %v6679_v54, %v2262_v28  ;;  %v2400_v42 = vsel %vm366_vm0, %v6707_v25, 0.0  ;;  %v6727_v39 = vadd.f32 %v5334_v4, %v6679_v54 }
 0x27a   : > { %v1245_v63 = vpop.permute.xlu0 %1244  ;;  %v2399_v0 = vadd.f32 %v2398_v41, %v2397_v38  ;;  %v2272_v26 = vpop.f32.mrf.mxu0 }
 0x27b   : > { %v1371_v15 = vpop.permute.xlu1 %1370  ;;  %v1920_v49 = vsel %vm1888_vm5, %v1887_v56, %v1245_v63  ;;  %v2402_v3 = vsel %vm366_vm0, %v6710_v11, 0.0  ;;  %v6720_v35 = vadd.f32 %v6679_v54, %v2272_v26  ;;  %v2408_v8 = vsel %vm366_vm0, %v6727_v39, 0.0 }
 0x27c   : > { %v1952_v61 = vsel %vm1921_vm6, %v1919_v32, %v1371_v15  ;;  %v2401_v15 = vadd.f32 %v2400_v42, %v2399_v0  ;;  %v5337_v63 = vpop.f32.mrf.mxu0 }
 0x27d   : > { %v6737_v24 = vadd.f32 %v5337_v63, %v6679_v54 }
 0x27e   : > { %v1753_v58 = vpop.permute.xlu0 %1752  ;;  %v2403_v47 = vadd.f32 %v2402_v3, %v2401_v15 }
 0x27f   : > { %v1373_v16 = vpop.permute.xlu1 %1372  ;;  %v2050_v19 = vsel %vm2020_vm9, %v2017_v33, %v1753_v58  ;;  %v2282_v33 = vpop.f32.mrf.mxu0  ;;  %v2406_v58 = vsel %vm366_vm0, %v6720_v35, 0.0 }
 0x280   : > { %5363 = vmatmul.mubr.msk.f32.gmra.mxu0 %vm2065_vm10, %v2050_v19  ;;  %v1953_v23 = vsel %vm1921_vm6, %v1920_v49, %v1373_v16  ;;  %v2404_v16 = vsel %vm366_vm0, %v6717_v48, 0.0 }
 0x281   : > { %v2405_v19 = vadd.f32 %v2404_v16, %v2403_v47  ;;  %v5340_v30 = vpop.f32.mrf.mxu0 }
 0x282   : > { %v1499_v21 = vpop.permute.xlu0 %1498 }
 0x283   : > { %v1501_v44 = vpop.permute.xlu1 %1500  ;;  %v1985_v17 = vsel %vm1954_vm7, %v1952_v61, %v1499_v21  ;;  %v2407_v21 = vadd.f32 %v2406_v58, %v2405_v19  ;;  %v2292_v53 = vpop.f32.mrf.mxu0 }
 0x284   : > { %v1986_v34 = vsel %vm1954_vm7, %v1953_v23, %v1501_v44  ;;  %v6730_v44 = vadd.f32 %v6679_v54, %v2282_v33  ;;  %v6740_v2 = vadd.f32 %v6679_v54, %v2292_v53  ;;  %v6747_v23 = vadd.f32 %v5340_v30, %v6679_v54 }
 0x285   : > { %v2409_v52 = vadd.f32 %v2408_v8, %v2407_v21 }
 0x286   : > { %v1627_v51 = vpop.permute.xlu0 %1626  ;;  %v2410_v50 = vsel %vm366_vm0, %v6730_v44, 0.0  ;;  %v2414_v32 = vsel %vm366_vm0, %v6740_v2, 0.0 }
 0x287   : > { %v1629_v9 = vpop.permute.xlu1 %1628  ;;  %v2018_v43 = vsel %vm1987_vm8, %v1985_v17, %v1627_v51  ;;  %v2411_v56 = vadd.f32 %v2410_v50, %v2409_v52  ;;  %v2412_v51 = vsel %vm366_vm0, %v6737_v24, 0.0 }
 0x288   : > { %v2019_v57 = vsel %vm1987_vm8, %v1986_v34, %v1629_v9  ;;  %v5343_v13 = vpop.f32.mrf.mxu0 }
 0x289   : > { %v2413_v49 = vadd.f32 %v2412_v51, %v2411_v56 }
 0x28a   : > { %v1755_v55 = vpop.permute.xlu0 %1754  ;;  %v2302_v9 = vpop.f32.mrf.mxu0 }
 0x28b   : > { %v1757_v12 = vpop.permute.xlu1 %1756  ;;  %v2051_v5 = vsel %vm2020_vm9, %v2018_v43, %v1755_v55  ;;  %v6750_v34 = vadd.f32 %v6679_v54, %v2302_v9  ;;  %v2415_v17 = vadd.f32 %v2414_v32, %v2413_v49  ;;  %v2416_v43 = vsel %vm366_vm0, %v6747_v23, 0.0 }
 0x28c   : > { %v2052_v1 = vsel %vm2020_vm9, %v2019_v57, %v1757_v12  ;;  %5365 = vmatprep.mubr.msk.f32.mxu0 %vm2065_vm10, %v2051_v5  ;;  %v6757_v5 = vadd.f32 %v5343_v13, %v6679_v54 }
 0x28d   : > { %5366 = vmatmul.mubr.msk.f32.gmra.mxu0 %vm2065_vm10, %v2052_v1  ;;  %v2418_v12 = vsel %vm366_vm0, %v6750_v34, 0.0  ;;  %v2417_v55 = vadd.f32 %v2416_v43, %v2415_v17 }
 0x28e   : > { %v2420_v31 = vsel %vm366_vm0, %v6757_v5, 0.0 }
 0x28f   : > { %v2419_v27 = vadd.f32 %v2418_v12, %v2417_v55 }
 0x291   : > { %v2421_v36 = vadd.f32 %v2420_v31, %v2419_v27 }
 0x2a0   : > { %v5346_v61 = vpop.f32.mrf.mxu0 }
 0x2a1   : > { %v6767_v62 = vadd.f32 %v5346_v61, %v6679_v54 }
 0x2a2   : > { %v2312_v57 = vpop.f32.mrf.mxu0 }
 0x2a3   : > { %v6760_v7 = vadd.f32 %v6679_v54, %v2312_v57  ;;  %v2424_v29 = vsel %vm366_vm0, %v6767_v62, 0.0 }
 0x2a5   : > { %v2422_v40 = vsel %vm366_vm0, %v6760_v7, 0.0 }
 0x2a6   : > { %v2423_v46 = vadd.f32 %v2422_v40, %v2421_v36 }
 0x2a8   : > { %v2425_v6 = vadd.f32 %v2424_v29, %v2423_v46 }
 0x2b8   : > { %v5349_v1 = vpop.f32.mrf.mxu0 }
 0x2b9   : > { %v6777_v38 = vadd.f32 %v5349_v1, %v6679_v54 }
 0x2ba   : > { %v2322_v45 = vpop.f32.mrf.mxu0 }
 0x2bb   : > { %v6770_v59 = vadd.f32 %v6679_v54, %v2322_v45  ;;  %v2428_v42 = vsel %vm366_vm0, %v6777_v38, 0.0 }
 0x2bd   : > { %v2426_v28 = vsel %vm366_vm0, %v6770_v59, 0.0 }
 0x2be   : > { %v2427_v0 = vadd.f32 %v2426_v28, %v2425_v6 }
 0x2c0   : > { %v2429_v15 = vadd.f32 %v2428_v42, %v2427_v0 }
 0x2d0   : > { %v5352_v14 = vpop.f32.mrf.mxu0 }
 0x2d1   : > { %v6787_v47 = vadd.f32 %v5352_v14, %v6679_v54 }
 0x2d2   : > { %v2332_v10 = vpop.f32.mrf.mxu0 }
 0x2d3   : > { %v6780_v4 = vadd.f32 %v6679_v54, %v2332_v10  ;;  %v2432_v19 = vsel %vm366_vm0, %v6787_v47, 0.0 }
 0x2d5   : > { %v2430_v3 = vsel %vm366_vm0, %v6780_v4, 0.0 }
 0x2d6   : > { %v2431_v16 = vadd.f32 %v2430_v3, %v2429_v15 }
 0x2d8   : > { %v2433_v21 = vadd.f32 %v2432_v19, %v2431_v16 }
 0x2ec   : > { %v5355_v41 = vpop.f32.mrf.mxu0 }
 0x2ed   : > { %v6797_v8 = vadd.f32 %v5355_v41, %v6679_v54 }
 0x2ee   : > { %v2342_v26 = vpop.f32.mrf.mxu0 }
 0x2ef   : > { %v6790_v33 = vadd.f32 %v6679_v54, %v2342_v26  ;;  %v2436_v56 = vsel %vm366_vm0, %v6797_v8, 0.0 }
 0x2f1   : > { %v2434_v30 = vsel %vm366_vm0, %v6790_v33, 0.0 }
 0x2f2   : > { %v2435_v52 = vadd.f32 %v2434_v30, %v2433_v21 }
 0x2f4   : > { %v2437_v51 = vadd.f32 %v2436_v56, %v2435_v52 }
 0x308   : > { %v5358_v63 = vpop.f32.mrf.mxu0 }
 0x309   : > { %v6807_v32 = vadd.f32 %v5358_v63, %v6679_v54 }
 0x30a   : > { %v2352_v58 = vpop.f32.mrf.mxu0 }
 0x30b   : > { %v6800_v50 = vadd.f32 %v6679_v54, %v2352_v58  ;;  %v2440_v43 = vsel %vm366_vm0, %v6807_v32, 0.0 }
 0x30d   : > { %v2438_v9 = vsel %vm366_vm0, %v6800_v50, 0.0 }
 0x30e   : > { %v2439_v17 = vadd.f32 %v2438_v9, %v2437_v51 }
 0x310   : > { %v2441_v55 = vadd.f32 %v2440_v43, %v2439_v17 }
 0x324   : > { %v5361_v53 = vpop.f32.mrf.mxu0 }
 0x325   : > { %v6817_v1 = vadd.f32 %v5361_v53, %v6679_v54 }
 0x326   : > { %v2362_v13 = vpop.f32.mrf.mxu0 }
 0x327   : > { %v6810_v49 = vadd.f32 %v6679_v54, %v2362_v13  ;;  %v2444_v31 = vsel %vm366_vm0, %v6817_v1, 0.0 }
 0x329   : > { %v2442_v12 = vsel %vm366_vm0, %v6810_v49, 0.0 }
 0x32a   : > { %v2443_v45 = vadd.f32 %v2442_v12, %v2441_v55 }
 0x32c   : > { %v2445_v36 = vadd.f32 %v2444_v31, %v2443_v45 }
 0x340   : > { %v5364_v61 = vpop.f32.mrf.mxu0 }
 0x341   : > { %v6827_v14 = vadd.f32 %v5364_v61, %v6679_v54 }
 0x342   : > { %v2372_v57 = vpop.f32.mrf.mxu0 }
 0x343   : > { %v6820_v27 = vadd.f32 %v6679_v54, %v2372_v57  ;;  %v2448_v28 = vsel %vm366_vm0, %v6827_v14, 0.0 }
 0x345   : > { %v2446_v40 = vsel %vm366_vm0, %v6820_v27, 0.0 }
 0x346   : > { %v2447_v46 = vadd.f32 %v2446_v40, %v2445_v36 }
 0x348   : > { %v2449_v0 = vadd.f32 %v2448_v28, %v2447_v46 }
 0x34d   : > { %v5367_v10 = vpop.f32.mrf.mxu0 }
 0x34e   : > { %v6832_v6 = vadd.f32 %v5367_v10, %v6679_v54 }
 0x34f   : > { %v2382_v29 = vpop.f32.mrf.mxu0 }
 0x350   : > { %v6835_v41 = vadd.f32 %v6679_v54, %v2382_v29  ;;  %v2452_v3 = vsel %vm366_vm0, %v6832_v6, 0.0 }
 0x352   : > { %v2450_v26 = vsel %vm366_vm0, %v6835_v41, 0.0 }
 0x353   : > { %v2451_v42 = vadd.f32 %v2450_v26, %v2449_v0 }
 0x355   : > { %v2453_v15 = vadd.f32 %v2452_v3, %v2451_v42 }
 0x357   : > { %v2454_v63 = vrot.slane %v2453_v15, 4 }
 0x359   : > { %v2455_v16 = vadd.f32 %v2454_v63, %v2453_v15 }
 0x35b   : > { %v2456_v58 = vrot.slane %v2455_v16, 2 }
 0x35d   : > { %v2457_v19 = vadd.f32 %v2456_v58, %v2455_v16 }
 0x35f   : > { %v2458_v30 = vrot.slane %v2457_v19, 1 }
 0x361   : > { %v2459_v21 = vadd.f32 %v2458_v30, %v2457_v19 }
 0x363   : > { %v6841_v53 = vmul.f32 0.00390625, %v2459_v21 }
 0x365   : > { %v6845_v54 = vsub.f32 %v6682_v20, %v6841_v53  ;;  %v6849_v52 = vsub.f32 %v6685_v37, %v6841_v53  ;;  %v6853_v13 = vsub.f32 %v6688_v22, %v6841_v53  ;;  %v6857_v56 = vsub.f32 %v6697_v60, %v6841_v53 }
 0x366   : > { %v6865_v20 = vsub.f32 %v6700_v18, %v6841_v53  ;;  %v6871_v22 = vsub.f32 %v6707_v25, %v6841_v53  ;;  %v6879_v43 = vsub.f32 %v6710_v11, %v6841_v53  ;;  %v6886_v25 = vsub.f32 %v6717_v48, %v6841_v53 }
 0x367   : > { %v2494_v9 = vmul.f32 %v6845_v54, %v6845_v54  ;;  %v2495_v51 = vmul.f32 %v6849_v52, %v6849_v52  ;;  %v2496_v37 = vmul.f32 %v6853_v13, %v6853_v13  ;;  %v2497_v60 = vmul.f32 %v6857_v56, %v6857_v56 }
 0x368   : > { %v2498_v18 = vmul.f32 %v6865_v20, %v6865_v20  ;;  %v2499_v45 = vmul.f32 %v6871_v22, %v6871_v22  ;;  %v6893_v11 = vsub.f32 %v6720_v35, %v6841_v53  ;;  %v2500_v36 = vmul.f32 %v6879_v43, %v6879_v43 }
 0x369   : > { %v2526_v61 = vsel %vm366_vm0, %v2494_v9, 0.0  ;;  %v2527_v17 = vsel %vm366_vm0, %v2495_v51, 0.0  ;;  %v2529_v12 = vsel %vm366_vm0, %v2496_v37, 0.0  ;;  %v2531_v31 = vsel %vm366_vm0, %v2497_v60, 0.0 }
 0x36a   : > { %v2528_v57 = vadd.f32 %v2527_v17, %v2526_v61  ;;  %v2533_v46 = vsel %vm366_vm0, %v2498_v18, 0.0  ;;  %v6900_v48 = vsub.f32 %v6727_v39, %v6841_v53  ;;  %v2501_v29 = vmul.f32 %v6886_v25, %v6886_v25 }
 0x36b   : > { %v2535_v28 = vsel %vm366_vm0, %v2499_v45, 0.0  ;;  %v6907_v35 = vsub.f32 %v6730_v44, %v6841_v53  ;;  %v2502_v26 = vmul.f32 %v6893_v11, %v6893_v11  ;;  %v2537_v42 = vsel %vm366_vm0, %v2500_v36, 0.0 }
 0x36c   : > { %v2530_v55 = vadd.f32 %v2529_v12, %v2528_v57  ;;  %v6914_v39 = vsub.f32 %v6737_v24, %v6841_v53  ;;  %v2503_v15 = vmul.f32 %v6900_v48, %v6900_v48  ;;  %v2539_v63 = vsel %vm366_vm0, %v2501_v29, 0.0 }
 0x36d   : > { %v6921_v44 = vsub.f32 %v6740_v2, %v6841_v53  ;;  %v2504_v58 = vmul.f32 %v6907_v35, %v6907_v35  ;;  %v2541_v19 = vsel %vm366_vm0, %v2502_v26, 0.0  ;;  %v6928_v24 = vsub.f32 %v6747_v23, %v6841_v53 }
 0x36e   : > { %v2532_v40 = vadd.f32 %v2531_v31, %v2530_v55  ;;  %v2505_v21 = vmul.f32 %v6914_v39, %v6914_v39  ;;  %v2543_v9 = vsel %vm366_vm0, %v2503_v15, 0.0  ;;  %v6935_v2 = vsub.f32 %v6750_v34, %v6841_v53 }
 0x36f   : > { %v2506_v37 = vmul.f32 %v6921_v44, %v6921_v44  ;;  %v2545_v60 = vsel %vm366_vm0, %v2504_v58, 0.0  ;;  %v6942_v23 = vsub.f32 %v6757_v5, %v6841_v53  ;;  %v2507_v17 = vmul.f32 %v6928_v24, %v6928_v24 }
 0x370   : > { %v2534_v10 = vadd.f32 %v2533_v46, %v2532_v40  ;;  %v2547_v57 = vsel %vm366_vm0, %v2505_v21, 0.0  ;;  %v6949_v34 = vsub.f32 %v6760_v7, %v6841_v53  ;;  %v2508_v12 = vmul.f32 %v6935_v2, %v6935_v2 }
 0x371   : > { %v2549_v55 = vsel %vm366_vm0, %v2506_v37, 0.0  ;;  %v6956_v5 = vsub.f32 %v6767_v62, %v6841_v53  ;;  %v2509_v31 = vmul.f32 %v6942_v23, %v6942_v23  ;;  %v2551_v40 = vsel %vm366_vm0, %v2507_v17, 0.0 }
 0x372   : > { %v2536_v0 = vadd.f32 %v2535_v28, %v2534_v10  ;;  %v6963_v7 = vsub.f32 %v6770_v59, %v6841_v53  ;;  %v2510_v46 = vmul.f32 %v6949_v34, %v6949_v34  ;;  %v2553_v10 = vsel %vm366_vm0, %v2508_v12, 0.0 }
 0x373   : > { %v6970_v62 = vsub.f32 %v6777_v38, %v6841_v53  ;;  %v2511_v28 = vmul.f32 %v6956_v5, %v6956_v5  ;;  %v6977_v59 = vsub.f32 %v6780_v4, %v6841_v53  ;;  %v6984_v38 = vsub.f32 %v6787_v47, %v6841_v53 }
 0x374   : > { %v2538_v3 = vadd.f32 %v2537_v42, %v2536_v0  ;;  %v2555_v0 = vsel %vm366_vm0, %v2509_v31, 0.0  ;;  %v2512_v42 = vmul.f32 %v6963_v7, %v6963_v7  ;;  %v6991_v4 = vsub.f32 %v6790_v33, %v6841_v53 }
 0x375   : > { %v6998_v47 = vsub.f32 %v6797_v8, %v6841_v53  ;;  %v7005_v33 = vsub.f32 %v6800_v50, %v6841_v53  ;;  %v7012_v8 = vsub.f32 %v6807_v32, %v6841_v53  ;;  %v7019_v50 = vsub.f32 %v6810_v49, %v6841_v53 }
 0x376   : > { %v2540_v16 = vadd.f32 %v2539_v63, %v2538_v3  ;;  %v2557_v3 = vsel %vm366_vm0, %v2510_v46, 0.0  ;;  %v2513_v63 = vmul.f32 %v6970_v62, %v6970_v62  ;;  %v7026_v32 = vsub.f32 %v6817_v1, %v6841_v53 }
 0x377   : > { %v7033_v49 = vsub.f32 %v6820_v27, %v6841_v53  ;;  %v7040_v1 = vsub.f32 %v6827_v14, %v6841_v53  ;;  %v2492_v27 = vsub.f32 %v6835_v41, %v6841_v53 }
 0x378   : > { %v2542_v30 = vadd.f32 %v2541_v19, %v2540_v16  ;;  %v2559_v16 = vsel %vm366_vm0, %v2511_v28, 0.0  ;;  %v2514_v19 = vmul.f32 %v6977_v59, %v6977_v59 }
 0x379   : > { %v2523_v14 = vmul.f32 %v7040_v1, %v7040_v1 }
 0x37a   : > { %v2544_v51 = vadd.f32 %v2543_v9, %v2542_v30  ;;  %v2561_v30 = vsel %vm366_vm0, %v2512_v42, 0.0  ;;  %v2515_v9 = vmul.f32 %v6984_v38, %v6984_v38 }
 0x37c   : > { %v2546_v61 = vadd.f32 %v2545_v60, %v2544_v51  ;;  %v2563_v51 = vsel %vm366_vm0, %v2513_v63, 0.0  ;;  %v2516_v60 = vmul.f32 %v6991_v4, %v6991_v4 }
 0x37e   : > { %v2548_v18 = vadd.f32 %v2547_v57, %v2546_v61  ;;  %v2565_v61 = vsel %vm366_vm0, %v2514_v19, 0.0  ;;  %v2517_v57 = vmul.f32 %v6998_v47, %v6998_v47 }
 0x380   : > { %v2550_v45 = vadd.f32 %v2549_v55, %v2548_v18  ;;  %v2567_v18 = vsel %vm366_vm0, %v2515_v9, 0.0  ;;  %v2518_v55 = vmul.f32 %v7005_v33, %v7005_v33 }
 0x382   : > { %v2552_v36 = vadd.f32 %v2551_v40, %v2550_v45  ;;  %v2569_v45 = vsel %vm366_vm0, %v2516_v60, 0.0  ;;  %v2519_v40 = vmul.f32 %v7012_v8, %v7012_v8 }
 0x384   : > { %v2554_v29 = vadd.f32 %v2553_v10, %v2552_v36  ;;  %v2571_v36 = vsel %vm366_vm0, %v2517_v57, 0.0  ;;  %v2520_v10 = vmul.f32 %v7019_v50, %v7019_v50 }
 0x386   : > { %v2556_v26 = vadd.f32 %v2555_v0, %v2554_v29  ;;  %v2573_v29 = vsel %vm366_vm0, %v2518_v55, 0.0  ;;  %v2521_v0 = vmul.f32 %v7026_v32, %v7026_v32 }
 0x388   : > { %v2558_v15 = vadd.f32 %v2557_v3, %v2556_v26  ;;  %v2575_v26 = vsel %vm366_vm0, %v2519_v40, 0.0  ;;  %v2522_v3 = vmul.f32 %v7033_v49, %v7033_v49 }
 0x38a   : > { %v2560_v58 = vadd.f32 %v2559_v16, %v2558_v15  ;;  %v2577_v15 = vsel %vm366_vm0, %v2520_v10, 0.0  ;;  %v7052_v16 = vsub.f32 %v6832_v6, %v6841_v53  ;;  %v2598_v10 = vld [vmem:[%s8833_s3] sm:$0x1] }
 0x38c   : > { %v2562_v21 = vadd.f32 %v2561_v30, %v2560_v58  ;;  %v2579_v58 = vsel %vm366_vm0, %v2521_v0, 0.0  ;;  %v2524_v30 = vmul.f32 %v2492_v27, %v2492_v27  ;;  %v2525_v9 = vmul.f32 %v7052_v16, %v7052_v16 }
 0x38e   : > { %v2564_v37 = vadd.f32 %v2563_v51, %v2562_v21  ;;  %v2581_v21 = vsel %vm366_vm0, %v2522_v3, 0.0  ;;  %v2583_v51 = vsel %vm366_vm0, %v2523_v14, 0.0  ;;  %v2585_v60 = vsel %vm366_vm0, %v2524_v30, 0.0 }
 0x38f   : > { %v2587_v53 = vsel %vm366_vm0, %v2525_v9, 0.0 }
 0x390   : > { %v2566_v17 = vadd.f32 %v2565_v61, %v2564_v37 }
 0x392   : > { %v2568_v12 = vadd.f32 %v2567_v18, %v2566_v17 }
 0x394   : > { %v2570_v31 = vadd.f32 %v2569_v45, %v2568_v12 }
 0x396   : > { %v2572_v46 = vadd.f32 %v2571_v36, %v2570_v31  ;;  %v2600_v36 = vlaneseq }
 0x398   : > { %v2574_v28 = vadd.f32 %v2573_v29, %v2572_v46  ;;  %v7063_v46 = vshrl.u32 %v2600_v36, 7 }
 0x39a   : > { %v2576_v42 = vadd.f32 %v2575_v26, %v2574_v28  ;;  %8901 = vst [vmem:[#allocation3_spill] sm:$0xff] %v7063_v46  ;;  %v8841_v29 = vsub.s32 0, %v7063_v46 }
 0x39c   : > { %v2578_v63 = vadd.f32 %v2577_v15, %v2576_v42  ;;  %v7074_v42 = vld [vmem:[%s8834_s4] ss:$0 sm:$0xff] }
 0x39e   : > { %v2580_v19 = vadd.f32 %v2579_v58, %v2578_v63 }
 0x3a0   : > { %v2582_v41 = vadd.f32 %v2581_v21, %v2580_v19 }
 0x3a2   : > { %v2584_v37 = vadd.f32 %v2583_v51, %v2582_v41 }
 0x3a4   : > { %v2586_v6 = vadd.f32 %v2585_v60, %v2584_v37 }
 0x3a6   : > { %v2588_v61 = vadd.f32 %v2587_v53, %v2586_v6 }
 0x3a8   : > { %v2589_v17 = vrot.slane %v2588_v61, 4 }
 0x3aa   : > { %v2590_v57 = vadd.f32 %v2589_v17, %v2588_v61 }
 0x3ac   : > { %v2591_v18 = vrot.slane %v2590_v57, 2 }
 0x3ae   : > { %v2592_v12 = vadd.f32 %v2591_v18, %v2590_v57 }
 0x3b0   : > { %v2593_v55 = vrot.slane %v2592_v12, 1 }
 0x3b2   : > { %v2594_v45 = vadd.f32 %v2593_v55, %v2592_v12 }
 0x3b4   : > { %v2595_v31 = vmul.f32 0.00390625, %v2594_v45 }
 0x3b6   : > { %v2596_v40 = vadd.f32 1e-05, %v2595_v31 }
 0x3b8   : > { %5442 = vrsqrt.f32 %v2596_v40 }
 0x3c5   : > { %v5443_v28 = vpop.eup %5442 }
 0x3c6   : > { %v2599_v0 = vmul.f32 %v5443_v28, %v2598_v10 }
 0x3c8   : > { %v2603_v26 = vrot.slane %v2599_v0, %v8841_v29 }
 0x3ca   : > { %v2634_v3 = vmul.f32 %v2603_v26, %v2492_v27  ;;  %v2604_v15 = vmul.f32 %v2603_v26, %v6845_v54  ;;  %v2605_v63 = vmul.f32 %v2603_v26, %v6849_v52  ;;  %v2606_v14 = vmul.f32 %v2603_v26, %v6853_v13 }
 0x3cb   : > { %v2607_v58 = vmul.f32 %v2603_v26, %v6857_v56  ;;  %v2608_v19 = vmul.f32 %v2603_v26, %v6865_v20  ;;  %v2609_v30 = vmul.f32 %v2603_v26, %v6871_v22  ;;  %v2610_v21 = vmul.f32 %v2603_v26, %v6879_v43 }
 0x3cc   : > { %v2673_v41 = vadd.f32 %v7074_v42, %v2634_v3  ;;  %v2611_v9 = vmul.f32 %v2603_v26, %v6886_v25  ;;  %v2612_v27 = vmul.f32 %v2603_v26, %v6893_v11  ;;  %v2613_v54 = vmul.f32 %v2603_v26, %v6900_v48 }
 0x3cd   : > { %v2614_v52 = vmul.f32 %v2603_v26, %v6907_v35  ;;  %v2615_v13 = vmul.f32 %v2603_v26, %v6914_v39  ;;  %v2616_v56 = vmul.f32 %v2603_v26, %v6921_v44  ;;  %v2617_v20 = vmul.f32 %v2603_v26, %v6928_v24 }
 0x3ce   : > { %v2705_v51 = vmax.f32 %v2673_v41, 0.0  ;;  %v2618_v22 = vmul.f32 %v2603_v26, %v6935_v2  ;;  %v2619_v43 = vmul.f32 %v2603_v26, %v6942_v23  ;;  %v2620_v37 = vmul.f32 %v2603_v26, %v6949_v34 }
 0x3cf   : > { %v2621_v25 = vmul.f32 %v2603_v26, %v6956_v5  ;;  %v2622_v11 = vmul.f32 %v2603_v26, %v6963_v7  ;;  %v2623_v48 = vmul.f32 %v2603_v26, %v6970_v62  ;;  %v2624_v35 = vmul.f32 %v2603_v26, %v6977_v59 }
 0x3d0   : > { %v2625_v39 = vmul.f32 %v2603_v26, %v6984_v38  ;;  %v2626_v44 = vmul.f32 %v2603_v26, %v6991_v4  ;;  %v2627_v24 = vmul.f32 %v2603_v26, %v6998_v47  ;;  %v2628_v2 = vmul.f32 %v2603_v26, %v7005_v33  ;;  %2737 = vst.msk [vmem:[#allocation2 + $0x181] sm:$0xff] %vm366_vm0, %v2705_v51 }
 0x3d1   : > { %v2629_v23 = vmul.f32 %v2603_v26, %v7012_v8  ;;  %v2630_v34 = vmul.f32 %v2603_v26, %v7019_v50  ;;  %v2631_v5 = vmul.f32 %v2603_v26, %v7026_v32  ;;  %v2632_v7 = vmul.f32 %v2603_v26, %v7033_v49 }
 0x3d2   : > { %v2633_v62 = vmul.f32 %v2603_v26, %v7040_v1  ;;  %v2635_v59 = vmul.f32 %v2603_v26, %v7052_v16  ;;  %v2646_v38 = vadd.f32 %v7074_v42, %v2607_v58  ;;  %v2643_v4 = vadd.f32 %v7074_v42, %v2604_v15 }
 0x3d3   : > { %v2644_v47 = vadd.f32 %v7074_v42, %v2605_v63  ;;  %v2645_v33 = vadd.f32 %v7074_v42, %v2606_v14  ;;  %v2647_v8 = vadd.f32 %v7074_v42, %v2608_v19  ;;  %v2648_v50 = vadd.f32 %v7074_v42, %v2609_v30 }
 0x3d4   : > { %v2678_v60 = vmax.f32 %v2646_v38, 0.0  ;;  %v2649_v32 = vadd.f32 %v7074_v42, %v2610_v21  ;;  %v2650_v49 = vadd.f32 %v7074_v42, %v2611_v9  ;;  %v2651_v1 = vadd.f32 %v7074_v42, %v2612_v27 }
 0x3d5   : > { %v2652_v16 = vadd.f32 %v7074_v42, %v2613_v54  ;;  %v2653_v6 = vadd.f32 %v7074_v42, %v2614_v52  ;;  %v2654_v53 = vadd.f32 %v7074_v42, %v2615_v13  ;;  %v2655_v61 = vadd.f32 %v7074_v42, %v2616_v56 }
 0x3d6   : > { %2740 = vst.msk [vmem:[#allocation2 + $0x9] sm:$0xff] %vm366_vm0, %v2678_v60  ;;  %v2656_v17 = vadd.f32 %v7074_v42, %v2617_v20  ;;  %v2657_v57 = vadd.f32 %v7074_v42, %v2618_v22  ;;  %v7126_v18 = vadd.f32 %v7074_v42, %v2619_v43  ;;  %v7129_v12 = vadd.f32 %v7074_v42, %v2620_v37 }
 0x3d7   : > { %2710 = vst.msk [vmem:[#allocation2 + $0x39] sm:$0xff] %vm366_vm0, %v2678_v60  ;;  %v7133_v55 = vadd.f32 %v7074_v42, %v2621_v25  ;;  %v7136_v45 = vadd.f32 %v7074_v42, %v2622_v11  ;;  %v7139_v31 = vadd.f32 %v7074_v42, %v2623_v48  ;;  %v7142_v40 = vadd.f32 %v7074_v42, %v2624_v35  ;;  %v2759_v36 = vld [vmem:[#allocation2 + $0x182] sm:$0x1] }
 0x3d8   : > { %v7145_v10 = vadd.f32 %v7074_v42, %v2625_v39  ;;  %v7148_v28 = vadd.f32 %v7074_v42, %v2626_v44  ;;  %v7151_v0 = vadd.f32 %v7074_v42, %v2627_v24  ;;  %v7154_v26 = vadd.f32 %v7074_v42, %v2628_v2  ;;  %2777 = vst.msk [vmem:[#allocation2 + $0x180] sm:$0x1] %vm422_vm1, %v2759_v36 }
 0x3d9   : > { %v7158_v3 = vadd.f32 %v7074_v42, %v2629_v23  ;;  %v7161_v15 = vadd.f32 %v7074_v42, %v2630_v34  ;;  %v7164_v63 = vadd.f32 %v7074_v42, %v2631_v5  ;;  %v7167_v14 = vadd.f32 %v7074_v42, %v2632_v7 }
 0x3da   : > { %v7170_v58 = vadd.f32 %v7074_v42, %v2633_v62  ;;  %v7173_v19 = vadd.f32 %v7074_v42, %v2635_v59  ;;  %v2677_v30 = vmax.f32 %v2645_v33, 0.0  ;;  %v2675_v21 = vmax.f32 %v2643_v4, 0.0 }
 0x3db   : > { %v2676_v41 = vmax.f32 %v2644_v47, 0.0  ;;  %v2679_v9 = vmax.f32 %v2647_v8, 0.0  ;;  %v2680_v27 = vmax.f32 %v2648_v50, 0.0  ;;  %v2681_v54 = vmax.f32 %v2649_v32, 0.0 }
 0x3dc   : > { %2739 = vst.msk [vmem:[#allocation2 + $0x1] sm:$0xff] %vm366_vm0, %v2677_v30  ;;  %v2682_v52 = vmax.f32 %v2650_v49, 0.0  ;;  %v2683_v13 = vmax.f32 %v2651_v1, 0.0  ;;  %v2684_v56 = vmax.f32 %v2652_v16, 0.0  ;;  %v2685_v20 = vmax.f32 %v2653_v6, 0.0  ;;  %2709 = vst.msk [vmem:[#allocation2 + $0x31] sm:$0xff] %vm366_vm0, %v2677_v30 }
 0x3dd   : > { %2707 = vst.msk [vmem:[#allocation2 + $0x19] sm:$0xff] %vm366_vm0, %v2675_v21  ;;  %v2848_v51 = vld [vmem:[#allocation2 + $0x9] sm:$0xff]  ;;  %v2686_v22 = vmax.f32 %v2654_v53, 0.0  ;;  %v2687_v42 = vmax.f32 %v2655_v61, 0.0  ;;  %v2688_v43 = vmax.f32 %v2656_v17, 0.0  ;;  %v2689_v37 = vmax.f32 %v2657_v57, 0.0 }
 0x3de   : > { %2708 = vst.msk [vmem:[#allocation2 + $0x21] sm:$0xff] %vm366_vm0, %v2676_v41  ;;  %2711 = vst.msk [vmem:[#allocation2 + $0x49] sm:$0xff] %vm366_vm0, %v2679_v9  ;;  %3137 = vrot.lane.b32.xlu1 %v2848_v51, %s5454_s15  ;;  %v2690_v25 = vmax.f32 %v7126_v18, 0.0  ;;  %v2691_v11 = vmax.f32 %v7129_v12, 0.0  ;;  %v2692_v48 = vmax.f32 %v7133_v55, 0.0  ;;  %v2693_v35 = vmax.f32 %v7136_v45, 0.0 }
 0x3df   : > { %2712 = vst.msk [vmem:[#allocation2 + $0x51] sm:$0xff] %vm366_vm0, %v2680_v27  ;;  %2713 = vst.msk [vmem:[#allocation2 + $0x61] sm:$0xff] %vm366_vm0, %v2681_v54  ;;  %v2779_v39 = vld [vmem:[#allocation2 + $0xf] sm:$0x1]  ;;  %v2694_v44 = vmax.f32 %v7139_v31, 0.0  ;;  %v2695_v24 = vmax.f32 %v7142_v40, 0.0 }
 0x3e0   : > { %2714 = vst.msk [vmem:[#allocation2 + $0x69] sm:$0xff] %vm366_vm0, %v2682_v52  ;;  %2715 = vst.msk [vmem:[#allocation2 + $0x79] sm:$0xff] %vm366_vm0, %v2683_v13  ;;  %v2696_v2 = vmax.f32 %v7145_v10, 0.0  ;;  %v2697_v23 = vmax.f32 %v7148_v28, 0.0  ;;  %v2781_v34 = vld [vmem:[#allocation2 + $0x3f] sm:$0x1] }
 0x3e1   : > { %2716 = vst.msk [vmem:[#allocation2 + $0x81] sm:$0xff] %vm366_vm0, %v2684_v56  ;;  %2717 = vst.msk [vmem:[#allocation2 + $0x91] sm:$0xff] %vm366_vm0, %v2685_v20  ;;  %v2698_v5 = vmax.f32 %v7151_v0, 0.0  ;;  %v2699_v7 = vmax.f32 %v7154_v26, 0.0  ;;  %v2700_v62 = vmax.f32 %v7158_v3, 0.0  ;;  %v2701_v59 = vmax.f32 %v7161_v15, 0.0 }
 0x3e2   : > { %2718 = vst.msk [vmem:[#allocation2 + $0x99] sm:$0xff] %vm366_vm0, %v2686_v22  ;;  %2719 = vst.msk [vmem:[#allocation2 + $0xa9] sm:$0xff] %vm366_vm0, %v2687_v42  ;;  %v2702_v38 = vmax.f32 %v7164_v63, 0.0  ;;  %v2703_v4 = vmax.f32 %v7167_v14, 0.0  ;;  %v2704_v47 = vmax.f32 %v7170_v58, 0.0  ;;  %v2706_v33 = vmax.f32 %v7173_v19, 0.0 }
 0x3e3   : > { %2720 = vst.msk [vmem:[#allocation2 + $0xb1] sm:$0xff] %vm366_vm0, %v2688_v43  ;;  %2721 = vst.msk [vmem:[#allocation2 + $0xc1] sm:$0xff] %vm366_vm0, %v2689_v37  ;;  %v2847_v8 = vld [vmem:[#allocation2 + $0x1] sm:$0xff]  ;;  %v7236_v32 = vld [vmem:[#allocation2 + $0x39] sm:$0xff] }
 0x3e4   : > { %2797 = vst.msk [vmem:[#allocation2 + $0x11] sm:$0x1] %vm422_vm1, %v2779_v39  ;;  %2799 = vst.msk [vmem:[#allocation2 + $0x41] sm:$0x1] %vm422_vm1, %v2781_v34  ;;  %3135 = vrot.lane.b32.xlu0 %v2847_v8, %s5454_s15  ;;  %v7232_v60 = vld [vmem:[#allocation2 + $0x19] sm:$0xff]  ;;  %v7240_v49 = vld [vmem:[#allocation2 + $0x31] sm:$0xff] }
 0x3e5   : > { %2722 = vst.msk [vmem:[#allocation2 + $0xc9] sm:$0xff] %vm366_vm0, %v2690_v25  ;;  %2723 = vst.msk [vmem:[#allocation2 + $0xd9] sm:$0xff] %vm366_vm0, %v2691_v11  ;;  %v7228_v50 = vld [vmem:[#allocation2 + $0x21] sm:$0xff]  ;;  %v2744_v16 = vld [vmem:[#allocation2 + $0x1a] sm:$0x1] }
 0x3e6   : > { %2724 = vst.msk [vmem:[#allocation2 + $0xe1] sm:$0xff] %vm366_vm0, %v2692_v48  ;;  %2725 = vst.msk [vmem:[#allocation2 + $0xf1] sm:$0xff] %vm366_vm0, %v2693_v35  ;;  %3141 = vrot.lane.b32.xlu1 %v7228_v50, %s5454_s15  ;;  %v7244_v1 = vld [vmem:[#allocation2 + $0x51] sm:$0xff]  ;;  %v7248_v53 = vld [vmem:[#allocation2 + $0x49] sm:$0xff] }
 0x3e7   : > { %2726 = vst.msk [vmem:[#allocation2 + $0xf9] sm:$0xff] %vm366_vm0, %v2694_v44  ;;  %2727 = vst.msk [vmem:[#allocation2 + $0x109] sm:$0xff] %vm366_vm0, %v2695_v24  ;;  %v2745_v6 = vld [vmem:[#allocation2 + $0x32] sm:$0x1]  ;;  %v2780_v61 = vld [vmem:[#allocation2 + $0x27] sm:$0x1] }
 0x3e8   : > { %2728 = vst.msk [vmem:[#allocation2 + $0x111] sm:$0xff] %vm366_vm0, %v2696_v2  ;;  %2729 = vst.msk [vmem:[#allocation2 + $0x121] sm:$0xff] %vm366_vm0, %v2697_v23  ;;  %3139 = vrot.lane.b32.xlu0 %v7232_v60, %s5454_s15  ;;  %v7254_v17 = vld [vmem:[#allocation2 + $0x69] sm:$0xff]  ;;  %v2743_v18 = vld [vmem:[#allocation2 + $0x2] sm:$0x1] }
 0x3e9   : > { %2730 = vst.msk [vmem:[#allocation2 + $0x129] sm:$0xff] %vm366_vm0, %v2698_v5  ;;  %2731 = vst.msk [vmem:[#allocation2 + $0x139] sm:$0xff] %vm366_vm0, %v2699_v7  ;;  %v2746_v57 = vld [vmem:[#allocation2 + $0x4a] sm:$0x1]  ;;  %v2747_v12 = vld [vmem:[#allocation2 + $0x62] sm:$0x1] }
 0x3ea   : > { %2732 = vst.msk [vmem:[#allocation2 + $0x141] sm:$0xff] %vm366_vm0, %v2700_v62  ;;  %2733 = vst.msk [vmem:[#allocation2 + $0x151] sm:$0xff] %vm366_vm0, %v2701_v59  ;;  %3145 = vrot.lane.b32.xlu1 %v7236_v32, %s5454_s15  ;;  %v2782_v55 = vld [vmem:[#allocation2 + $0x57] sm:$0x1]  ;;  %v7261_v45 = vld [vmem:[#allocation2 + $0x61] sm:$0xff] }
 0x3eb   : > { %2734 = vst.msk [vmem:[#allocation2 + $0x159] sm:$0xff] %vm366_vm0, %v2702_v38  ;;  %2735 = vst.msk [vmem:[#allocation2 + $0x169] sm:$0xff] %vm366_vm0, %v2703_v4  ;;  %v2748_v31 = vld [vmem:[#allocation2 + $0x7a] sm:$0x1]  ;;  %v7267_v40 = vld [vmem:[#allocation2 + $0x81] sm:$0xff] }
 0x3ec   : > { %2736 = vst.msk [vmem:[#allocation2 + $0x171] sm:$0xff] %vm366_vm0, %v2704_v47  ;;  %2738 = vst.msk [vmem:[#allocation2 + $0x189] sm:$0xff] %vm366_vm0, %v2706_v33  ;;  %3143 = vrot.lane.b32.xlu0 %v7240_v49, %s5454_s15  ;;  %v2749_v36 = vld [vmem:[#allocation2 + $0x92] sm:$0x1]  ;;  %v2750_v10 = vld [vmem:[#allocation2 + $0xaa] sm:$0x1] }
 0x3ed   : > { %2741 = vst.msk [vmem:[#allocation2 + $0x199] sm:$0xff] %vm366_vm0, %v2703_v4  ;;  %2742 = vst.msk [vmem:[#allocation2 + $0x1a1] sm:$0xff] %vm366_vm0, %v2704_v47  ;;  %v2751_v28 = vld [vmem:[#allocation2 + $0xc2] sm:$0x1]  ;;  %v2752_v0 = vld [vmem:[#allocation2 + $0xda] sm:$0x1] }
 0x3ee   : > { %3149 = vrot.lane.b32.xlu1 %v7244_v1, %s5454_s15  ;;  %2762 = vst.msk [vmem:[#allocation2 + $0x18] sm:$0x1] %vm422_vm1, %v2744_v16  ;;  %2763 = vst.msk [vmem:[#allocation2 + $0x30] sm:$0x1] %vm422_vm1, %v2745_v6  ;;  %v7275_v26 = vld [vmem:[#allocation2 + $0x79] sm:$0xff]  ;;  %v7287_v58 = vld [vmem:[#allocation2 + $0x91] sm:$0xff] }
 0x3ef   : > { %2798 = vst.msk [vmem:[#allocation2 + $0x29] sm:$0x1] %vm422_vm1, %v2780_v61  ;;  %2764 = vst.msk [vmem:[#allocation2 + $0x48] sm:$0x1] %vm422_vm1, %v2746_v57  ;;  %v7280_v3 = vld [vmem:[#allocation2 + $0x99] sm:$0xff]  ;;  %v7291_v30 = vld [vmem:[#allocation2 + $0xb1] sm:$0xff] }
 0x3f0   : > { %3147 = vrot.lane.b32.xlu0 %v7248_v53, %s5454_s15  ;;  %2761 = vst.msk [vmem:[#allocation2] sm:$0x1] %vm422_vm1, %v2743_v18  ;;  %2765 = vst.msk [vmem:[#allocation2 + $0x60] sm:$0x1] %vm422_vm1, %v2747_v12  ;;  %v2753_v15 = vld [vmem:[#allocation2 + $0xf2] sm:$0x1] }
 0x3f1   : > { %2800 = vst.msk [vmem:[#allocation2 + $0x59] sm:$0x1] %vm422_vm1, %v2782_v55  ;;  %2766 = vst.msk [vmem:[#allocation2 + $0x78] sm:$0x1] %vm422_vm1, %v2748_v31  ;;  %v2754_v63 = vld [vmem:[#allocation2 + $0x10a] sm:$0x1] }
 0x3f2   : > { %3153 = vrot.lane.b32.xlu1 %v7254_v17, %s5454_s15  ;;  %2767 = vst.msk [vmem:[#allocation2 + $0x90] sm:$0x1] %vm422_vm1, %v2749_v36  ;;  %2768 = vst.msk [vmem:[#allocation2 + $0xa8] sm:$0x1] %vm422_vm1, %v2750_v10  ;;  %v2783_v14 = vld [vmem:[#allocation2 + $0x6f] sm:$0x1] }
 0x3f3   : > { %2769 = vst.msk [vmem:[#allocation2 + $0xc0] sm:$0x1] %vm422_vm1, %v2751_v28  ;;  %2770 = vst.msk [vmem:[#allocation2 + $0xd8] sm:$0x1] %vm422_vm1, %v2752_v0  ;;  %v2755_v19 = vld [vmem:[#allocation2 + $0x122] sm:$0x1] }
 0x3f4   : > { %3151 = vrot.lane.b32.xlu0 %v7261_v45, %s5454_s15  ;;  %2771 = vst.msk [vmem:[#allocation2 + $0xf0] sm:$0x1] %vm422_vm1, %v2753_v15  ;;  %2772 = vst.msk [vmem:[#allocation2 + $0x108] sm:$0x1] %vm422_vm1, %v2754_v63  ;;  %v2756_v21 = vld [vmem:[#allocation2 + $0x13a] sm:$0x1] }
 0x3f5   : > { %2801 = vst.msk [vmem:[#allocation2 + $0x71] sm:$0x1] %vm422_vm1, %v2783_v14  ;;  %2773 = vst.msk [vmem:[#allocation2 + $0x120] sm:$0x1] %vm422_vm1, %v2755_v19  ;;  %v2757_v41 = vld [vmem:[#allocation2 + $0x152] sm:$0x1] }
 0x3f6   : > { %3157 = vrot.lane.b32.xlu1 %v7267_v40, %s5454_s15  ;;  %2774 = vst.msk [vmem:[#allocation2 + $0x138] sm:$0x1] %vm422_vm1, %v2756_v21  ;;  %2775 = vst.msk [vmem:[#allocation2 + $0x150] sm:$0x1] %vm422_vm1, %v2757_v41  ;;  %v2758_v9 = vld [vmem:[#allocation2 + $0x16a] sm:$0x1] }
 0x3f7   : > { %v7298_v27 = vld [vmem:[#allocation2 + $0xa9] sm:$0xff]  ;;  %2776 = vst.msk [vmem:[#allocation2 + $0x168] sm:$0x1] %vm422_vm1, %v2758_v9  ;;  %v2784_v54 = vld [vmem:[#allocation2 + $0x87] sm:$0x1]  ;;  %v2865_v37 = vld [vmem:[#allocation2 + $0xd9] sm:$0xff] }
 0x3f8   : > { %3155 = vrot.lane.b32.xlu0 %v7275_v26, %s5454_s15  ;;  %v7303_v52 = vld [vmem:[#allocation2 + $0xc9] sm:$0xff]  ;;  %2802 = vst.msk [vmem:[#allocation2 + $0x89] sm:$0x1] %vm422_vm1, %v2784_v54  ;;  %v2785_v13 = vld [vmem:[#allocation2 + $0x9f] sm:$0x1]  ;;  %v7310_v51 = vld [vmem:[#allocation2 + $0xc1] sm:$0xff] }
 0x3f9   : > { %2803 = vst.msk [vmem:[#allocation2 + $0xa1] sm:$0x1] %vm422_vm1, %v2785_v13  ;;  %v2786_v56 = vld [vmem:[#allocation2 + $0xb7] sm:$0x1]  ;;  %v2787_v20 = vld [vmem:[#allocation2 + $0xcf] sm:$0x1] }
 0x3fa   : > { %3161 = vrot.lane.b32.xlu1 %v7280_v3, %s5454_s15  ;;  %2804 = vst.msk [vmem:[#allocation2 + $0xb9] sm:$0x1] %vm422_vm1, %v2786_v56  ;;  %2805 = vst.msk [vmem:[#allocation2 + $0xd1] sm:$0x1] %vm422_vm1, %v2787_v20  ;;  %v2866_v22 = vld [vmem:[#allocation2 + $0xe1] sm:$0xff]  ;;  %v2868_v25 = vld [vmem:[#allocation2 + $0xf9] sm:$0xff] }
 0x3fb   : > { %v2788_v42 = vld [vmem:[#allocation2 + $0xe7] sm:$0x1]  ;;  %v2789_v43 = vld [vmem:[#allocation2 + $0xff] sm:$0x1]  ;;  %v2790_v11 = vld [vmem:[#allocation2 + $0x117] sm:$0x1] }
 0x3fc   : > { %3159 = vrot.lane.b32.xlu0 %v7287_v58, %s5454_s15  ;;  %2806 = vst.msk [vmem:[#allocation2 + $0xe9] sm:$0x1] %vm422_vm1, %v2788_v42  ;;  %2807 = vst.msk [vmem:[#allocation2 + $0x101] sm:$0x1] %vm422_vm1, %v2789_v43  ;;  %v2791_v48 = vld [vmem:[#allocation2 + $0x12f] sm:$0x1] }
 0x3fd   : > { %2808 = vst.msk [vmem:[#allocation2 + $0x119] sm:$0x1] %vm422_vm1, %v2790_v11  ;;  %v2867_v35 = vld [vmem:[#allocation2 + $0xf1] sm:$0xff]  ;;  %2809 = vst.msk [vmem:[#allocation2 + $0x131] sm:$0x1] %vm422_vm1, %v2791_v48  ;;  %v2869_v2 = vld [vmem:[#allocation2 + $0x109] sm:$0xff] }
 0x3fe   : > { %3165 = vrot.lane.b32.xlu1 %v7291_v30, %s5454_s15  ;;  %v2870_v39 = vld [vmem:[#allocation2 + $0x111] sm:$0xff]  ;;  %v2792_v44 = vld [vmem:[#allocation2 + $0x147] sm:$0x1]  ;;  %v2793_v24 = vld [vmem:[#allocation2 + $0x15f] sm:$0x1] }
 0x3ff   : > { %2810 = vst.msk [vmem:[#allocation2 + $0x149] sm:$0x1] %vm422_vm1, %v2792_v44  ;;  %2811 = vst.msk [vmem:[#allocation2 + $0x161] sm:$0x1] %vm422_vm1, %v2793_v24  ;;  %v2872_v23 = vld [vmem:[#allocation2 + $0x129] sm:$0xff]  ;;  %v2871_v7 = vld [vmem:[#allocation2 + $0x121] sm:$0xff] }
 0x400   : > { %3163 = vrot.lane.b32.xlu0 %v7298_v27, %s5454_s15  ;;  %v2794_v34 = vld [vmem:[#allocation2 + $0x177] sm:$0x1]  ;;  %v2795_v5 = vld [vmem:[#allocation2 + $0x18f] sm:$0x1]  ;;  %v2760_v62 = vld [vmem:[#allocation2 + $0x19a] sm:$0x1] }
 0x401   : > { %2812 = vst.msk [vmem:[#allocation2 + $0x179] sm:$0x1] %vm422_vm1, %v2794_v34  ;;  %2813 = vst.msk [vmem:[#allocation2 + $0x191] sm:$0x1] %vm422_vm1, %v2795_v5  ;;  %v2874_v59 = vld [vmem:[#allocation2 + $0x141] sm:$0xff]  ;;  %v2873_v4 = vld [vmem:[#allocation2 + $0x139] sm:$0xff] }
 0x402   : > { %3169 = vrot.lane.b32.xlu1 %v7303_v52, %s5454_s15  ;;  %2778 = vst.msk [vmem:[#allocation2 + $0x198] sm:$0x1] %vm422_vm1, %v2760_v62  ;;  %v2796_v38 = vld [vmem:[#allocation2 + $0x1a7] sm:$0x1]  ;;  %v2876_v47 = vld [vmem:[#allocation2 + $0x159] sm:$0xff]  ;;  %v2875_v33 = vld [vmem:[#allocation2 + $0x151] sm:$0xff] }
 0x403   : > { %2814 = vst.msk [vmem:[#allocation2 + $0x1a9] sm:$0x1] %vm422_vm1, %v2796_v38  ;;  %v2878_v8 = vld [vmem:[#allocation2 + $0x171] sm:$0xff]  ;;  %v2877_v16 = vld [vmem:[#allocation2 + $0x169] sm:$0xff]  ;;  %v7341_v57 = vld [vmem:[#allocation2 + $0x20] sm:$0xff] }
 0x404   : > { %3167 = vrot.lane.b32.xlu0 %v7310_v51, %s5454_s15  ;;  %v2880_v6 = vld [vmem:[#allocation2 + $0xa] sm:$0xff]  ;;  %v2879_v61 = vld [vmem:[#allocation2 + $0x2] sm:$0xff]  ;;  %v7345_v18 = vld [vmem:[#allocation2 + $0x18] sm:$0xff] }
 0x405   : > { %v2881_v12 = vld [vmem:[#allocation2 + $0x1a] sm:$0xff]  ;;  %v7355_v55 = vld [vmem:[#allocation2 + $0x30] sm:$0xff]  ;;  %v2976_v31 = vld [vmem:[#allocation2 + $0x22] sm:$0xff] }
 0x406   : > { %3173 = vrot.lane.b32.xlu1 %v2866_v22, %s5454_s15  ;;  %v4385_v36 = vld [vmem:[%s8835_s5 + $0x10] sm:$0xff]  ;;  %v7376_v10 = vld [vmem:[#allocation2 + $0x38] sm:$0xff]  ;;  %v4384_v28 = vld [vmem:[%s8835_s5 + $0x8] sm:$0xff] }
 0x407   : > { %v4383_v0 = vld [vmem:[%s8835_s5] sm:$0xff]  ;;  %v3071_v15 = vld [vmem:[#allocation2 + $0x32] sm:$0xff]  ;;  %v7398_v63 = vld [vmem:[#allocation2 + $0x48] sm:$0xff] }
 0x408   : > { %3171 = vrot.lane.b32.xlu0 %v2865_v37, %s5454_s15  ;;  %v7412_v19 = vld [vmem:[#allocation2 + $0x50] sm:$0xff]  ;;  %v7445_v37 = vld [vmem:[#allocation2 + $0x60] sm:$0xff]  ;;  %v7556_v29 = vld [vmem:[#allocation2 + $0x98] sm:$0xff] }
 0x409   : > { %v3073_v54 = vld [vmem:[#allocation2 + $0x4a] sm:$0xff]  ;;  %v3074_v42 = vld [vmem:[#allocation2 + $0x52] sm:$0xff] }
 0x40a   : > { %3177 = vrot.lane.b32.xlu1 %v2868_v25, %s5454_s15 }
 0x40c   : > { %3175 = vrot.lane.b32.xlu0 %v2867_v35, %s5454_s15 }
 0x40e   : > { %3181 = vrot.lane.b32.xlu1 %v2870_v39, %s5454_s15  ;;  %v7466_v39 = vld [vmem:[#allocation2 + $0x68] sm:$0xff] }
 0x410   : > { %3179 = vrot.lane.b32.xlu0 %v2869_v2, %s5454_s15 }
 0x412   : > { %3185 = vrot.lane.b32.xlu1 %v2872_v23, %s5454_s15  ;;  %v3075_v23 = vld [vmem:[#allocation2 + $0x62] sm:$0xff] }
 0x414   : > { %3183 = vrot.lane.b32.xlu0 %v2871_v7, %s5454_s15 }
 0x416   : > { %3189 = vrot.lane.b32.xlu1 %v2874_v59, %s5454_s15  ;;  %v3076_v59 = vld [vmem:[#allocation2 + $0x6a] sm:$0xff] }
 0x418   : > { %3187 = vrot.lane.b32.xlu0 %v2873_v4, %s5454_s15  ;;  %v7499_v4 = vld [vmem:[#allocation2 + $0x78] sm:$0xff] }
 0x41a   : > { %3193 = vrot.lane.b32.xlu1 %v2876_v47, %s5454_s15 }
 0x41c   : > { %3191 = vrot.lane.b32.xlu0 %v2875_v33, %s5454_s15 }
 0x41e   : > { %3197 = vrot.lane.b32.xlu1 %v2878_v8, %s5454_s15 }
 0x420   : > { %3195 = vrot.lane.b32.xlu0 %v2877_v16, %s5454_s15 }
 0x422   : > { %3265 = vrot.lane.b32.xlu1 %v2880_v6, %s5455_s16  ;;  %v7520_v6 = vld [vmem:[#allocation2 + $0x80] sm:$0xff] }
 0x424   : > { %3263 = vrot.lane.b32.xlu0 %v2879_v61, %s5455_s16 }
 0x426   : > { %3393 = vrot.lane.b32.xlu1 %v7341_v57, %s5456_s17 }
 0x428   : > { %3391 = vrot.lane.b32.xlu0 %v7345_v18, %s5456_s17 }
 0x42a   : > { %3521 = vrot.lane.b32.xlu1 %v7228_v50, %s5457_s18  ;;  %v4387_v50 = vld [vmem:[%s8835_s5 + $0x20] sm:$0xf] }
 0x42b   : > { %5368 = vmatprep.subr.msk.mxu1 %vm2162_vm2, %v4387_v50 }
 0x42c   : > { %3519 = vrot.lane.b32.xlu0 %v7232_v60, %s5457_s18  ;;  %5369 = vmatpush3.msk.msra.mxu1 %vm2162_vm2, %v4387_v50  ;;  %v4386_v60 = vld [vmem:[%s8835_s5 + $0x18] sm:$0xff] }
 0x42d   : > { %5370 = vmatprep.subr.mxu1 %v4386_v60  ;;  %v3077_v50 = vld [vmem:[#allocation2 + $0x7a] sm:$0xff] }
 0x42e   : > { %3267 = vrot.lane.b32.xlu1 %v2881_v12, %s5455_s16  ;;  %5371 = vmatpush3.msra.mxu1 %v4386_v60 }
 0x42f   : > { %5372 = vmatprep.subr.mxu1 %v4385_v36 }
 0x430   : > { %3647 = vrot.lane.b32.xlu0 %v2881_v12, %s5458_s19  ;;  %5373 = vmatpush3.msra.mxu1 %v4385_v36 }
 0x431   : > { %5374 = vmatprep.subr.mxu1 %v4384_v28 }
 0x432   : > { %3775 = vrot.lane.b32.xlu1 %v7355_v55, %s5459_s24  ;;  %5375 = vmatpush3.msra.mxu1 %v4384_v28 }
 0x433   : > { %5376 = vmatprep.subr.mxu1 %v4383_v0 }
 0x434   : > { %3649 = vrot.lane.b32.xlu0 %v2976_v31, %s5458_s19  ;;  %5377 = vmatpush3.msra.mxu1 %v4383_v0 }
 0x436   : > { %3395 = vrot.lane.b32.xlu1 %v7355_v55, %s5456_s17 }
 0x438   : > { %3269 = vrot.lane.b32.xlu0 %v2976_v31, %s5455_s16 }
 0x43a   : > { %3903 = vrot.lane.b32.xlu1 %v7240_v49, %s5460_s29 }
 0x43c   : > { %3777 = vrot.lane.b32.xlu0 %v7376_v10, %s5459_s24 }
 0x43e   : > { %3523 = vrot.lane.b32.xlu1 %v7240_v49, %s5457_s18  ;;  %v3072_v49 = vld [vmem:[#allocation2 + $0x3a] sm:$0xff] }
 0x440   : > { %3397 = vrot.lane.b32.xlu0 %v7376_v10, %s5456_s17 }
 0x442   : > { %4031 = vrot.lane.b32.xlu1 %v3071_v15, %s5461_s20 }
 0x444   : > { %3905 = vrot.lane.b32.xlu0 %v7236_v32, %s5460_s29 }
 0x446   : > { %3651 = vrot.lane.b32.xlu1 %v3071_v15, %s5458_s19 }
 0x448   : > { %3525 = vrot.lane.b32.xlu0 %v7236_v32, %s5457_s18 }
 0x44a   : > { %3271 = vrot.lane.b32.xlu1 %v3071_v15, %s5455_s16  ;;  %v3078_v15 = vld [vmem:[#allocation2 + $0x82] sm:$0xff] }
 0x44c   : > { %4033 = vrot.lane.b32.xlu0 %v3072_v49, %s5461_s20 }
 0x44e   : > { %3779 = vrot.lane.b32.xlu1 %v7398_v63, %s5459_s24 }
 0x450   : > { %3653 = vrot.lane.b32.xlu0 %v3072_v49, %s5458_s19  ;;  %v7405_v14 = vpop.permute.xlu1 %3137 }
 0x452   : > { %3399 = vrot.lane.b32.xlu1 %v7398_v63, %s5456_s17 }
 0x454   : > { %3273 = vrot.lane.b32.xlu0 %v3072_v49, %s5455_s16 }
 0x456   : > { %3907 = vrot.lane.b32.xlu1 %v7248_v53, %s5460_s29  ;;  %v7410_v32 = vpop.permute.xlu0 %3135 }
 0x458   : > { %v7414_v21 = vpop.permute.xlu1 %3141  ;;  %3781 = vrot.lane.b32.xlu0 %v7412_v19, %s5459_s24 }
 0x45a   : > { %3527 = vrot.lane.b32.xlu1 %v7248_v53, %s5457_s18  ;;  %v7420_v41 = vpop.permute.xlu0 %3139 }
 0x45c   : > { %v7422_v9 = vpop.permute.xlu1 %3145  ;;  %3401 = vrot.lane.b32.xlu0 %v7412_v19, %s5456_s17 }
 0x45e   : > { %4035 = vrot.lane.b32.xlu1 %v3073_v54, %s5461_s20  ;;  %v7427_v13 = vpop.permute.xlu0 %3143 }
 0x460   : > { %v7429_v56 = vpop.permute.xlu1 %3149  ;;  %3909 = vrot.lane.b32.xlu0 %v7244_v1, %s5460_s29 }
 0x462   : > { %3655 = vrot.lane.b32.xlu1 %v3073_v54, %s5458_s19  ;;  %v7434_v53 = vpop.permute.xlu0 %3147 }
 0x464   : > { %v7436_v20 = vpop.permute.xlu1 %3153  ;;  %3529 = vrot.lane.b32.xlu0 %v7244_v1, %s5457_s18 }
 0x466   : > { %3275 = vrot.lane.b32.xlu1 %v3073_v54, %s5455_s16  ;;  %v7441_v22 = vpop.permute.xlu0 %3151  ;;  %v7541_v54 = vld [vmem:[#allocation2 + $0x90] sm:$0xff] }
 0x468   : > { %v7443_v43 = vpop.permute.xlu1 %3157  ;;  %4037 = vrot.lane.b32.xlu0 %v3074_v42, %s5461_s20 }
 0x46a   : > { %3783 = vrot.lane.b32.xlu1 %v7445_v37, %s5459_s24  ;;  %v7450_v25 = vpop.permute.xlu0 %3155 }
 0x46c   : > { %v7452_v11 = vpop.permute.xlu1 %3161  ;;  %3657 = vrot.lane.b32.xlu0 %v3074_v42, %s5458_s19 }
 0x46e   : > { %3403 = vrot.lane.b32.xlu1 %v7445_v37, %s5456_s17  ;;  %v7457_v1 = vpop.permute.xlu0 %3159 }
 0x470   : > { %v7459_v48 = vpop.permute.xlu1 %3165  ;;  %3277 = vrot.lane.b32.xlu0 %v3074_v42, %s5455_s16 }
 0x472   : > { %3911 = vrot.lane.b32.xlu1 %v7261_v45, %s5460_s29  ;;  %v7464_v35 = vpop.permute.xlu0 %3163 }
 0x474   : > { %v7468_v44 = vpop.permute.xlu1 %3169  ;;  %3785 = vrot.lane.b32.xlu0 %v7466_v39, %s5459_s24 }
 0x476   : > { %3531 = vrot.lane.b32.xlu1 %v7261_v45, %s5457_s18  ;;  %v7474_v24 = vpop.permute.xlu0 %3167 }
 0x478   : > { %v7476_v2 = vpop.permute.xlu1 %3173  ;;  %3405 = vrot.lane.b32.xlu0 %v7466_v39, %s5456_s17 }
 0x47a   : > { %4039 = vrot.lane.b32.xlu1 %v3075_v23, %s5461_s20  ;;  %v7481_v34 = vpop.permute.xlu0 %3171 }
 0x47c   : > { %v7483_v5 = vpop.permute.xlu1 %3177  ;;  %3913 = vrot.lane.b32.xlu0 %v7254_v17, %s5460_s29 }
 0x47e   : > { %3659 = vrot.lane.b32.xlu1 %v3075_v23, %s5458_s19  ;;  %v7488_v45 = vpop.permute.xlu0 %3175 }
 0x480   : > { %v7490_v7 = vpop.permute.xlu1 %3181  ;;  %3533 = vrot.lane.b32.xlu0 %v7254_v17, %s5457_s18 }
 0x482   : > { %3279 = vrot.lane.b32.xlu1 %v3075_v23, %s5455_s16  ;;  %v7495_v62 = vpop.permute.xlu0 %3179 }
 0x484   : > { %v7497_v38 = vpop.permute.xlu1 %3185  ;;  %4041 = vrot.lane.b32.xlu0 %v3076_v59, %s5461_s20 }
 0x485   : > { %8902 = vst [vmem:[#allocation31_spill] sm:$0xff] %v7497_v38  ;;  %v3079_v38 = vld [vmem:[#allocation2 + $0x92] sm:$0xff] }
 0x486   : > { %3787 = vrot.lane.b32.xlu1 %v7499_v4, %s5459_s24  ;;  %v7504_v47 = vpop.permute.xlu0 %3183 }
 0x487   : > { %8903 = vst [vmem:[#allocation21_spill] sm:$0xff] %v7504_v47 }
 0x488   : > { %v7506_v33 = vpop.permute.xlu1 %3189  ;;  %3661 = vrot.lane.b32.xlu0 %v3076_v59, %s5458_s19 }
 0x489   : > { %8904 = vst [vmem:[#allocation4_spill] sm:$0xff] %v7506_v33 }
 0x48a   : > { %3407 = vrot.lane.b32.xlu1 %v7499_v4, %s5456_s17  ;;  %v7511_v17 = vpop.permute.xlu0 %3187 }
 0x48b   : > { %8905 = vst [vmem:[#allocation22_spill] sm:$0xff] %v7511_v17 }
 0x48c   : > { %v7513_v8 = vpop.permute.xlu1 %3193  ;;  %3281 = vrot.lane.b32.xlu0 %v3076_v59, %s5455_s16 }
 0x48d   : > { %8906 = vst [vmem:[#allocation5_spill] sm:$0xff] %v7513_v8 }
 0x48e   : > { %3915 = vrot.lane.b32.xlu1 %v7275_v26, %s5460_s29  ;;  %v7518_v16 = vpop.permute.xlu0 %3191 }
 0x48f   : > { %8907 = vst [vmem:[#allocation23_spill] sm:$0xff] %v7518_v16 }
 0x490   : > { %v7522_v61 = vpop.permute.xlu1 %3197  ;;  %3789 = vrot.lane.b32.xlu0 %v7520_v6, %s5459_s24 }
 0x491   : > { %8908 = vst [vmem:[#allocation6_spill] sm:$0xff] %v7522_v61 }
 0x492   : > { %3535 = vrot.lane.b32.xlu1 %v7275_v26, %s5457_s18  ;;  %v7528_v12 = vpop.permute.xlu0 %3195 }
 0x493   : > { %8909 = vst [vmem:[#allocation24_spill] sm:$0xff] %v7528_v12  ;;  %v2815_v12 = vld [vmem:[#allocation2] sm:$0xff] }
 0x494   : > { %v3266_v31 = vpop.permute.xlu1 %3265  ;;  %3409 = vrot.lane.b32.xlu0 %v7520_v6, %s5456_s17  ;;  %v4127_v61 = vsel %vm366_vm0, %v2815_v12, %v7410_v32 }
 0x496   : > { %4043 = vrot.lane.b32.xlu1 %v3077_v50, %s5461_s20  ;;  %v3264_v60 = vpop.permute.xlu0 %3263 }
 0x498   : > { %v3394_v36 = vpop.permute.xlu1 %3393  ;;  %3917 = vrot.lane.b32.xlu0 %v7267_v40, %s5460_s29 }
 0x49a   : > { %3663 = vrot.lane.b32.xlu1 %v3077_v50, %s5458_s19  ;;  %v3392_v28 = vpop.permute.xlu0 %3391 }
 0x49c   : > { %v3522_v0 = vpop.permute.xlu1 %3521  ;;  %3537 = vrot.lane.b32.xlu0 %v7267_v40, %s5457_s18 }
 0x49e   : > { %3283 = vrot.lane.b32.xlu1 %v3077_v50, %s5455_s16  ;;  %v3520_v26 = vpop.permute.xlu0 %3519 }
 0x4a0   : > { %v7539_v49 = vpop.permute.xlu1 %3267  ;;  %4045 = vrot.lane.b32.xlu0 %v3078_v15, %s5461_s20 }
 0x4a2   : > { %3791 = vrot.lane.b32.xlu1 %v7541_v54, %s5459_s24  ;;  %v3648_v42 = vpop.permute.xlu0 %3647 }
 0x4a4   : > { %v3776_v23 = vpop.permute.xlu1 %3775  ;;  %3665 = vrot.lane.b32.xlu0 %v3078_v15, %s5458_s19 }
 0x4a6   : > { %3411 = vrot.lane.b32.xlu1 %v7541_v54, %s5456_s17  ;;  %v3650_v40 = vpop.permute.xlu0 %3649 }
 0x4a8   : > { %v7549_v59 = vpop.permute.xlu1 %3395  ;;  %3285 = vrot.lane.b32.xlu0 %v3078_v15, %s5455_s16  ;;  %v4159_v15 = vsel %vm1822_vm3, %v4127_v61, %v3264_v60 }
 0x4a9   : > { %v4191_v16 = vsel %vm1855_vm4, %v4159_v15, %v3392_v28  ;;  %v3080_v15 = vld [vmem:[#allocation2 + $0x9a] sm:$0xff] }
 0x4aa   : > { %3919 = vrot.lane.b32.xlu1 %v7287_v58, %s5460_s29  ;;  %v7554_v50 = vpop.permute.xlu0 %3269  ;;  %v4223_v17 = vsel %vm1888_vm5, %v4191_v16, %v3520_v26 }
 0x4ab   : > { %v4255_v47 = vsel %vm1921_vm6, %v4223_v17, %v3648_v42  ;;  %v2816_v17 = vld [vmem:[#allocation2 + $0x8] sm:$0xff] }
 0x4ac   : > { %v3904_v46 = vpop.permute.xlu1 %3903  ;;  %3793 = vrot.lane.b32.xlu0 %v7556_v29, %s5459_s24  ;;  %v4287_v32 = vsel %vm1954_vm7, %v4255_v47, %v3776_v23  ;;  %v4128_v47 = vsel %vm366_vm0, %v2816_v17, %v7405_v14  ;;  %v4129_v17 = vsel %vm366_vm0, %v7345_v18, %v7420_v41 }
 0x4ae   : > { %3539 = vrot.lane.b32.xlu1 %v7287_v58, %s5457_s18  ;;  %v3778_v8 = vpop.permute.xlu0 %3777  ;;  %v4319_v58 = vsel %vm1987_vm8, %v4287_v32, %v3904_v46  ;;  %v4160_v46 = vsel %vm1822_vm3, %v4128_v47, %v3266_v31  ;;  %v4161_v47 = vsel %vm1822_vm3, %v4129_v17, %v7539_v49  ;;  %v3082_v17 = vld [vmem:[#allocation2 + $0xb2] sm:$0xff] }
 0x4af   : > { %v4192_v26 = vsel %vm1855_vm4, %v4160_v46, %v3394_v36 }
 0x4b0   : > { %v3524_v33 = vpop.permute.xlu1 %3523  ;;  %3413 = vrot.lane.b32.xlu0 %v7556_v29, %s5456_s17  ;;  %v4224_v23 = vsel %vm1888_vm5, %v4192_v26, %v3522_v0  ;;  %v4193_v26 = vsel %vm1855_vm4, %v4161_v47, %v7549_v59 }
 0x4b2   : > { %4047 = vrot.lane.b32.xlu1 %v3079_v38, %s5461_s20  ;;  %v7572_v12 = vpop.permute.xlu0 %3397 }
 0x4b4   : > { %v4032_v61 = vpop.permute.xlu1 %4031  ;;  %3921 = vrot.lane.b32.xlu0 %v7280_v3, %s5460_s29 }
 0x4b5   : > { %v4351_v16 = vsel %vm2020_vm9, %v4319_v58, %v4032_v61  ;;  %v7590_v58 = vld [vmem:[#allocation2 + $0xa8] sm:$0xff]  ;;  %v4256_v61 = vsel %vm1921_vm6, %v4224_v23, %v3650_v40 }
 0x4b6   : > { %3667 = vrot.lane.b32.xlu1 %v3079_v38, %s5458_s19  ;;  %5378 = vmatprep.mubr.msk.f32.mxu1 %vm2065_vm10, %v4351_v16  ;;  %v3906_v60 = vpop.permute.xlu0 %3905  ;;  %v7608_v16 = vld [vmem:[#allocation2 + $0xb0] sm:$0xff] }
 0x4b8   : > { %v3652_v28 = vpop.permute.xlu1 %3651  ;;  %3541 = vrot.lane.b32.xlu0 %v7280_v3, %s5457_s18  ;;  %v4288_v3 = vsel %vm1954_vm7, %v4256_v61, %v3778_v8  ;;  %v3081_v61 = vld [vmem:[#allocation2 + $0xaa] sm:$0xff] }
 0x4b9   : > { %v4320_v14 = vsel %vm1987_vm8, %v4288_v3, %v3906_v60 }
 0x4ba   : > { %3287 = vrot.lane.b32.xlu1 %v3079_v38, %s5455_s16  ;;  %v3526_v42 = vpop.permute.xlu0 %3525 }
 0x4bc   : > { %v7588_v32 = vpop.permute.xlu1 %3271  ;;  %4049 = vrot.lane.b32.xlu0 %v3080_v15, %s5461_s20 }
 0x4be   : > { %3795 = vrot.lane.b32.xlu1 %v7590_v58, %s5459_s24  ;;  %v4034_v38 = vpop.permute.xlu0 %4033 }
 0x4bf   : > { %v4352_v31 = vsel %vm2020_vm9, %v4320_v14, %v4034_v38  ;;  %v4130_v14 = vsel %vm366_vm0, %v7341_v57, %v7414_v21 }
 0x4c0   : > { %v3780_v36 = vpop.permute.xlu1 %3779  ;;  %3669 = vrot.lane.b32.xlu0 %v3080_v15, %s5458_s19  ;;  %5379 = vmatmul.mubr.msk.f32.vlgmr.msra.gmra.mxu1 %vm2065_vm10, %v4352_v31  ;;  %v4162_v38 = vsel %vm1822_vm3, %v4130_v14, %v7554_v50 }
 0x4c1   : > { %v4194_v31 = vsel %vm1855_vm4, %v4162_v38, %v7572_v12  ;;  %v3083_v38 = vld [vmem:[#allocation2 + $0xc2] sm:$0xff] }
 0x4c2   : > { %3415 = vrot.lane.b32.xlu1 %v7590_v58, %s5456_s17  ;;  %v3654_v0 = vpop.permute.xlu0 %3653 }
 0x4c4   : > { %v3400_v40 = vpop.permute.xlu1 %3399  ;;  %3289 = vrot.lane.b32.xlu0 %v3080_v15, %s5455_s16  ;;  %v4225_v15 = vsel %vm1888_vm5, %v4193_v26, %v3524_v33  ;;  %v7648_v26 = vld [vmem:[#allocation2 + $0xc0] sm:$0xff] }
 0x4c5   : > { %v4257_v3 = vsel %vm1921_vm6, %v4225_v15, %v3652_v28 }
 0x4c6   : > { %3923 = vrot.lane.b32.xlu1 %v7298_v27, %s5460_s29  ;;  %v7606_v8 = vpop.permute.xlu0 %3273 }
 0x4c8   : > { %v3908_v60 = vpop.permute.xlu1 %3907  ;;  %3797 = vrot.lane.b32.xlu0 %v7608_v16, %s5459_s24 }
 0x4ca   : > { %3543 = vrot.lane.b32.xlu1 %v7298_v27, %s5457_s18  ;;  %v3782_v46 = vpop.permute.xlu0 %3781  ;;  %v4289_v27 = vsel %vm1954_vm7, %v4257_v3, %v3780_v36 }
 0x4cb   : > { %v4321_v41 = vsel %vm1987_vm8, %v4289_v27, %v3908_v60  ;;  %v4226_v60 = vsel %vm1888_vm5, %v4194_v31, %v3526_v42  ;;  %v4131_v27 = vsel %vm366_vm0, %v7355_v55, %v7427_v13 }
 0x4cc   : > { %v3528_v23 = vpop.permute.xlu1 %3527  ;;  %3417 = vrot.lane.b32.xlu0 %v7608_v16, %s5456_s17  ;;  %v4258_v57 = vsel %vm1921_vm6, %v4226_v60, %v3654_v0  ;;  %v4132_v60 = vsel %vm366_vm0, %v7376_v10, %v7422_v9 }
 0x4ce   : > { %4051 = vrot.lane.b32.xlu1 %v3081_v61, %s5461_s20  ;;  %v7627_v18 = vpop.permute.xlu0 %3401 }
 0x4d0   : > { %v4036_v49 = vpop.permute.xlu1 %4035  ;;  %3925 = vrot.lane.b32.xlu0 %v7291_v30, %s5460_s29 }
 0x4d1   : > { %v4353_v33 = vsel %vm2020_vm9, %v4321_v41, %v4036_v49  ;;  %v4163_v41 = vsel %vm1822_vm3, %v4131_v27, %v7588_v32  ;;  %v3053_v27 = vld [vmem:[#allocation2 + $0xd9] sm:$0xff] }
 0x4d2   : > { %3671 = vrot.lane.b32.xlu1 %v3081_v61, %s5458_s19  ;;  %5381 = vmatprep.mubr.msk.f32.mxu1 %vm2065_vm10, %v4353_v33  ;;  %v3910_v59 = vpop.permute.xlu0 %3909  ;;  %v4195_v33 = vsel %vm1855_vm4, %v4163_v41, %v3400_v40 }
 0x4d3   : > { %v4227_v14 = vsel %vm1888_vm5, %v4195_v33, %v3528_v23 }
 0x4d4   : > { %v3656_v28 = vpop.permute.xlu1 %3655  ;;  %3545 = vrot.lane.b32.xlu0 %v7291_v30, %s5457_s18  ;;  %v4290_v30 = vsel %vm1954_vm7, %v4258_v57, %v3782_v46 }
 0x4d5   : > { %v4322_v21 = vsel %vm1987_vm8, %v4290_v30, %v3910_v59  ;;  %v4259_v31 = vsel %vm1921_vm6, %v4227_v14, %v3656_v28  ;;  %v4133_v14 = vsel %vm366_vm0, %v7398_v63, %v7434_v53 }
 0x4d6   : > { %3291 = vrot.lane.b32.xlu1 %v3081_v61, %s5455_s16  ;;  %v3530_v36 = vpop.permute.xlu0 %3529  ;;  %v7668_v61 = vld [vmem:[#allocation2 + $0xc8] sm:$0xff] }
 0x4d8   : > { %v7646_v47 = vpop.permute.xlu1 %3275  ;;  %4053 = vrot.lane.b32.xlu0 %v3082_v17, %s5461_s20 }
 0x4da   : > { %3799 = vrot.lane.b32.xlu1 %v7648_v26, %s5459_s24  ;;  %v4038_v50 = vpop.permute.xlu0 %4037 }
 0x4db   : > { %v4354_v12 = vsel %vm2020_vm9, %v4322_v21, %v4038_v50  ;;  %v3084_v50 = vld [vmem:[#allocation2 + $0xca] sm:$0xff] }
 0x4dc   : > { %v3784_v42 = vpop.permute.xlu1 %3783  ;;  %3673 = vrot.lane.b32.xlu0 %v3082_v17, %s5458_s19  ;;  %5382 = vmatmul.mubr.msk.f32.gmra.mxu1 %vm2065_vm10, %v4354_v12 }
 0x4dd   : > { %v4291_v55 = vsel %vm1954_vm7, %v4259_v31, %v3784_v42  ;;  %v7707_v42 = vld [vmem:[#allocation2 + $0xd8] sm:$0xff] }
 0x4de   : > { %3419 = vrot.lane.b32.xlu1 %v7648_v26, %s5456_s17  ;;  %v3658_v0 = vpop.permute.xlu0 %3657 }
 0x4e0   : > { %v7661_v15 = vpop.permute.xlu1 %3403  ;;  %3293 = vrot.lane.b32.xlu0 %v3082_v17, %s5455_s16  ;;  %v4164_v17 = vsel %vm1822_vm3, %v4132_v60, %v7606_v8  ;;  %v3054_v60 = vld [vmem:[#allocation2 + $0xe1] sm:$0xff] }
 0x4e1   : > { %v4196_v57 = vsel %vm1855_vm4, %v4164_v17, %v7627_v18 }
 0x4e2   : > { %3927 = vrot.lane.b32.xlu1 %v7310_v51, %s5460_s29  ;;  %v7666_v46 = vpop.permute.xlu0 %3277  ;;  %v4228_v21 = vsel %vm1888_vm5, %v4196_v57, %v3530_v36  ;;  %v4134_v57 = vsel %vm366_vm0, %v7412_v19, %v7429_v56 }
 0x4e3   : > { %v4260_v10 = vsel %vm1921_vm6, %v4228_v21, %v3658_v0  ;;  %v4166_v21 = vsel %vm1822_vm3, %v4134_v57, %v7666_v46  ;;  %v4136_v57 = vsel %vm366_vm0, %v7466_v39, %v7436_v20 }
 0x4e4   : > { %v3912_v3 = vpop.permute.xlu1 %3911  ;;  %3801 = vrot.lane.b32.xlu0 %v7668_v61, %s5459_s24 }
 0x4e5   : > { %v4323_v13 = vsel %vm1987_vm8, %v4291_v55, %v3912_v3 }
 0x4e6   : > { %3547 = vrot.lane.b32.xlu1 %v7310_v51, %s5457_s18  ;;  %v3786_v49 = vpop.permute.xlu0 %3785 }
 0x4e8   : > { %v3532_v59 = vpop.permute.xlu1 %3531  ;;  %3421 = vrot.lane.b32.xlu0 %v7668_v61, %s5456_s17 }
 0x4ea   : > { %4055 = vrot.lane.b32.xlu1 %v3083_v38, %s5461_s20  ;;  %v7686_v51 = vpop.permute.xlu0 %3405 }
 0x4ec   : > { %v4040_v32 = vpop.permute.xlu1 %4039  ;;  %3929 = vrot.lane.b32.xlu0 %v7303_v52, %s5460_s29 }
 0x4ed   : > { %v4355_v40 = vsel %vm2020_vm9, %v4323_v13, %v4040_v32 }
 0x4ee   : > { %3675 = vrot.lane.b32.xlu1 %v3083_v38, %s5458_s19  ;;  %5384 = vmatprep.mubr.msk.f32.mxu1 %vm2065_vm10, %v4355_v40  ;;  %v3914_v23 = vpop.permute.xlu0 %3913  ;;  %v3085_v40 = vld [vmem:[#allocation2 + $0xda] sm:$0xff] }
 0x4f0   : > { %v3660_v28 = vpop.permute.xlu1 %3659  ;;  %3549 = vrot.lane.b32.xlu0 %v7303_v52, %s5457_s18  ;;  %v4292_v52 = vsel %vm1954_vm7, %v4260_v10, %v3786_v49  ;;  %v7726_v49 = vld [vmem:[#allocation2 + $0xe0] sm:$0xff] }
 0x4f1   : > { %v4324_v9 = vsel %vm1987_vm8, %v4292_v52, %v3914_v23 }
 0x4f2   : > { %3295 = vrot.lane.b32.xlu1 %v3083_v38, %s5455_s16  ;;  %v3534_v30 = vpop.permute.xlu0 %3533  ;;  %v4165_v38 = vsel %vm1822_vm3, %v4133_v14, %v7646_v47 }
 0x4f3   : > { %v4197_v55 = vsel %vm1855_vm4, %v4165_v38, %v7661_v15  ;;  %v7782_v38 = vld [vmem:[#allocation2 + $0xf8] sm:$0xff] }
 0x4f4   : > { %v7705_v12 = vpop.permute.xlu1 %3279  ;;  %4057 = vrot.lane.b32.xlu0 %v3084_v50, %s5461_s20  ;;  %v4229_v32 = vsel %vm1888_vm5, %v4197_v55, %v3532_v59  ;;  %v4135_v55 = vsel %vm366_vm0, %v7445_v37, %v7441_v22 }
 0x4f5   : > { %v4261_v23 = vsel %vm1921_vm6, %v4229_v32, %v3660_v28  ;;  %v4167_v32 = vsel %vm1822_vm3, %v4135_v55, %v7705_v12 }
 0x4f6   : > { %3803 = vrot.lane.b32.xlu1 %v7707_v42, %s5459_s24  ;;  %v4042_v8 = vpop.permute.xlu0 %4041 }
 0x4f7   : > { %v4356_v18 = vsel %vm2020_vm9, %v4324_v9, %v4042_v8  ;;  %v3086_v9 = vld [vmem:[#allocation2 + $0xe2] sm:$0xff] }
 0x4f8   : > { %v3788_v36 = vpop.permute.xlu1 %3787  ;;  %3677 = vrot.lane.b32.xlu0 %v3084_v50, %s5458_s19  ;;  %5385 = vmatmul.mubr.msk.f32.gmra.mxu1 %vm2065_vm10, %v4356_v18  ;;  %v7763_v18 = vld [vmem:[#allocation2 + $0xf0] sm:$0xff] }
 0x4f9   : > { %v4293_v63 = vsel %vm1954_vm7, %v4261_v23, %v3788_v36 }
 0x4fa   : > { %3423 = vrot.lane.b32.xlu1 %v7707_v42, %s5456_s17  ;;  %v3662_v0 = vpop.permute.xlu0 %3661 }
 0x4fc   : > { %v7720_v3 = vpop.permute.xlu1 %3407  ;;  %3297 = vrot.lane.b32.xlu0 %v3084_v50, %s5455_s16  ;;  %v4198_v50 = vsel %vm1855_vm4, %v4166_v21, %v7686_v51 }
 0x4fd   : > { %v4230_v52 = vsel %vm1888_vm5, %v4198_v50, %v3534_v30  ;;  %v4199_v23 = vsel %vm1855_vm4, %v4167_v32, %v7720_v3  ;;  %v4137_v32 = vsel %vm366_vm0, %v7499_v4, %v7450_v25 }
 0x4fe   : > { %3931 = vrot.lane.b32.xlu1 %v3053_v27, %s5460_s29  ;;  %v7724_v41 = vpop.permute.xlu0 %3281  ;;  %v4262_v19 = vsel %vm1921_vm6, %v4230_v52, %v3662_v0 }
 0x4ff   : > { %v4168_v21 = vsel %vm1822_vm3, %v4136_v57, %v7724_v41 }
 0x500   : > { %v3916_v33 = vpop.permute.xlu1 %3915  ;;  %3805 = vrot.lane.b32.xlu0 %v7726_v49, %s5459_s24 }
 0x501   : > { %v4325_v47 = vsel %vm1987_vm8, %v4293_v63, %v3916_v33  ;;  %v3055_v33 = vld [vmem:[#allocation2 + $0xf1] sm:$0xff] }
 0x502   : > { %3551 = vrot.lane.b32.xlu1 %v3053_v27, %s5457_s18  ;;  %v3790_v31 = vpop.permute.xlu0 %3789 }
 0x503   : > { %v4294_v56 = vsel %vm1954_vm7, %v4262_v19, %v3790_v31  ;;  %v3088_v19 = vld [vmem:[#allocation2 + $0xfa] sm:$0xff] }
 0x504   : > { %v3536_v13 = vpop.permute.xlu1 %3535  ;;  %3425 = vrot.lane.b32.xlu0 %v7726_v49, %s5456_s17 }
 0x506   : > { %4059 = vrot.lane.b32.xlu1 %v3085_v40, %s5461_s20  ;;  %v7744_v53 = vpop.permute.xlu0 %3409 }
 0x507   : > { %v4200_v50 = vsel %vm1855_vm4, %v4168_v21, %v7744_v53 }
 0x508   : > { %v4044_v17 = vpop.permute.xlu1 %4043  ;;  %3933 = vrot.lane.b32.xlu0 %v3054_v60, %s5460_s29 }
 0x509   : > { %v4357_v15 = vsel %vm2020_vm9, %v4325_v47, %v4044_v17  ;;  %v4231_v47 = vsel %vm1888_vm5, %v4199_v23, %v3536_v13 }
 0x50a   : > { %3679 = vrot.lane.b32.xlu1 %v3085_v40, %s5458_s19  ;;  %5387 = vmatprep.mubr.msk.f32.mxu1 %vm2065_vm10, %v4357_v15  ;;  %v3918_v59 = vpop.permute.xlu0 %3917  ;;  %v3056_v15 = vld [vmem:[#allocation2 + $0xf9] sm:$0xff] }
 0x50b   : > { %v4326_v46 = vsel %vm1987_vm8, %v4294_v56, %v3918_v59 }
 0x50c   : > { %v3664_v28 = vpop.permute.xlu1 %3663  ;;  %3553 = vrot.lane.b32.xlu0 %v3054_v60, %s5457_s18  ;;  %v3087_v60 = vld [vmem:[#allocation2 + $0xf2] sm:$0xff] }
 0x50d   : > { %v4263_v17 = vsel %vm1921_vm6, %v4231_v47, %v3664_v28 }
 0x50e   : > { %3299 = vrot.lane.b32.xlu1 %v3085_v40, %s5455_s16  ;;  %v3538_v10 = vpop.permute.xlu0 %3537 }
 0x510   : > { %v7761_v8 = vpop.permute.xlu1 %3283  ;;  %4061 = vrot.lane.b32.xlu0 %v3086_v9, %s5461_s20 }
 0x512   : > { %3807 = vrot.lane.b32.xlu1 %v7763_v18, %s5459_s24  ;;  %v4046_v51 = vpop.permute.xlu0 %4045 }
 0x513   : > { %v4358_v36 = vsel %vm2020_vm9, %v4326_v46, %v4046_v51  ;;  %v7819_v46 = vld [vmem:[#allocation2 + $0x108] sm:$0xff] }
 0x514   : > { %v3792_v30 = vpop.permute.xlu1 %3791  ;;  %3681 = vrot.lane.b32.xlu0 %v3086_v9, %s5458_s19  ;;  %5388 = vmatmul.mubr.msk.f32.gmra.mxu1 %vm2065_vm10, %v4358_v36 }
 0x515   : > { %v4295_v22 = vsel %vm1954_vm7, %v4263_v17, %v3792_v30 }
 0x516   : > { %3427 = vrot.lane.b32.xlu1 %v7763_v18, %s5456_s17  ;;  %v3666_v0 = vpop.permute.xlu0 %3665 }
 0x518   : > { %v7776_v27 = vpop.permute.xlu1 %3411  ;;  %3301 = vrot.lane.b32.xlu0 %v3086_v9, %s5455_s16  ;;  %v4232_v9 = vsel %vm1888_vm5, %v4200_v50, %v3538_v10 }
 0x519   : > { %v4264_v20 = vsel %vm1921_vm6, %v4232_v9, %v3666_v0  ;;  %v3057_v0 = vld [vmem:[#allocation2 + $0x109] sm:$0xff]  ;;  %v3090_v9 = vld [vmem:[#allocation2 + $0x112] sm:$0xff] }
 0x51a   : > { %3935 = vrot.lane.b32.xlu1 %v3055_v33, %s5460_s29  ;;  %v7780_v14 = vpop.permute.xlu0 %3285 }
 0x51c   : > { %v3920_v31 = vpop.permute.xlu1 %3919  ;;  %3809 = vrot.lane.b32.xlu0 %v7782_v38, %s5459_s24 }
 0x51d   : > { %v4327_v12 = vsel %vm1987_vm8, %v4295_v22, %v3920_v31  ;;  %v7838_v31 = vld [vmem:[#allocation2 + $0x110] sm:$0xff] }
 0x51e   : > { %3555 = vrot.lane.b32.xlu1 %v3055_v33, %s5457_s18  ;;  %v3794_v40 = vpop.permute.xlu0 %3793  ;;  %v3089_v22 = vld [vmem:[#allocation2 + $0x10a] sm:$0xff] }
 0x51f   : > { %v4296_v39 = vsel %vm1954_vm7, %v4264_v20, %v3794_v40  ;;  %v4169_v40 = vsel %vm1822_vm3, %v4137_v32, %v7761_v8  ;;  %v7875_v20 = vld [vmem:[#allocation2 + $0x120] sm:$0xff] }
 0x520   : > { %v3540_v63 = vpop.permute.xlu1 %3539  ;;  %3429 = vrot.lane.b32.xlu0 %v7782_v38, %s5456_s17  ;;  %v4201_v47 = vsel %vm1855_vm4, %v4169_v40, %v7776_v27 }
 0x521   : > { %v4233_v17 = vsel %vm1888_vm5, %v4201_v47, %v3540_v63 }
 0x522   : > { %4063 = vrot.lane.b32.xlu1 %v3087_v60, %s5461_s20  ;;  %v7800_v37 = vpop.permute.xlu0 %3413 }
 0x524   : > { %v4048_v59 = vpop.permute.xlu1 %4047  ;;  %3937 = vrot.lane.b32.xlu0 %v3056_v15, %s5460_s29 }
 0x525   : > { %v4359_v3 = vsel %vm2020_vm9, %v4327_v12, %v4048_v59 }
 0x526   : > { %3683 = vrot.lane.b32.xlu1 %v3087_v60, %s5458_s19  ;;  %5390 = vmatprep.mubr.msk.f32.mxu1 %vm2065_vm10, %v4359_v3  ;;  %v3922_v13 = vpop.permute.xlu0 %3921 }
 0x527   : > { %v4328_v41 = vsel %vm1987_vm8, %v4296_v39, %v3922_v13  ;;  %v4138_v13 = vsel %vm366_vm0, %v7520_v6, %v7443_v43 }
 0x528   : > { %v3668_v28 = vpop.permute.xlu1 %3667  ;;  %3557 = vrot.lane.b32.xlu0 %v3056_v15, %s5457_s18  ;;  %v3058_v15 = vld [vmem:[#allocation2 + $0x111] sm:$0xff] }
 0x529   : > { %v4265_v12 = vsel %vm1921_vm6, %v4233_v17, %v3668_v28  ;;  %v4170_v28 = vsel %vm1822_vm3, %v4138_v13, %v7780_v14 }
 0x52a   : > { %3303 = vrot.lane.b32.xlu1 %v3087_v60, %s5455_s16  ;;  %v3542_v52 = vpop.permute.xlu0 %3541  ;;  %v4202_v57 = vsel %vm1855_vm4, %v4170_v28, %v7800_v37  ;;  %v3092_v28 = vld [vmem:[#allocation2 + $0x12a] sm:$0xff] }
 0x52b   : > { %v4234_v50 = vsel %vm1888_vm5, %v4202_v57, %v3542_v52 }
 0x52c   : > { %v7817_v56 = vpop.permute.xlu1 %3287  ;;  %4065 = vrot.lane.b32.xlu0 %v3088_v19, %s5461_s20 }
 0x52e   : > { %3811 = vrot.lane.b32.xlu1 %v7819_v46, %s5459_s24  ;;  %v4050_v53 = vpop.permute.xlu0 %4049 }
 0x52f   : > { %v4360_v51 = vsel %vm2020_vm9, %v4328_v41, %v4050_v53 }
 0x530   : > { %v3796_v10 = vpop.permute.xlu1 %3795  ;;  %3685 = vrot.lane.b32.xlu0 %v3088_v19, %s5458_s19  ;;  %5391 = vmatmul.mubr.msk.f32.gmra.mxu1 %vm2065_vm10, %v4360_v51  ;;  %v3059_v51 = vld [vmem:[#allocation2 + $0x121] sm:$0xff] }
 0x531   : > { %v4297_v25 = vsel %vm1954_vm7, %v4265_v12, %v3796_v10 }
 0x532   : > { %3431 = vrot.lane.b32.xlu1 %v7819_v46, %s5456_s17  ;;  %v3670_v36 = vpop.permute.xlu0 %3669 }
 0x533   : > { %v4266_v43 = vsel %vm1921_vm6, %v4234_v50, %v3670_v36  ;;  %v7894_v36 = vld [vmem:[#allocation2 + $0x128] sm:$0xff]  ;;  %v7931_v50 = vld [vmem:[#allocation2 + $0x138] sm:$0xff] }
 0x534   : > { %v7832_v30 = vpop.permute.xlu1 %3415  ;;  %3305 = vrot.lane.b32.xlu0 %v3088_v19, %s5455_s16 }
 0x536   : > { %3939 = vrot.lane.b32.xlu1 %v3057_v0, %s5460_s29  ;;  %v7836_v33 = vpop.permute.xlu0 %3289 }
 0x538   : > { %v3924_v55 = vpop.permute.xlu1 %3923  ;;  %3813 = vrot.lane.b32.xlu0 %v7838_v31, %s5459_s24 }
 0x539   : > { %v4329_v8 = vsel %vm1987_vm8, %v4297_v25, %v3924_v55  ;;  %v4139_v55 = vsel %vm366_vm0, %v7541_v54, %v7457_v1  ;;  %v3060_v25 = vld [vmem:[#allocation2 + $0x129] sm:$0xff] }
 0x53a   : > { %3559 = vrot.lane.b32.xlu1 %v3057_v0, %s5457_s18  ;;  %v3798_v23 = vpop.permute.xlu0 %3797  ;;  %v4171_v32 = vsel %vm1822_vm3, %v4139_v55, %v7817_v56 }
 0x53b   : > { %v4298_v6 = vsel %vm1954_vm7, %v4266_v43, %v3798_v23  ;;  %v4203_v23 = vsel %vm1855_vm4, %v4171_v32, %v7832_v30 }
 0x53c   : > { %v3544_v60 = vpop.permute.xlu1 %3543  ;;  %3433 = vrot.lane.b32.xlu0 %v7838_v31, %s5456_s17 }
 0x53d   : > { %v4235_v17 = vsel %vm1888_vm5, %v4203_v23, %v3544_v60  ;;  %v3093_v23 = vld [vmem:[#allocation2 + $0x13a] sm:$0xff] }
 0x53e   : > { %4067 = vrot.lane.b32.xlu1 %v3089_v22, %s5461_s20  ;;  %v7856_v4 = vpop.permute.xlu0 %3417 }
 0x540   : > { %v4052_v59 = vpop.permute.xlu1 %4051  ;;  %3941 = vrot.lane.b32.xlu0 %v3058_v15, %s5460_s29 }
 0x541   : > { %v4361_v27 = vsel %vm2020_vm9, %v4329_v8, %v4052_v59  ;;  %v4140_v59 = vsel %vm366_vm0, %v7556_v29, %v7452_v11 }
 0x542   : > { %3687 = vrot.lane.b32.xlu1 %v3089_v22, %s5458_s19  ;;  %5393 = vmatprep.mubr.msk.f32.mxu1 %vm2065_vm10, %v4361_v27  ;;  %v3926_v63 = vpop.permute.xlu0 %3925  ;;  %v4172_v27 = vsel %vm1822_vm3, %v4140_v59, %v7836_v33 }
 0x543   : > { %v4330_v14 = vsel %vm1987_vm8, %v4298_v6, %v3926_v63  ;;  %v4204_v63 = vsel %vm1855_vm4, %v4172_v27, %v7856_v4 }
 0x544   : > { %v3672_v3 = vpop.permute.xlu1 %3671  ;;  %3561 = vrot.lane.b32.xlu0 %v3058_v15, %s5457_s18 }
 0x545   : > { %v4267_v12 = vsel %vm1921_vm6, %v4235_v17, %v3672_v3 }
 0x546   : > { %3307 = vrot.lane.b32.xlu1 %v3089_v22, %s5455_s16  ;;  %v3546_v21 = vpop.permute.xlu0 %3545  ;;  %v3091_v22 = vld [vmem:[#allocation2 + $0x122] sm:$0xff] }
 0x547   : > { %v4236_v13 = vsel %vm1888_vm5, %v4204_v63, %v3546_v21 }
 0x548   : > { %v7873_v19 = vpop.permute.xlu1 %3291  ;;  %4069 = vrot.lane.b32.xlu0 %v3090_v9, %s5461_s20 }
 0x54a   : > { %3815 = vrot.lane.b32.xlu1 %v7875_v20, %s5459_s24  ;;  %v4054_v37 = vpop.permute.xlu0 %4053 }
 0x54b   : > { %v4362_v39 = vsel %vm2020_vm9, %v4330_v14, %v4054_v37  ;;  %v3061_v14 = vld [vmem:[#allocation2 + $0x139] sm:$0xff] }
 0x54c   : > { %v3800_v52 = vpop.permute.xlu1 %3799  ;;  %3689 = vrot.lane.b32.xlu0 %v3090_v9, %s5458_s19  ;;  %5394 = vmatmul.mubr.msk.f32.gmra.mxu1 %vm2065_vm10, %v4362_v39  ;;  %v3030_v39 = vld [vmem:[#allocation2 + $0x140] sm:$0xff] }
 0x54d   : > { %v4299_v1 = vsel %vm1954_vm7, %v4267_v12, %v3800_v52 }
 0x54e   : > { %3435 = vrot.lane.b32.xlu1 %v7875_v20, %s5456_s17  ;;  %v3674_v41 = vpop.permute.xlu0 %3673 }
 0x54f   : > { %v4268_v29 = vsel %vm1921_vm6, %v4236_v13, %v3674_v41  ;;  %v4141_v41 = vsel %vm366_vm0, %v7590_v58, %v7464_v35 }
 0x550   : > { %v7888_v53 = vpop.permute.xlu1 %3419  ;;  %3309 = vrot.lane.b32.xlu0 %v3090_v9, %s5455_s16 }
 0x552   : > { %3943 = vrot.lane.b32.xlu1 %v3059_v51, %s5460_s29  ;;  %v7892_v10 = vpop.permute.xlu0 %3293 }
 0x554   : > { %v3928_v0 = vpop.permute.xlu1 %3927  ;;  %3817 = vrot.lane.b32.xlu0 %v7894_v36, %s5459_s24 }
 0x555   : > { %v4331_v56 = vsel %vm1987_vm8, %v4299_v1, %v3928_v0 }
 0x556   : > { %3563 = vrot.lane.b32.xlu1 %v3059_v51, %s5457_s18  ;;  %v3802_v40 = vpop.permute.xlu0 %3801  ;;  %v4173_v51 = vsel %vm1822_vm3, %v4141_v41, %v7873_v19  ;;  %v3095_v41 = vld [vmem:[#allocation2 + $0x152] sm:$0xff] }
 0x557   : > { %v4300_v11 = vsel %vm1954_vm7, %v4268_v29, %v3802_v40  ;;  %v4205_v55 = vsel %vm1855_vm4, %v4173_v51, %v7888_v53  ;;  %v3063_v29 = vld [vmem:[#allocation2 + $0x151] sm:$0xff] }
 0x558   : > { %v3548_v47 = vpop.permute.xlu1 %3547  ;;  %3437 = vrot.lane.b32.xlu0 %v7894_v36, %s5456_s17 }
 0x559   : > { %v4237_v40 = vsel %vm1888_vm5, %v4205_v55, %v3548_v47 }
 0x55a   : > { %4071 = vrot.lane.b32.xlu1 %v3091_v22, %s5461_s20  ;;  %v7912_v54 = vpop.permute.xlu0 %3421 }
 0x55c   : > { %v4056_v8 = vpop.permute.xlu1 %4055  ;;  %3945 = vrot.lane.b32.xlu0 %v3060_v25, %s5460_s29 }
 0x55d   : > { %v4363_v30 = vsel %vm2020_vm9, %v4331_v56, %v4056_v8  ;;  %v4142_v56 = vsel %vm366_vm0, %v7608_v16, %v7459_v48  ;;  %v3031_v48 = vld [vmem:[#allocation2 + $0x150] sm:$0xff] }
 0x55e   : > { %3691 = vrot.lane.b32.xlu1 %v3091_v22, %s5458_s19  ;;  %5396 = vmatprep.mubr.msk.f32.mxu1 %vm2065_vm10, %v4363_v30  ;;  %v3930_v60 = vpop.permute.xlu0 %3929 }
 0x55f   : > { %v4332_v33 = vsel %vm1987_vm8, %v4300_v11, %v3930_v60 }
 0x560   : > { %v3676_v15 = vpop.permute.xlu1 %3675  ;;  %3565 = vrot.lane.b32.xlu0 %v3060_v25, %s5457_s18  ;;  %v4174_v25 = vsel %vm1822_vm3, %v4142_v56, %v7892_v10 }
 0x561   : > { %v4269_v17 = vsel %vm1921_vm6, %v4237_v40, %v3676_v15  ;;  %v4206_v8 = vsel %vm1855_vm4, %v4174_v25, %v7912_v54  ;;  %v3094_v15 = vld [vmem:[#allocation2 + $0x142] sm:$0xff] }
 0x562   : > { %3311 = vrot.lane.b32.xlu1 %v3091_v22, %s5455_s16  ;;  %v3550_v3 = vpop.permute.xlu0 %3549  ;;  %v3062_v22 = vld [vmem:[#allocation2 + $0x141] sm:$0xff] }
 0x563   : > { %v4238_v60 = vsel %vm1888_vm5, %v4206_v8, %v3550_v3 }
 0x564   : > { %v7929_v57 = vpop.permute.xlu1 %3295  ;;  %4073 = vrot.lane.b32.xlu0 %v3092_v28, %s5461_s20 }
 0x566   : > { %3819 = vrot.lane.b32.xlu1 %v7931_v50, %s5459_s24  ;;  %v4058_v4 = vpop.permute.xlu0 %4057 }
 0x567   : > { %v4364_v9 = vsel %vm2020_vm9, %v4332_v33, %v4058_v4  ;;  %v3032_v33 = vld [vmem:[#allocation2 + $0x158] sm:$0xff] }
 0x568   : > { %v3804_v21 = vpop.permute.xlu1 %3803  ;;  %3693 = vrot.lane.b32.xlu0 %v3092_v28, %s5458_s19  ;;  %5397 = vmatmul.mubr.msk.f32.gmra.mxu1 %vm2065_vm10, %v4364_v9  ;;  %v4143_v9 = vsel %vm366_vm0, %v7648_v26, %v7474_v24 }
 0x569   : > { %v4301_v35 = vsel %vm1954_vm7, %v4269_v17, %v3804_v21  ;;  %v4175_v21 = vsel %vm1822_vm3, %v4143_v9, %v7929_v57 }
 0x56a   : > { %3439 = vrot.lane.b32.xlu1 %v7931_v50, %s5456_s17  ;;  %v3678_v43 = vpop.permute.xlu0 %3677 }
 0x56b   : > { %v4270_v27 = vsel %vm1921_vm6, %v4238_v60, %v3678_v43 }
 0x56c   : > { %v7944_v6 = vpop.permute.xlu1 %3423  ;;  %3313 = vrot.lane.b32.xlu0 %v3092_v28, %s5455_s16 }
 0x56e   : > { %3947 = vrot.lane.b32.xlu1 %v3061_v14, %s5460_s29  ;;  %v7948_v37 = vpop.permute.xlu0 %3297 }
 0x570   : > { %v3932_v52 = vpop.permute.xlu1 %3931  ;;  %3821 = vrot.lane.b32.xlu0 %v3030_v39, %s5459_s24 }
 0x571   : > { %v4333_v19 = vsel %vm1987_vm8, %v4301_v35, %v3932_v52 }
 0x572   : > { %3567 = vrot.lane.b32.xlu1 %v3061_v14, %s5457_s18  ;;  %v3806_v0 = vpop.permute.xlu0 %3805  ;;  %v4207_v14 = vsel %vm1855_vm4, %v4175_v21, %v7944_v6 }
 0x573   : > { %v4302_v16 = vsel %vm1954_vm7, %v4270_v27, %v3806_v0  ;;  %v3064_v0 = vld [vmem:[#allocation2 + $0x159] sm:$0xff] }
 0x574   : > { %v3552_v32 = vpop.permute.xlu1 %3551  ;;  %3441 = vrot.lane.b32.xlu0 %v3030_v39, %s5456_s17 }
 0x575   : > { %v4239_v52 = vsel %vm1888_vm5, %v4207_v14, %v3552_v32 }
 0x576   : > { %4075 = vrot.lane.b32.xlu1 %v3093_v23, %s5461_s20  ;;  %v7964_v58 = vpop.permute.xlu0 %3425 }
 0x578   : > { %v4060_v12 = vpop.permute.xlu1 %4059  ;;  %3949 = vrot.lane.b32.xlu0 %v3062_v22, %s5460_s29 }
 0x579   : > { %v4365_v53 = vsel %vm2020_vm9, %v4333_v19, %v4060_v12  ;;  %v3096_v12 = vld [vmem:[#allocation2 + $0x15a] sm:$0xff] }
 0x57a   : > { %3695 = vrot.lane.b32.xlu1 %v3093_v23, %s5458_s19  ;;  %5399 = vmatprep.mubr.msk.f32.mxu1 %vm2065_vm10, %v4365_v53  ;;  %v3934_v47 = vpop.permute.xlu0 %3933 }
 0x57b   : > { %v4334_v10 = vsel %vm1987_vm8, %v4302_v16, %v3934_v47 }
 0x57c   : > { %v3680_v1 = vpop.permute.xlu1 %3679  ;;  %3569 = vrot.lane.b32.xlu0 %v3062_v22, %s5457_s18 }
 0x57d   : > { %v4271_v51 = vsel %vm1921_vm6, %v4239_v52, %v3680_v1 }
 0x57e   : > { %3315 = vrot.lane.b32.xlu1 %v3093_v23, %s5455_s16  ;;  %v3554_v30 = vpop.permute.xlu0 %3553  ;;  %v4144_v23 = vsel %vm366_vm0, %v7668_v61, %v7468_v44  ;;  %v3033_v44 = vld [vmem:[#allocation2 + $0x168] sm:$0xff] }
 0x57f   : > { %v4176_v17 = vsel %vm1822_vm3, %v4144_v23, %v7948_v37 }
 0x580   : > { %v7981_v59 = vpop.permute.xlu1 %3299  ;;  %4077 = vrot.lane.b32.xlu0 %v3094_v15, %s5461_s20  ;;  %v4208_v35 = vsel %vm1855_vm4, %v4176_v17, %v7964_v58  ;;  %v3036_v17 = vld [vmem:[#allocation2 + $0x188] sm:$0xff] }
 0x581   : > { %v4240_v22 = vsel %vm1888_vm5, %v4208_v35, %v3554_v30  ;;  %v3065_v30 = vld [vmem:[#allocation2 + $0x169] sm:$0xff] }
 0x582   : > { %3823 = vrot.lane.b32.xlu1 %v3031_v48, %s5459_s24  ;;  %v4062_v63 = vpop.permute.xlu0 %4061 }
 0x583   : > { %v4366_v54 = vsel %vm2020_vm9, %v4334_v10, %v4062_v63 }
 0x584   : > { %v3808_v13 = vpop.permute.xlu1 %3807  ;;  %3697 = vrot.lane.b32.xlu0 %v3094_v15, %s5458_s19  ;;  %5400 = vmatmul.mubr.msk.f32.gmra.mxu1 %vm2065_vm10, %v4366_v54 }
 0x585   : > { %v4303_v24 = vsel %vm1954_vm7, %v4271_v51, %v3808_v13  ;;  %v3098_v51 = vld [vmem:[#allocation2 + $0x172] sm:$0xff] }
 0x586   : > { %3443 = vrot.lane.b32.xlu1 %v3031_v48, %s5456_s17  ;;  %v3682_v3 = vpop.permute.xlu0 %3681  ;;  %v4145_v48 = vsel %vm366_vm0, %v7707_v42, %v7481_v34 }
 0x587   : > { %v4272_v47 = vsel %vm1921_vm6, %v4240_v22, %v3682_v3  ;;  %v4177_v16 = vsel %vm1822_vm3, %v4145_v48, %v7981_v59  ;;  %v3097_v3 = vld [vmem:[#allocation2 + $0x16a] sm:$0xff] }
 0x588   : > { %v7992_v28 = vpop.permute.xlu1 %3427  ;;  %3317 = vrot.lane.b32.xlu0 %v3094_v15, %s5455_s16  ;;  %v3034_v15 = vld [vmem:[#allocation2 + $0x170] sm:$0xff] }
 0x589   : > { %v4209_v63 = vsel %vm1855_vm4, %v4177_v16, %v7992_v28 }
 0x58a   : > { %3951 = vrot.lane.b32.xlu1 %v3063_v29, %s5460_s29  ;;  %v7996_v11 = vpop.permute.xlu0 %3301 }
 0x58c   : > { %v3936_v4 = vpop.permute.xlu1 %3935  ;;  %3825 = vrot.lane.b32.xlu0 %v3032_v33, %s5459_s24 }
 0x58d   : > { %v4335_v57 = vsel %vm1987_vm8, %v4303_v24, %v3936_v4 }
 0x58e   : > { %3571 = vrot.lane.b32.xlu1 %v3063_v29, %s5457_s18  ;;  %v3810_v43 = vpop.permute.xlu0 %3809 }
 0x58f   : > { %v4304_v61 = vsel %vm1954_vm7, %v4272_v47, %v3810_v43  ;;  %v4146_v43 = vsel %vm366_vm0, %v7726_v49, %v7476_v2  ;;  %v3035_v2 = vld [vmem:[#allocation2 + $0x180] sm:$0xff] }
 0x590   : > { %v3556_v39 = vpop.permute.xlu1 %3555  ;;  %3445 = vrot.lane.b32.xlu0 %v3032_v33, %s5456_s17  ;;  %v3066_v33 = vld [vmem:[#allocation2 + $0x171] sm:$0xff]  ;;  %v4178_v14 = vsel %vm1822_vm3, %v4146_v43, %v7996_v11  ;;  %v3101_v43 = vld [vmem:[#allocation2 + $0x19a] sm:$0xff] }
 0x591   : > { %v4241_v13 = vsel %vm1888_vm5, %v4209_v63, %v3556_v39 }
 0x592   : > { %4079 = vrot.lane.b32.xlu1 %v3095_v41, %s5461_s20  ;;  %v8012_v26 = vpop.permute.xlu0 %3429 }
 0x593   : > { %v4210_v39 = vsel %vm1855_vm4, %v4178_v14, %v8012_v26 }
 0x594   : > { %v4064_v55 = vpop.permute.xlu1 %4063  ;;  %3953 = vrot.lane.b32.xlu0 %v3064_v0, %s5460_s29 }
 0x595   : > { %v4367_v6 = vsel %vm2020_vm9, %v4335_v57, %v4064_v55 }
 0x596   : > { %3699 = vrot.lane.b32.xlu1 %v3095_v41, %s5458_s19  ;;  %5402 = vmatprep.mubr.msk.f32.mxu1 %vm2065_vm10, %v4367_v6  ;;  %v3938_v32 = vpop.permute.xlu0 %3937 }
 0x597   : > { %v4336_v37 = vsel %vm1987_vm8, %v4304_v61, %v3938_v32 }
 0x598   : > { %v3684_v40 = vpop.permute.xlu1 %3683  ;;  %3573 = vrot.lane.b32.xlu0 %v3064_v0, %s5457_s18 }
 0x599   : > { %v4273_v29 = vsel %vm1921_vm6, %v4241_v13, %v3684_v40  ;;  %v3067_v40 = vld [vmem:[#allocation2 + $0x181] sm:$0xff] }
 0x59a   : > { %3319 = vrot.lane.b32.xlu1 %v3095_v41, %s5455_s16  ;;  %v3558_v19 = vpop.permute.xlu0 %3557 }
 0x59b   : > { %v4242_v41 = vsel %vm1888_vm5, %v4210_v39, %v3558_v19  ;;  %v4147_v19 = vsel %vm366_vm0, %v7763_v18, %v7488_v45  ;;  %v4149_v39 = vsel %vm366_vm0, %v7819_v46, %v7495_v62 }
 0x59c   : > { %v8029_v53 = vpop.permute.xlu1 %3303  ;;  %4081 = vrot.lane.b32.xlu0 %v3096_v12, %s5461_s20 }
 0x59d   : > { %v4179_v22 = vsel %vm1822_vm3, %v4147_v19, %v8029_v53  ;;  %v3068_v53 = vld [vmem:[#allocation2 + $0x189] sm:$0xff] }
 0x59e   : > { %3827 = vrot.lane.b32.xlu1 %v3033_v44, %s5459_s24  ;;  %v4066_v1 = vpop.permute.xlu0 %4065 }
 0x59f   : > { %v4368_v58 = vsel %vm2020_vm9, %v4336_v37, %v4066_v1  ;;  %v3099_v37 = vld [vmem:[#allocation2 + $0x182] sm:$0xff] }
 0x5a0   : > { %v3812_v56 = vpop.permute.xlu1 %3811  ;;  %3701 = vrot.lane.b32.xlu0 %v3096_v12, %s5458_s19  ;;  %5403 = vmatmul.mubr.msk.f32.gmra.mxu1 %vm2065_vm10, %v4368_v58 }
 0x5a1   : > { %v4305_v34 = vsel %vm1954_vm7, %v4273_v29, %v3812_v56 }
 0x5a2   : > { %3447 = vrot.lane.b32.xlu1 %v3033_v44, %s5456_s17  ;;  %v3686_v25 = vpop.permute.xlu0 %3685 }
 0x5a3   : > { %v4274_v57 = vsel %vm1921_vm6, %v4242_v41, %v3686_v25 }
 0x5a4   : > { %v8040_v8 = vpop.permute.xlu1 %3431  ;;  %3321 = vrot.lane.b32.xlu0 %v3096_v12, %s5455_s16 }
 0x5a5   : > { %v4211_v47 = vsel %vm1855_vm4, %v4179_v22, %v8040_v8 }
 0x5a6   : > { %3955 = vrot.lane.b32.xlu1 %v3065_v30, %s5460_s29  ;;  %v8044_v60 = vpop.permute.xlu0 %3305 }
 0x5a8   : > { %v3940_v27 = vpop.permute.xlu1 %3939  ;;  %3829 = vrot.lane.b32.xlu0 %v3034_v15, %s5459_s24 }
 0x5a9   : > { %v4337_v59 = vsel %vm1987_vm8, %v4305_v34, %v3940_v27  ;;  %v3006_v27 = vld [vmem:[#allocation2 + $0x18a] sm:$0xff]  ;;  %v3037_v34 = vld [vmem:[#allocation2 + $0x198] sm:$0xff] }
 0x5aa   : > { %3575 = vrot.lane.b32.xlu1 %v3065_v30, %s5457_s18  ;;  %v3814_v10 = vpop.permute.xlu0 %3813 }
 0x5ab   : > { %v4306_v49 = vsel %vm1954_vm7, %v4274_v57, %v3814_v10 }
 0x5ac   : > { %v3560_v54 = vpop.permute.xlu1 %3559  ;;  %3449 = vrot.lane.b32.xlu0 %v3034_v15, %s5456_s17  ;;  %v4148_v15 = vsel %vm366_vm0, %v7782_v38, %v7483_v5  ;;  %v3038_v5 = vld [vmem:[#allocation2 + $0x1a0] sm:$0xff] }
 0x5ad   : > { %v4243_v61 = vsel %vm1888_vm5, %v4211_v47, %v3560_v54  ;;  %v4180_v48 = vsel %vm1822_vm3, %v4148_v15, %v8044_v60 }
 0x5ae   : > { %4083 = vrot.lane.b32.xlu1 %v3097_v3, %s5461_s20  ;;  %v8060_v42 = vpop.permute.xlu0 %3433 }
 0x5af   : > { %v4212_v16 = vsel %vm1855_vm4, %v4180_v48, %v8060_v42 }
 0x5b0   : > { %v4068_v4 = vpop.permute.xlu1 %4067  ;;  %3957 = vrot.lane.b32.xlu0 %v3066_v33, %s5460_s29 }
 0x5b1   : > { %v4369_v28 = vsel %vm2020_vm9, %v4337_v59, %v4068_v4  ;;  %v3070_v59 = vld [vmem:[#allocation2 + $0x1a1] sm:$0xff]  ;;  %v3069_v4 = vld [vmem:[#allocation2 + $0x199] sm:$0xff] }
 0x5b2   : > { %3703 = vrot.lane.b32.xlu1 %v3097_v3, %s5458_s19  ;;  %5405 = vmatprep.mubr.msk.f32.mxu1 %vm2065_vm10, %v4369_v28  ;;  %v3942_v9 = vpop.permute.xlu0 %3941 }
 0x5b3   : > { %v4338_v11 = vsel %vm1987_vm8, %v4306_v49, %v3942_v9  ;;  %v3102_v9 = vld [vmem:[#allocation2 + $0x1a2] sm:$0xff] }
 0x5b4   : > { %v3688_v21 = vpop.permute.xlu1 %3687  ;;  %3577 = vrot.lane.b32.xlu0 %v3066_v33, %s5457_s18 }
 0x5b5   : > { %v4275_v1 = vsel %vm1921_vm6, %v4243_v61, %v3688_v21 }
 0x5b6   : > { %3323 = vrot.lane.b32.xlu1 %v3097_v3, %s5455_s16  ;;  %v3562_v52 = vpop.permute.xlu0 %3561 }
 0x5b7   : > { %v4244_v63 = vsel %vm1888_vm5, %v4212_v16, %v3562_v52 }
 0x5b8   : > { %v8077_v24 = vpop.permute.xlu1 %3307  ;;  %4085 = vrot.lane.b32.xlu0 %v3098_v51, %s5461_s20 }
 0x5b9   : > { %v4181_v52 = vsel %vm1822_vm3, %v4149_v39, %v8077_v24 }
 0x5ba   : > { %3831 = vrot.lane.b32.xlu1 %v3035_v2, %s5459_s24  ;;  %v4070_v0 = vpop.permute.xlu0 %4069 }
 0x5bb   : > { %v4370_v26 = vsel %vm2020_vm9, %v4338_v11, %v4070_v0 }
 0x5bc   : > { %v3816_v55 = vpop.permute.xlu1 %3815  ;;  %3705 = vrot.lane.b32.xlu0 %v3098_v51, %s5458_s19  ;;  %5406 = vmatmul.mubr.msk.f32.gmra.mxu1 %vm2065_vm10, %v4370_v26 }
 0x5bd   : > { %v4307_v45 = vsel %vm1954_vm7, %v4275_v1, %v3816_v55 }
 0x5be   : > { %3451 = vrot.lane.b32.xlu1 %v3035_v2, %s5456_s17  ;;  %v3690_v6 = vpop.permute.xlu0 %3689 }
 0x5bf   : > { %v4276_v13 = vsel %vm1921_vm6, %v4244_v63, %v3690_v6  ;;  %v4150_v6 = vsel %vm366_vm0, %v7838_v31, %v7490_v7 }
 0x5c0   : > { %v8088_v32 = vpop.permute.xlu1 %3435  ;;  %3325 = vrot.lane.b32.xlu0 %v3098_v51, %s5455_s16 }
 0x5c1   : > { %v4213_v51 = vsel %vm1855_vm4, %v4181_v52, %v8088_v32 }
 0x5c2   : > { %3959 = vrot.lane.b32.xlu1 %v3067_v40, %s5460_s29  ;;  %v8092_v23 = vpop.permute.xlu0 %3309 }
 0x5c3   : > { %v4182_v32 = vsel %vm1822_vm3, %v4150_v6, %v8092_v23  ;;  %v8913_v6 = vld [vmem:[#allocation4_spill] sm:$0xff] }
 0x5c4   : > { %v3944_v35 = vpop.permute.xlu1 %3943  ;;  %3833 = vrot.lane.b32.xlu0 %v3036_v17, %s5459_s24 }
 0x5c5   : > { %v4339_v58 = vsel %vm1987_vm8, %v4307_v45, %v3944_v35  ;;  %v8910_v45 = vld [vmem:[#allocation21_spill] sm:$0xff] }
 0x5c6   : > { %3579 = vrot.lane.b32.xlu1 %v3067_v40, %s5457_s18  ;;  %v3818_v12 = vpop.permute.xlu0 %3817 }
 0x5c7   : > { %v4308_v38 = vsel %vm1954_vm7, %v4276_v13, %v3818_v12 }
 0x5c8   : > { %v3564_v44 = vpop.permute.xlu1 %3563  ;;  %3453 = vrot.lane.b32.xlu0 %v3036_v17, %s5456_s17 }
 0x5c9   : > { %v4245_v2 = vsel %vm1888_vm5, %v4213_v51, %v3564_v44 }
 0x5ca   : > { %4087 = vrot.lane.b32.xlu1 %v3099_v37, %s5461_s20  ;;  %v3438_v18 = vpop.permute.xlu0 %3437 }
 0x5cb   : > { %v4214_v40 = vsel %vm1855_vm4, %v4182_v32, %v3438_v18  ;;  %v4151_v18 = vsel %vm366_vm0, %v7875_v20, %v8910_v45 }
 0x5cc   : > { %v4072_v56 = vpop.permute.xlu1 %4071  ;;  %3961 = vrot.lane.b32.xlu0 %v3068_v53, %s5460_s29 }
 0x5cd   : > { %v4371_v25 = vsel %vm2020_vm9, %v4339_v58, %v4072_v56 }
 0x5ce   : > { %3707 = vrot.lane.b32.xlu1 %v3099_v37, %s5458_s19  ;;  %5408 = vmatprep.mubr.msk.f32.mxu1 %vm2065_vm10, %v4371_v25  ;;  %v3946_v8 = vpop.permute.xlu0 %3945 }
 0x5cf   : > { %v4340_v60 = vsel %vm1987_vm8, %v4308_v38, %v3946_v8 }
 0x5d0   : > { %v3692_v30 = vpop.permute.xlu1 %3691  ;;  %3581 = vrot.lane.b32.xlu0 %v3068_v53, %s5457_s18 }
 0x5d1   : > { %v4277_v49 = vsel %vm1921_vm6, %v4245_v2, %v3692_v30 }
 0x5d2   : > { %3709 = vrot.lane.b32.xlu1 %v3006_v27, %s5458_s19  ;;  %v3566_v10 = vpop.permute.xlu0 %3565 }
 0x5d3   : > { %v4246_v35 = vsel %vm1888_vm5, %v4214_v40, %v3566_v10 }
 0x5d4   : > { %v3312_v54 = vpop.permute.xlu1 %3311  ;;  %4089 = vrot.lane.b32.xlu0 %v3006_v27, %s5461_s20 }
 0x5d5   : > { %v4183_v58 = vsel %vm1822_vm3, %v4151_v18, %v3312_v54  ;;  %v8911_v54 = vld [vmem:[#allocation31_spill] sm:$0xff] }
 0x5d6   : > { %3837 = vrot.lane.b32.xlu1 %v3038_v5, %s5459_s24  ;;  %v4074_v3 = vpop.permute.xlu0 %4073  ;;  %v4152_v13 = vsel %vm366_vm0, %v7894_v36, %v8911_v54  ;;  %v2843_v18 = vld [vmem:[#allocation2 + $0x150] sm:$0xff] }
 0x5d7   : > { %v4372_v29 = vsel %vm2020_vm9, %v4340_v60, %v4074_v3 }
 0x5d8   : > { %v3820_v42 = vpop.permute.xlu1 %3819  ;;  %3835 = vrot.lane.b32.xlu0 %v3037_v34, %s5459_s24  ;;  %5409 = vmatmul.mubr.msk.f32.gmra.mxu1 %vm2065_vm10, %v4372_v29 }
 0x5d9   : > { %v4309_v11 = vsel %vm1954_vm7, %v4277_v49, %v3820_v42 }
 0x5da   : > { %3965 = vrot.lane.b32.xlu1 %v3070_v59, %s5460_s29  ;;  %v3694_v33 = vpop.permute.xlu0 %3693 }
 0x5db   : > { %v4278_v22 = vsel %vm1921_vm6, %v4246_v35, %v3694_v33 }
 0x5dc   : > { %v3440_v28 = vpop.permute.xlu1 %3439  ;;  %3963 = vrot.lane.b32.xlu0 %v3069_v4, %s5460_s29 }
 0x5dd   : > { %v4215_v56 = vsel %vm1855_vm4, %v4183_v58, %v3440_v28  ;;  %v8914_v58 = vld [vmem:[#allocation23_spill] sm:$0xff] }
 0x5de   : > { %4093 = vrot.lane.b32.xlu1 %v3102_v9, %s5461_s20  ;;  %v3314_v21 = vpop.permute.xlu0 %3313 }
 0x5df   : > { %v4184_v5 = vsel %vm1822_vm3, %v4152_v13, %v3314_v21  ;;  %v2844_v13 = vld [vmem:[#allocation2 + $0x158] sm:$0xff] }
 0x5e0   : > { %v3948_v14 = vpop.permute.xlu1 %3947  ;;  %4091 = vrot.lane.b32.xlu0 %v3101_v43, %s5461_s20 }
 0x5e1   : > { %v4341_v26 = vsel %vm1987_vm8, %v4309_v11, %v3948_v14  ;;  %v8912_v14 = vld [vmem:[#allocation22_spill] sm:$0xff] }
 0x5e2   : > { %v3822_v41 = vpop.permute.xlu0 %3821  ;;  %v4153_v39 = vsel %vm366_vm0, %v7931_v50, %v8912_v14  ;;  %v2846_v14 = vld [vmem:[#allocation2 + $0x170] sm:$0xff] }
 0x5e3   : > { %v4310_v12 = vsel %vm1954_vm7, %v4278_v22, %v3822_v41 }
 0x5e4   : > { %v3568_v57 = vpop.permute.xlu1 %3567 }
 0x5e5   : > { %v4247_v8 = vsel %vm1888_vm5, %v4215_v56, %v3568_v57 }
 0x5e6   : > { %v3442_v0 = vpop.permute.xlu0 %3441 }
 0x5e7   : > { %v4216_v38 = vsel %vm1855_vm4, %v4184_v5, %v3442_v0 }
 0x5e8   : > { %v4076_v55 = vpop.permute.xlu1 %4075 }
 0x5e9   : > { %v4373_v62 = vsel %vm2020_vm9, %v4341_v26, %v4076_v55 }
 0x5ea   : > { %5411 = vmatprep.mubr.msk.f32.mxu1 %vm2065_vm10, %v4373_v62  ;;  %v3950_v46 = vpop.permute.xlu0 %3949 }
 0x5eb   : > { %v4342_v47 = vsel %vm1987_vm8, %v4310_v12, %v3950_v46  ;;  %v2842_v46 = vld [vmem:[#allocation2 + $0x140] sm:$0xff] }
 0x5ec   : > { %v3696_v24 = vpop.permute.xlu1 %3695  ;;  %v4154_v32 = vsel %vm366_vm0, %v2842_v46, %v8913_v6 }
 0x5ed   : > { %v4279_v30 = vsel %vm1921_vm6, %v4247_v8, %v3696_v24 }
 0x5ee   : > { %v3570_v17 = vpop.permute.xlu0 %3569 }
 0x5ef   : > { %v4248_v3 = vsel %vm1888_vm5, %v4216_v38, %v3570_v17  ;;  %v8915_v38 = vld [vmem:[#allocation5_spill] sm:$0xff] }
 0x5f0   : > { %v3316_v19 = vpop.permute.xlu1 %3315 }
 0x5f1   : > { %v4185_v52 = vsel %vm1822_vm3, %v4153_v39, %v3316_v19  ;;  %v8916_v39 = vld [vmem:[#allocation6_spill] sm:$0xff] }
 0x5f2   : > { %v4078_v44 = vpop.permute.xlu0 %4077 }
 0x5f3   : > { %v4374_v61 = vsel %vm2020_vm9, %v4342_v47, %v4078_v44 }
 0x5f4   : > { %v3824_v37 = vpop.permute.xlu1 %3823  ;;  %5412 = vmatmul.mubr.msk.f32.gmra.mxu1 %vm2065_vm10, %v4374_v61 }
 0x5f5   : > { %v4311_v15 = vsel %vm1954_vm7, %v4279_v30, %v3824_v37 }
 0x5f6   : > { %v3698_v7 = vpop.permute.xlu0 %3697 }
 0x5f7   : > { %v4280_v34 = vsel %vm1921_vm6, %v4248_v3, %v3698_v7 }
 0x5f8   : > { %v3444_v31 = vpop.permute.xlu1 %3443 }
 0x5f9   : > { %v4217_v51 = vsel %vm1855_vm4, %v4185_v52, %v3444_v31  ;;  %v4158_v52 = vsel %vm366_vm0, %v2846_v14, %v8916_v39 }
 0x5fa   : > { %v3318_v23 = vpop.permute.xlu0 %3317 }
 0x5fb   : > { %v4186_v40 = vsel %vm1822_vm3, %v4154_v32, %v3318_v23 }
 0x5fc   : > { %v3952_v1 = vpop.permute.xlu1 %3951 }
 0x5fd   : > { %v4343_v48 = vsel %vm1987_vm8, %v4311_v15, %v3952_v1 }
 0x5fe   : > { %v3826_v53 = vpop.permute.xlu0 %3825 }
 0x5ff   : > { %v4312_v42 = vsel %vm1954_vm7, %v4280_v34, %v3826_v53  ;;  %v4155_v53 = vsel %vm366_vm0, %v2843_v18, %v8914_v58 }
 0x600   : > { %v3572_v25 = vpop.permute.xlu1 %3571 }
 0x601   : > { %v4249_v2 = vsel %vm1888_vm5, %v4217_v51, %v3572_v25 }
 0x602   : > { %v3446_v27 = vpop.permute.xlu0 %3445 }
 0x603   : > { %v4218_v17 = vsel %vm1855_vm4, %v4186_v40, %v3446_v27 }
 0x604   : > { %v4080_v16 = vpop.permute.xlu1 %4079 }
 0x605   : > { %v4375_v10 = vsel %vm2020_vm9, %v4343_v48, %v4080_v16 }
 0x606   : > { %5414 = vmatprep.mubr.msk.f32.mxu1 %vm2065_vm10, %v4375_v10  ;;  %v3954_v20 = vpop.permute.xlu0 %3953 }
 0x607   : > { %v4344_v59 = vsel %vm1987_vm8, %v4312_v42, %v3954_v20 }
 0x608   : > { %v3700_v63 = vpop.permute.xlu1 %3699 }
 0x609   : > { %v4281_v49 = vsel %vm1921_vm6, %v4249_v2, %v3700_v63 }
 0x60a   : > { %v3574_v60 = vpop.permute.xlu0 %3573 }
 0x60b   : > { %v4250_v19 = vsel %vm1888_vm5, %v4218_v17, %v3574_v60  ;;  %v4156_v60 = vsel %vm366_vm0, %v2844_v13, %v8915_v38 }
 0x60c   : > { %v3320_v29 = vpop.permute.xlu1 %3319 }
 0x60d   : > { %v4187_v56 = vsel %vm1822_vm3, %v4155_v53, %v3320_v29 }
 0x60e   : > { %v4082_v33 = vpop.permute.xlu0 %4081 }
 0x60f   : > { %v4376_v4 = vsel %vm2020_vm9, %v4344_v59, %v4082_v33 }
 0x610   : > { %v3828_v28 = vpop.permute.xlu1 %3827  ;;  %5415 = vmatmul.mubr.msk.f32.gmra.mxu1 %vm2065_vm10, %v4376_v4 }
 0x611   : > { %v4313_v11 = vsel %vm1954_vm7, %v4281_v49, %v3828_v28 }
 0x612   : > { %v3702_v36 = vpop.permute.xlu0 %3701 }
 0x613   : > { %v4282_v12 = vsel %vm1921_vm6, %v4250_v19, %v3702_v36 }
 0x614   : > { %v3448_v9 = vpop.permute.xlu1 %3447 }
 0x615   : > { %v4219_v8 = vsel %vm1855_vm4, %v4187_v56, %v3448_v9 }
 0x616   : > { %v3322_v21 = vpop.permute.xlu0 %3321 }
 0x617   : > { %v4188_v3 = vsel %vm1822_vm3, %v4156_v60, %v3322_v21 }
 0x618   : > { %v3956_v43 = vpop.permute.xlu1 %3955 }
 0x619   : > { %v4345_v26 = vsel %vm1987_vm8, %v4313_v11, %v3956_v43 }
 0x61a   : > { %v3830_v41 = vpop.permute.xlu0 %3829 }
 0x61b   : > { %v4314_v47 = vsel %vm1954_vm7, %v4282_v12, %v3830_v41  ;;  %v2845_v41 = vld [vmem:[#allocation2 + $0x168] sm:$0xff] }
 0x61c   : > { %v3576_v57 = vpop.permute.xlu1 %3575 }
 0x61d   : > { %v4251_v15 = vsel %vm1888_vm5, %v4219_v8, %v3576_v57  ;;  %v8917_v57 = vld [vmem:[#allocation24_spill] sm:$0xff] }
 0x61e   : > { %v3450_v0 = vpop.permute.xlu0 %3449  ;;  %v4157_v2 = vsel %vm366_vm0, %v2845_v41, %v8917_v57 }
 0x61f   : > { %v4220_v29 = vsel %vm1855_vm4, %v4188_v3, %v3450_v0 }
 0x620   : > { %v4084_v55 = vpop.permute.xlu1 %4083 }
 0x621   : > { %v4377_v62 = vsel %vm2020_vm9, %v4345_v26, %v4084_v55 }
 0x622   : > { %5417 = vmatprep.mubr.msk.f32.mxu1 %vm2065_vm10, %v4377_v62  ;;  %v3958_v50 = vpop.permute.xlu0 %3957 }
 0x623   : > { %v4346_v44 = vsel %vm1987_vm8, %v4314_v47, %v3958_v50  ;;  %v5380_v47 = vpop.f32.mrf.mxu1 }
 0x624   : > { %v3704_v24 = vpop.permute.xlu1 %3703 }
 0x625   : > { %v4283_v27 = vsel %vm1921_vm6, %v4251_v15, %v3704_v24 }
 0x626   : > { %v3578_v35 = vpop.permute.xlu0 %3577 }
 0x627   : > { %v4252_v42 = vsel %vm1888_vm5, %v4220_v29, %v3578_v35 }
 0x628   : > { %v3324_v22 = vpop.permute.xlu1 %3323 }
 0x629   : > { %v4189_v11 = vsel %vm1822_vm3, %v4157_v2, %v3324_v22 }
 0x62a   : > { %v4086_v61 = vpop.permute.xlu0 %4085 }
 0x62b   : > { %v4378_v37 = vsel %vm2020_vm9, %v4346_v44, %v4086_v61  ;;  %v4560_v44 = vpop.f32.mrf.mxu1 }
 0x62c   : > { %v3832_v7 = vpop.permute.xlu1 %3831  ;;  %5418 = vmatmul.mubr.msk.f32.gmra.mxu1 %vm2065_vm10, %v4378_v37  ;;  %v8246_v37 = vld [vmem:[%s8836_s6] ss:$0 sm:$0xff] }
 0x62d   : > { %v4315_v48 = vsel %vm1954_vm7, %v4283_v27, %v3832_v7  ;;  %v5383_v61 = vpop.f32.mrf.mxu1 }
 0x62e   : > { %v3706_v31 = vpop.permute.xlu0 %3705 }
 0x62f   : > { %v4284_v33 = vsel %vm1921_vm6, %v4252_v42, %v3706_v31  ;;  %v4570_v7 = vpop.f32.mrf.mxu1  ;;  %v8249_v31 = vadd.f32 %v8246_v37, %v4560_v44 }
 0x630   : > { %v3452_v23 = vpop.permute.xlu1 %3451 }
 0x631   : > { %v4221_v26 = vsel %vm1855_vm4, %v4189_v11, %v3452_v23  ;;  %v5386_v23 = vpop.f32.mrf.mxu1  ;;  %v4719_v18 = vsel %vm366_vm0, %v8249_v31, 0.0 }
 0x632   : > { %v3326_v1 = vpop.permute.xlu0 %3325 }
 0x633   : > { %v4190_v49 = vsel %vm1822_vm3, %v4158_v52, %v3326_v1  ;;  %v8252_v1 = vadd.f32 %v5380_v47, %v8246_v37  ;;  %v4580_v58 = vpop.f32.mrf.mxu1 }
 0x634   : > { %v3960_v45 = vpop.permute.xlu1 %3959  ;;  %v8267_v15 = vadd.f32 %v8246_v37, %v4580_v58 }
 0x635   : > { %v4347_v10 = vsel %vm1987_vm8, %v4315_v48, %v3960_v45  ;;  %v8255_v45 = vadd.f32 %v8246_v37, %v4570_v7  ;;  %v4720_v53 = vsel %vm366_vm0, %v8252_v1, 0.0  ;;  %v5389_v8 = vpop.f32.mrf.mxu1 }
 0x636   : > { %v3834_v25 = vpop.permute.xlu0 %3833  ;;  %v8284_v42 = vadd.f32 %v5389_v8, %v8246_v37 }
 0x637   : > { %v4316_v4 = vsel %vm1954_vm7, %v4284_v33, %v3834_v25  ;;  %v4722_v56 = vsel %vm366_vm0, %v8255_v45, 0.0  ;;  %v4721_v25 = vadd.f32 %v4720_v53, %v4719_v18  ;;  %v4590_v48 = vpop.f32.mrf.mxu1 }
 0x638   : > { %v3580_v30 = vpop.permute.xlu1 %3579  ;;  %v8277_v13 = vadd.f32 %v8246_v37, %v4590_v48 }
 0x639   : > { %v4253_v50 = vsel %vm1888_vm5, %v4221_v26, %v3580_v30  ;;  %v8264_v30 = vadd.f32 %v5383_v61, %v8246_v37  ;;  %v4723_v27 = vadd.f32 %v4722_v56, %v4721_v25 }
 0x63a   : > { %v3454_v16 = vpop.permute.xlu0 %3453  ;;  %v4730_v3 = vsel %vm366_vm0, %v8277_v13, 0.0 }
 0x63b   : > { %v4222_v0 = vsel %vm1855_vm4, %v4190_v49, %v3454_v16  ;;  %v4724_v16 = vsel %vm366_vm0, %v8264_v30, 0.0 }
 0x63c   : > { %v4088_v20 = vpop.permute.xlu1 %4087 }
 0x63d   : > { %v4379_v63 = vsel %vm2020_vm9, %v4347_v10, %v4088_v20  ;;  %v4726_v10 = vsel %vm366_vm0, %v8267_v15, 0.0  ;;  %v4725_v20 = vadd.f32 %v4724_v16, %v4723_v27 }
 0x63e   : > { %5420 = vmatprep.mubr.msk.f32.mxu1 %vm2065_vm10, %v4379_v63  ;;  %v3962_v54 = vpop.permute.xlu0 %3961  ;;  %v5392_v63 = vpop.f32.mrf.mxu1 }
 0x63f   : > { %v4348_v28 = vsel %vm1987_vm8, %v4316_v4, %v3962_v54  ;;  %v8274_v54 = vadd.f32 %v5386_v23, %v8246_v37  ;;  %v8294_v14 = vadd.f32 %v5392_v63, %v8246_v37 }
 0x640   : > { %v3708_v5 = vpop.permute.xlu1 %3707  ;;  %v4600_v38 = vpop.f32.mrf.mxu1 }
 0x641   : > { %v4285_v6 = vsel %vm1921_vm6, %v4253_v50, %v3708_v5  ;;  %v4727_v5 = vadd.f32 %v4726_v10, %v4725_v20  ;;  %v4728_v60 = vsel %vm366_vm0, %v8274_v54, 0.0  ;;  %v4736_v41 = vsel %vm366_vm0, %v8294_v14, 0.0 }
 0x642   : > { %v3582_v34 = vpop.permute.xlu0 %3581 }
 0x643   : > { %v4254_v55 = vsel %vm1888_vm5, %v4222_v0, %v3582_v34  ;;  %v4729_v29 = vadd.f32 %v4728_v60, %v4727_v5  ;;  %v5395_v34 = vpop.f32.mrf.mxu1 }
 0x644   : > { %v3710_v59 = vpop.permute.xlu1 %3709  ;;  %v8304_v49 = vadd.f32 %v5395_v34, %v8246_v37 }
 0x645   : > { %v4286_v46 = vsel %vm1921_vm6, %v4254_v55, %v3710_v59  ;;  %v8287_v59 = vadd.f32 %v8246_v37, %v4600_v38  ;;  %v4731_v33 = vadd.f32 %v4730_v3, %v4729_v29  ;;  %v4610_v4 = vpop.f32.mrf.mxu1 }
 0x646   : > { %v4090_v36 = vpop.permute.xlu0 %4089  ;;  %v4740_v55 = vsel %vm366_vm0, %v8304_v49, 0.0 }
 0x647   : > { %v4380_v9 = vsel %vm2020_vm9, %v4348_v28, %v4090_v36  ;;  %v4732_v28 = vsel %vm366_vm0, %v8284_v42, 0.0  ;;  %v4734_v36 = vsel %vm366_vm0, %v8287_v59, 0.0 }
 0x648   : > { %v3838_v43 = vpop.permute.xlu1 %3837  ;;  %5421 = vmatmul.mubr.msk.f32.gmra.mxu1 %vm2065_vm10, %v4380_v9  ;;  %v4733_v9 = vadd.f32 %v4732_v28, %v4731_v33 }
 0x649   : > { %v4318_v32 = vsel %vm1954_vm7, %v4286_v46, %v3838_v43  ;;  %v5398_v43 = vpop.f32.mrf.mxu1 }
 0x64a   : > { %v3836_v21 = vpop.permute.xlu0 %3835  ;;  %v4735_v39 = vadd.f32 %v4734_v36, %v4733_v9 }
 0x64b   : > { %v4317_v40 = vsel %vm1954_vm7, %v4285_v6, %v3836_v21  ;;  %v8297_v21 = vadd.f32 %v8246_v37, %v4610_v4  ;;  %v4620_v52 = vpop.f32.mrf.mxu1 }
 0x64c   : > { %v3966_v51 = vpop.permute.xlu1 %3965  ;;  %v4737_v57 = vadd.f32 %v4736_v41, %v4735_v39  ;;  %v8307_v11 = vadd.f32 %v8246_v37, %v4620_v52 }
 0x64d   : > { %v4350_v17 = vsel %vm1987_vm8, %v4318_v32, %v3966_v51  ;;  %v4738_v51 = vsel %vm366_vm0, %v8297_v21, 0.0  ;;  %v5401_v2 = vpop.f32.mrf.mxu1 }
 0x64e   : > { %v3964_v62 = vpop.permute.xlu0 %3963  ;;  %v4739_v0 = vadd.f32 %v4738_v51, %v4737_v57 }
 0x64f   : > { %v4349_v35 = vsel %vm1987_vm8, %v4317_v40, %v3964_v62  ;;  %v4630_v26 = vpop.f32.mrf.mxu1  ;;  %v4742_v62 = vsel %vm366_vm0, %v8307_v11, 0.0 }
 0x650   : > { %v4094_v24 = vpop.permute.xlu1 %4093  ;;  %v4741_v50 = vadd.f32 %v4740_v55, %v4739_v0  ;;  %v8317_v6 = vadd.f32 %v8246_v37, %v4630_v26 }
 0x651   : > { %v4382_v19 = vsel %vm2020_vm9, %v4350_v17, %v4094_v24  ;;  %v8314_v24 = vadd.f32 %v5398_v43, %v8246_v37 }
 0x652   : > { %v4092_v22 = vpop.permute.xlu0 %4091  ;;  %v4743_v32 = vadd.f32 %v4742_v62, %v4741_v50 }
 0x653   : > { %v4381_v12 = vsel %vm2020_vm9, %v4349_v35, %v4092_v22  ;;  %v4744_v17 = vsel %vm366_vm0, %v8314_v24, 0.0  ;;  %v4746_v35 = vsel %vm366_vm0, %v8317_v6, 0.0 }
 0x654   : > { %5423 = vmatprep.mubr.msk.f32.mxu1 %vm2065_vm10, %v4381_v12  ;;  %v8324_v12 = vadd.f32 %v5401_v2, %v8246_v37 }
 0x655   : > { %5424 = vmatmul.mubr.msk.f32.gmra.mxu1 %vm2065_vm10, %v4382_v19  ;;  %v4745_v19 = vadd.f32 %v4744_v17, %v4743_v32 }
 0x656   : > { %v4748_v7 = vsel %vm366_vm0, %v8324_v12, 0.0 }
 0x657   : > { %v4747_v44 = vadd.f32 %v4746_v35, %v4745_v19 }
 0x659   : > { %v4749_v18 = vadd.f32 %v4748_v7, %v4747_v44 }
 0x660   : > { %v5404_v46 = vpop.f32.mrf.mxu1 }
 0x661   : > { %v8334_v53 = vadd.f32 %v5404_v46, %v8246_v37 }
 0x662   : > { %v4640_v40 = vpop.f32.mrf.mxu1 }
 0x663   : > { %v8327_v47 = vadd.f32 %v8246_v37, %v4640_v40  ;;  %v4752_v27 = vsel %vm366_vm0, %v8334_v53, 0.0 }
 0x665   : > { %v4750_v23 = vsel %vm366_vm0, %v8327_v47, 0.0 }
 0x666   : > { %v4751_v25 = vadd.f32 %v4750_v23, %v4749_v18 }
 0x668   : > { %v4753_v16 = vadd.f32 %v4752_v27, %v4751_v25 }
 0x67c   : > { %v5407_v22 = vpop.f32.mrf.mxu1 }
 0x67d   : > { %v8344_v20 = vadd.f32 %v5407_v22, %v8246_v37 }
 0x67e   : > { %v4650_v61 = vpop.f32.mrf.mxu1 }
 0x67f   : > { %v8337_v56 = vadd.f32 %v8246_v37, %v4650_v61  ;;  %v4756_v60 = vsel %vm366_vm0, %v8344_v20, 0.0 }
 0x681   : > { %v4754_v48 = vsel %vm366_vm0, %v8337_v56, 0.0 }
 0x682   : > { %v4755_v5 = vadd.f32 %v4754_v48, %v4753_v16 }
 0x684   : > { %v4757_v29 = vadd.f32 %v4756_v60, %v4755_v5 }
 0x698   : > { %v5410_v58 = vpop.f32.mrf.mxu1 }
 0x699   : > { %v8354_v33 = vadd.f32 %v5410_v58, %v8246_v37 }
 0x69a   : > { %v4660_v8 = vpop.f32.mrf.mxu1 }
 0x69b   : > { %v8347_v63 = vadd.f32 %v8246_v37, %v4660_v8  ;;  %v4760_v9 = vsel %vm366_vm0, %v8354_v33, 0.0 }
 0x69d   : > { %v4758_v3 = vsel %vm366_vm0, %v8347_v63, 0.0 }
 0x69e   : > { %v4759_v28 = vadd.f32 %v4758_v3, %v4757_v29 }
 0x6a0   : > { %v4761_v39 = vadd.f32 %v4760_v9, %v4759_v28 }
 0x6b4   : > { %v5413_v10 = vpop.f32.mrf.mxu1 }
 0x6b5   : > { %v8364_v41 = vadd.f32 %v5413_v10, %v8246_v37 }
 0x6b6   : > { %v4670_v38 = vpop.f32.mrf.mxu1 }
 0x6b7   : > { %v8357_v4 = vadd.f32 %v8246_v37, %v4670_v38  ;;  %v4764_v0 = vsel %vm366_vm0, %v8364_v41, 0.0 }
 0x6b9   : > { %v4762_v43 = vsel %vm366_vm0, %v8357_v4, 0.0 }
 0x6ba   : > { %v4763_v57 = vadd.f32 %v4762_v43, %v4761_v39 }
 0x6bc   : > { %v4765_v55 = vadd.f32 %v4764_v0, %v4763_v57 }
 0x6d0   : > { %v5416_v34 = vpop.f32.mrf.mxu1 }
 0x6d1   : > { %v8374_v62 = vadd.f32 %v5416_v34, %v8246_v37 }
 0x6d2   : > { %v4680_v36 = vpop.f32.mrf.mxu1 }
 0x6d3   : > { %v8367_v51 = vadd.f32 %v8246_v37, %v4680_v36  ;;  %v4768_v17 = vsel %vm366_vm0, %v8374_v62, 0.0 }
 0x6d5   : > { %v4766_v26 = vsel %vm366_vm0, %v8367_v51, 0.0 }
 0x6d6   : > { %v4767_v32 = vadd.f32 %v4766_v26, %v4765_v55 }
 0x6d8   : > { %v4769_v19 = vadd.f32 %v4768_v17, %v4767_v32 }
 0x6ec   : > { %v5419_v52 = vpop.f32.mrf.mxu1 }
 0x6ed   : > { %v8384_v22 = vadd.f32 %v5419_v52, %v8246_v37 }
 0x6ee   : > { %v4690_v2 = vpop.f32.mrf.mxu1 }
 0x6ef   : > { %v8377_v50 = vadd.f32 %v8246_v37, %v4690_v2  ;;  %v4772_v7 = vsel %vm366_vm0, %v8384_v22, 0.0 }
 0x6f1   : > { %v4770_v35 = vsel %vm366_vm0, %v8377_v50, 0.0 }
 0x6f2   : > { %v4771_v61 = vadd.f32 %v4770_v35, %v4769_v19 }
 0x6f4   : > { %v4773_v18 = vadd.f32 %v4772_v7, %v4771_v61 }
 0x708   : > { %v5422_v46 = vpop.f32.mrf.mxu1 }
 0x709   : > { %v8394_v58 = vadd.f32 %v5422_v46, %v8246_v37 }
 0x70a   : > { %v4700_v40 = vpop.f32.mrf.mxu1 }
 0x70b   : > { %v8387_v44 = vadd.f32 %v8246_v37, %v4700_v40  ;;  %v4776_v48 = vsel %vm366_vm0, %v8394_v58, 0.0 }
 0x70d   : > { %v4774_v23 = vsel %vm366_vm0, %v8387_v44, 0.0 }
 0x70e   : > { %v4775_v25 = vadd.f32 %v4774_v23, %v4773_v18 }
 0x710   : > { %v4777_v5 = vadd.f32 %v4776_v48, %v4775_v25 }
 0x715   : > { %v5425_v8 = vpop.f32.mrf.mxu1 }
 0x716   : > { %v8399_v16 = vadd.f32 %v5425_v8, %v8246_v37 }
 0x717   : > { %v4710_v27 = vpop.f32.mrf.mxu1 }
 0x718   : > { %v8402_v10 = vadd.f32 %v8246_v37, %v4710_v27  ;;  %v4780_v3 = vsel %vm366_vm0, %v8399_v16, 0.0 }
 0x71a   : > { %v4778_v38 = vsel %vm366_vm0, %v8402_v10, 0.0 }
 0x71b   : > { %v4779_v60 = vadd.f32 %v4778_v38, %v4777_v5 }
 0x71d   : > { %v4781_v29 = vadd.f32 %v4780_v3, %v4779_v60 }
 0x71f   : > { %v4782_v34 = vrot.slane %v4781_v29, 4 }
 0x721   : > { %v4783_v28 = vadd.f32 %v4782_v34, %v4781_v29 }
 0x723   : > { %v4784_v36 = vrot.slane %v4783_v28, 2 }
 0x725   : > { %v4785_v9 = vadd.f32 %v4784_v36, %v4783_v28 }
 0x727   : > { %v4786_v43 = vrot.slane %v4785_v9, 1 }
 0x729   : > { %v4787_v39 = vadd.f32 %v4786_v43, %v4785_v9 }
 0x72b   : > { %v8408_v52 = vmul.f32 0.00390625, %v4787_v39 }
 0x72d   : > { %v8412_v37 = vsub.f32 %v8249_v31, %v8408_v52  ;;  %v8416_v57 = vsub.f32 %v8252_v1, %v8408_v52  ;;  %v8420_v2 = vsub.f32 %v8255_v45, %v8408_v52  ;;  %v8424_v0 = vsub.f32 %v8264_v30, %v8408_v52 }
 0x72e   : > { %v8432_v31 = vsub.f32 %v8267_v15, %v8408_v52  ;;  %v8438_v45 = vsub.f32 %v8274_v54, %v8408_v52  ;;  %v8446_v17 = vsub.f32 %v8277_v13, %v8408_v52  ;;  %v8453_v54 = vsub.f32 %v8284_v42, %v8408_v52 }
 0x72f   : > { %v4821_v26 = vmul.f32 %v8412_v37, %v8412_v37  ;;  %v4822_v55 = vmul.f32 %v8416_v57, %v8416_v57  ;;  %v4823_v1 = vmul.f32 %v8420_v2, %v8420_v2  ;;  %v4824_v30 = vmul.f32 %v8424_v0, %v8424_v0 }
 0x730   : > { %v4825_v15 = vmul.f32 %v8432_v31, %v8432_v31  ;;  %v4826_v61 = vmul.f32 %v8438_v45, %v8438_v45  ;;  %v8460_v13 = vsub.f32 %v8287_v59, %v8408_v52  ;;  %v4827_v18 = vmul.f32 %v8446_v17, %v8446_v17 }
 0x731   : > { %v4853_v46 = vsel %vm366_vm0, %v4821_v26, 0.0  ;;  %v4854_v32 = vsel %vm366_vm0, %v4822_v55, 0.0  ;;  %v4856_v35 = vsel %vm366_vm0, %v4823_v1, 0.0  ;;  %v4858_v7 = vsel %vm366_vm0, %v4824_v30, 0.0 }
 0x732   : > { %v4855_v40 = vadd.f32 %v4854_v32, %v4853_v46  ;;  %v4860_v25 = vsel %vm366_vm0, %v4825_v15, 0.0  ;;  %v8467_v42 = vsub.f32 %v8294_v14, %v8408_v52  ;;  %v4828_v27 = vmul.f32 %v8453_v54, %v8453_v54 }
 0x733   : > { %v4862_v48 = vsel %vm366_vm0, %v4826_v61, 0.0  ;;  %v8474_v59 = vsub.f32 %v8297_v21, %v8408_v52  ;;  %v4829_v38 = vmul.f32 %v8460_v13, %v8460_v13  ;;  %v4864_v60 = vsel %vm366_vm0, %v4827_v18, 0.0 }
 0x734   : > { %v4857_v19 = vadd.f32 %v4856_v35, %v4855_v40  ;;  %v8481_v14 = vsub.f32 %v8304_v49, %v8408_v52  ;;  %v4830_v29 = vmul.f32 %v8467_v42, %v8467_v42  ;;  %v4866_v34 = vsel %vm366_vm0, %v4828_v27, 0.0 }
 0x735   : > { %v8488_v21 = vsub.f32 %v8307_v11, %v8408_v52  ;;  %v4831_v36 = vmul.f32 %v8474_v59, %v8474_v59  ;;  %v4868_v9 = vsel %vm366_vm0, %v4829_v38, 0.0  ;;  %v8495_v49 = vsub.f32 %v8314_v24, %v8408_v52 }
 0x736   : > { %v4859_v23 = vadd.f32 %v4858_v7, %v4857_v19  ;;  %v4832_v39 = vmul.f32 %v8481_v14, %v8481_v14  ;;  %v4870_v26 = vsel %vm366_vm0, %v4830_v29, 0.0  ;;  %v8502_v11 = vsub.f32 %v8317_v6, %v8408_v52 }
 0x737   : > { %v4833_v1 = vmul.f32 %v8488_v21, %v8488_v21  ;;  %v4872_v30 = vsel %vm366_vm0, %v4831_v36, 0.0  ;;  %v8509_v24 = vsub.f32 %v8324_v12, %v8408_v52  ;;  %v4834_v32 = vmul.f32 %v8495_v49, %v8495_v49 }
 0x738   : > { %v4861_v8 = vadd.f32 %v4860_v25, %v4859_v23  ;;  %v4874_v40 = vsel %vm366_vm0, %v4832_v39, 0.0  ;;  %v8516_v6 = vsub.f32 %v8327_v47, %v8408_v52  ;;  %v4835_v35 = vmul.f32 %v8502_v11, %v8502_v11 }
 0x739   : > { %v4876_v19 = vsel %vm366_vm0, %v4833_v1, 0.0  ;;  %v8523_v12 = vsub.f32 %v8334_v53, %v8408_v52  ;;  %v4836_v7 = vmul.f32 %v8509_v24, %v8509_v24  ;;  %v4878_v23 = vsel %vm366_vm0, %v4834_v32, 0.0 }
 0x73a   : > { %v4863_v5 = vadd.f32 %v4862_v48, %v4861_v8  ;;  %v8530_v47 = vsub.f32 %v8337_v56, %v8408_v52  ;;  %v4837_v25 = vmul.f32 %v8516_v6, %v8516_v6  ;;  %v4880_v8 = vsel %vm366_vm0, %v4835_v35, 0.0 }
 0x73b   : > { %v8537_v53 = vsub.f32 %v8344_v20, %v8408_v52  ;;  %v4838_v48 = vmul.f32 %v8523_v12, %v8523_v12  ;;  %v8544_v56 = vsub.f32 %v8347_v63, %v8408_v52  ;;  %v8551_v20 = vsub.f32 %v8354_v33, %v8408_v52 }
 0x73c   : > { %v4865_v3 = vadd.f32 %v4864_v60, %v4863_v5  ;;  %v4882_v5 = vsel %vm366_vm0, %v4836_v7, 0.0  ;;  %v4839_v60 = vmul.f32 %v8530_v47, %v8530_v47  ;;  %v8558_v63 = vsub.f32 %v8357_v4, %v8408_v52 }
 0x73d   : > { %v8565_v33 = vsub.f32 %v8364_v41, %v8408_v52  ;;  %v8572_v4 = vsub.f32 %v8367_v51, %v8408_v52  ;;  %v8579_v41 = vsub.f32 %v8374_v62, %v8408_v52  ;;  %v8586_v51 = vsub.f32 %v8377_v50, %v8408_v52 }
 0x73e   : > { %v4867_v28 = vadd.f32 %v4866_v34, %v4865_v3  ;;  %v4884_v3 = vsel %vm366_vm0, %v4837_v25, 0.0  ;;  %v4840_v34 = vmul.f32 %v8537_v53, %v8537_v53  ;;  %v8593_v62 = vsub.f32 %v8384_v22, %v8408_v52 }
 0x73f   : > { %v8600_v50 = vsub.f32 %v8387_v44, %v8408_v52  ;;  %v8607_v22 = vsub.f32 %v8394_v58, %v8408_v52  ;;  %v4819_v44 = vsub.f32 %v8402_v10, %v8408_v52 }
 0x740   : > { %v4869_v43 = vadd.f32 %v4868_v9, %v4867_v28  ;;  %v4886_v28 = vsel %vm366_vm0, %v4838_v48, 0.0  ;;  %v4841_v9 = vmul.f32 %v8544_v56, %v8544_v56 }
 0x741   : > { %v4850_v58 = vmul.f32 %v8607_v22, %v8607_v22 }
 0x742   : > { %v4871_v55 = vadd.f32 %v4870_v26, %v4869_v43  ;;  %v4888_v43 = vsel %vm366_vm0, %v4839_v60, 0.0  ;;  %v4842_v26 = vmul.f32 %v8551_v20, %v8551_v20 }
 0x744   : > { %v4873_v46 = vadd.f32 %v4872_v30, %v4871_v55  ;;  %v4890_v55 = vsel %vm366_vm0, %v4840_v34, 0.0  ;;  %v4843_v30 = vmul.f32 %v8558_v63, %v8558_v63 }
 0x746   : > { %v4875_v15 = vadd.f32 %v4874_v40, %v4873_v46  ;;  %v4892_v46 = vsel %vm366_vm0, %v4841_v9, 0.0  ;;  %v4844_v40 = vmul.f32 %v8565_v33, %v8565_v33 }
 0x748   : > { %v4877_v61 = vadd.f32 %v4876_v19, %v4875_v15  ;;  %v4894_v15 = vsel %vm366_vm0, %v4842_v26, 0.0  ;;  %v4845_v19 = vmul.f32 %v8572_v4, %v8572_v4 }
 0x74a   : > { %v4879_v18 = vadd.f32 %v4878_v23, %v4877_v61  ;;  %v4896_v61 = vsel %vm366_vm0, %v4843_v30, 0.0  ;;  %v4846_v23 = vmul.f32 %v8579_v41, %v8579_v41 }
 0x74c   : > { %v4881_v27 = vadd.f32 %v4880_v8, %v4879_v18  ;;  %v4898_v18 = vsel %vm366_vm0, %v4844_v40, 0.0  ;;  %v4847_v8 = vmul.f32 %v8586_v51, %v8586_v51 }
 0x74e   : > { %v4883_v38 = vadd.f32 %v4882_v5, %v4881_v27  ;;  %v4900_v27 = vsel %vm366_vm0, %v4845_v19, 0.0  ;;  %v4848_v5 = vmul.f32 %v8593_v62, %v8593_v62 }
 0x750   : > { %v4885_v29 = vadd.f32 %v4884_v3, %v4883_v38  ;;  %v4902_v38 = vsel %vm366_vm0, %v4846_v23, 0.0  ;;  %v4849_v3 = vmul.f32 %v8600_v50, %v8600_v50 }
 0x752   : > { %v4887_v36 = vadd.f32 %v4886_v28, %v4885_v29  ;;  %v4904_v29 = vsel %vm366_vm0, %v4847_v8, 0.0  ;;  %v4820_v28 = vsub.f32 %v8399_v16, %v8408_v52 }
 0x754   : > { %v4889_v39 = vadd.f32 %v4888_v43, %v4887_v36  ;;  %v4906_v36 = vsel %vm366_vm0, %v4848_v5, 0.0  ;;  %v4851_v43 = vmul.f32 %v4819_v44, %v4819_v44  ;;  %v4852_v10 = vmul.f32 %v4820_v28, %v4820_v28 }
 0x756   : > { %v4891_v1 = vadd.f32 %v4890_v55, %v4889_v39  ;;  %v4908_v39 = vsel %vm366_vm0, %v4849_v3, 0.0  ;;  %v4910_v55 = vsel %vm366_vm0, %v4850_v58, 0.0  ;;  %v4912_v30 = vsel %vm366_vm0, %v4851_v43, 0.0 }
 0x758   : > { %v4893_v32 = vadd.f32 %v4892_v46, %v4891_v1 }
 0x75a   : > { %v4895_v35 = vadd.f32 %v4894_v15, %v4893_v32  ;;  %v4914_v32 = vsel %vm366_vm0, %v4852_v10, 0.0 }
 0x75c   : > { %v4897_v7 = vadd.f32 %v4896_v61, %v4895_v35 }
 0x75e   : > { %v4899_v25 = vadd.f32 %v4898_v18, %v4897_v7  ;;  %v4925_v18 = vld [vmem:[%s8837_s7] sm:$0x1] }
 0x760   : > { %v4901_v48 = vadd.f32 %v4900_v27, %v4899_v25  ;;  %v8918_v27 = vld [vmem:[#allocation3_spill] sm:$0xff] }
 0x762   : > { %v4903_v60 = vadd.f32 %v4902_v38, %v4901_v48  ;;  %v8919_v48 = vsub.s32 0, %v8918_v27 }
 0x764   : > { %v4905_v34 = vadd.f32 %v4904_v29, %v4903_v60 }
 0x766   : > { %v4907_v9 = vadd.f32 %v4906_v36, %v4905_v34 }
 0x768   : > { %v4909_v26 = vadd.f32 %v4908_v39, %v4907_v9 }
 0x76a   : > { %v4911_v1 = vadd.f32 %v4910_v55, %v4909_v26 }
 0x76c   : > { %v4913_v46 = vadd.f32 %v4912_v30, %v4911_v1 }
 0x76e   : > { %v4915_v16 = vadd.f32 %v4914_v32, %v4913_v46 }
 0x770   : > { %v4916_v52 = vrot.slane %v4915_v16, 4 }
 0x772   : > { %v4917_v40 = vadd.f32 %v4916_v52, %v4915_v16  ;;  %v5002_v16 = vld [vmem:[%s5528_s14] sm:$0xff]  ;;  %v5003_v52 = vld [vmem:[%s5528_s14 + $0x8] sm:$0xff] }
 0x774   : > { %v4918_v15 = vrot.slane %v4917_v40, 2 }
 0x776   : > { %v4919_v35 = vadd.f32 %v4918_v15, %v4917_v40  ;;  %v5004_v40 = vld [vmem:[%s5528_s14 + $0x10] sm:$0xff]  ;;  %v5005_v15 = vld [vmem:[%s5528_s14 + $0x18] sm:$0xff] }
 0x778   : > { %v4920_v19 = vrot.slane %v4919_v35, 1 }
 0x77a   : > { %v4921_v61 = vadd.f32 %v4920_v19, %v4919_v35 }
 0x77c   : > { %v4922_v7 = vmul.f32 0.00390625, %v4921_v61 }
 0x77e   : > { %v4923_v23 = vadd.f32 1e-05, %v4922_v7 }
 0x780   : > { %5444 = vrsqrt.f32 %v4923_v23  ;;  %v5006_v23 = vld [vmem:[%s5528_s14 + $0x20] sm:$0xff] }
 0x78d   : > { %v5445_v25 = vpop.eup %5444 }
 0x78e   : > { %v4926_v8 = vmul.f32 %v5445_v25, %v4925_v18  ;;  %v5007_v18 = vld [vmem:[%s5528_s14 + $0x28] sm:$0xff]  ;;  %v5008_v25 = vld [vmem:[%s5528_s14 + $0x30] sm:$0xff] }
 0x790   : > { %v4930_v5 = vrot.slane %v4926_v8, %v8919_v48  ;;  %v5009_v8 = vld [vmem:[%s5528_s14 + $0x38] sm:$0xff] }
 0x792   : > { %v4931_v38 = vmul.f32 %v4930_v5, %v8412_v37  ;;  %v4932_v60 = vmul.f32 %v4930_v5, %v8416_v57  ;;  %v4933_v3 = vmul.f32 %v4930_v5, %v8420_v2  ;;  %v4934_v29 = vmul.f32 %v4930_v5, %v8424_v0 }
 0x793   : > { %v4935_v34 = vmul.f32 %v4930_v5, %v8432_v31  ;;  %v4936_v58 = vmul.f32 %v4930_v5, %v8438_v45  ;;  %v4937_v36 = vmul.f32 %v4930_v5, %v8446_v17  ;;  %v4938_v9 = vmul.f32 %v4930_v5, %v8453_v54 }
 0x794   : > { %v4939_v43 = vmul.f32 %v4930_v5, %v8460_v13  ;;  %v4940_v39 = vmul.f32 %v4930_v5, %v8467_v42  ;;  %v4941_v37 = vmul.f32 %v4930_v5, %v8474_v59  ;;  %v4942_v57 = vmul.f32 %v4930_v5, %v8481_v14 }
 0x795   : > { %v4943_v2 = vmul.f32 %v4930_v5, %v8488_v21  ;;  %v4944_v0 = vmul.f32 %v4930_v5, %v8495_v49  ;;  %v4945_v31 = vmul.f32 %v4930_v5, %v8502_v11  ;;  %v4946_v45 = vmul.f32 %v4930_v5, %v8509_v24  ;;  %v5231_v11 = vld [vmem:[%s8838_s8] ss:$0 sm:$0xff] }
 0x796   : > { %v4947_v17 = vmul.f32 %v4930_v5, %v8516_v6  ;;  %v4948_v54 = vmul.f32 %v4930_v5, %v8523_v12  ;;  %v4949_v13 = vmul.f32 %v4930_v5, %v8530_v47  ;;  %v4950_v42 = vmul.f32 %v4930_v5, %v8537_v53 }
 0x797   : > { %v4951_v59 = vmul.f32 %v4930_v5, %v8544_v56  ;;  %v4952_v14 = vmul.f32 %v4930_v5, %v8551_v20  ;;  %v4953_v21 = vmul.f32 %v4930_v5, %v8558_v63  ;;  %v4954_v49 = vmul.f32 %v4930_v5, %v8565_v33 }
 0x798   : > { %v4955_v24 = vmul.f32 %v4930_v5, %v8572_v4  ;;  %v4956_v6 = vmul.f32 %v4930_v5, %v8579_v41  ;;  %v4957_v12 = vmul.f32 %v4930_v5, %v8586_v51  ;;  %v4958_v47 = vmul.f32 %v4930_v5, %v8593_v62 }
 0x799   : > { %v4959_v53 = vmul.f32 %v4930_v5, %v8600_v50  ;;  %v4960_v56 = vmul.f32 %v4930_v5, %v8607_v22  ;;  %v4961_v20 = vmul.f32 %v4930_v5, %v4819_v44  ;;  %v4962_v63 = vmul.f32 %v4930_v5, %v4820_v28 }
 0x79a   : > { %v4970_v26 = vadd.f32 %v5231_v11, %v4931_v38  ;;  %v4971_v33 = vadd.f32 %v5231_v11, %v4932_v60  ;;  %v4972_v10 = vadd.f32 %v5231_v11, %v4933_v3  ;;  %v4973_v55 = vadd.f32 %v5231_v11, %v4934_v29  ;;  %v5010_v60 = vld [vmem:[%s5528_s14 + $0x40] sm:$0xff]  ;;  %v5011_v3 = vld [vmem:[%s5528_s14 + $0x48] sm:$0xff]  ;;  %v5012_v29 = vld [vmem:[%s5528_s14 + $0x50] sm:$0xff] }
 0x79b   : > { %v4974_v4 = vadd.f32 %v5231_v11, %v4935_v34  ;;  %v4975_v41 = vadd.f32 %v5231_v11, %v4936_v58  ;;  %v4976_v1 = vadd.f32 %v5231_v11, %v4937_v36  ;;  %v4977_v51 = vadd.f32 %v5231_v11, %v4938_v9 }
 0x79c   : > { %v4978_v30 = vadd.f32 %v5231_v11, %v4939_v43  ;;  %v4979_v62 = vadd.f32 %v5231_v11, %v4940_v39  ;;  %v4980_v50 = vadd.f32 %v5231_v11, %v4941_v37  ;;  %v4981_v22 = vadd.f32 %v5231_v11, %v4942_v57  ;;  %v5013_v43 = vld [vmem:[%s5528_s14 + $0x58] sm:$0xff]  ;;  %v5014_v39 = vld [vmem:[%s5528_s14 + $0x60] sm:$0xff]  ;;  %v5015_v37 = vld [vmem:[%s5528_s14 + $0x68] sm:$0xff] }
 0x79d   : > { %v8664_v44 = vadd.f32 %v5231_v11, %v4943_v2  ;;  %v8666_v28 = vadd.f32 %v5231_v11, %v4944_v0  ;;  %v8668_v46 = vadd.f32 %v5231_v11, %v4945_v31  ;;  %v8670_v32 = vadd.f32 %v5231_v11, %v4946_v45  ;;  %v5016_v45 = vld [vmem:[%s5528_s14 + $0x70] sm:$0xff] }
 0x79e   : > { %v8676_v35 = vadd.f32 %v5231_v11, %v4947_v17  ;;  %v8678_v19 = vadd.f32 %v5231_v11, %v4948_v54  ;;  %v8680_v61 = vadd.f32 %v5231_v11, %v4949_v13  ;;  %v8682_v7 = vadd.f32 %v5231_v11, %v4950_v42  ;;  %v5017_v17 = vld [vmem:[%s5528_s14 + $0x78] sm:$0xff]  ;;  %v5018_v54 = vld [vmem:[%s5528_s14 + $0x80] sm:$0xff]  ;;  %v5019_v13 = vld [vmem:[%s5528_s14 + $0x88] sm:$0xff] }
 0x79f   : > { %v8688_v27 = vadd.f32 %v5231_v11, %v4951_v59  ;;  %v8690_v48 = vadd.f32 %v5231_v11, %v4952_v14  ;;  %v8692_v5 = vadd.f32 %v5231_v11, %v4953_v21  ;;  %v8694_v38 = vadd.f32 %v5231_v11, %v4954_v49  ;;  %v5020_v42 = vld [vmem:[%s5528_s14 + $0x90] sm:$0xff]  ;;  %v5021_v59 = vld [vmem:[%s5528_s14 + $0x98] sm:$0xff] }
 0x7a0   : > { %v8699_v34 = vadd.f32 %v5231_v11, %v4955_v24  ;;  %v8701_v58 = vadd.f32 %v5231_v11, %v4956_v6  ;;  %v8703_v36 = vadd.f32 %v5231_v11, %v4957_v12  ;;  %v8705_v9 = vadd.f32 %v5231_v11, %v4958_v47  ;;  %v5022_v6 = vld [vmem:[%s5528_s14 + $0xa0] sm:$0xff]  ;;  %v5023_v12 = vld [vmem:[%s5528_s14 + $0xa8] sm:$0xff] }
 0x7a1   : > { %v8717_v57 = vadd.f32 %v5231_v11, %v4959_v53  ;;  %v8719_v2 = vadd.f32 %v5231_v11, %v4960_v56  ;;  %v8721_v0 = vadd.f32 %v5231_v11, %v4961_v20  ;;  %v8723_v31 = vadd.f32 %v5231_v11, %v4962_v63  ;;  %v5024_v11 = vld [vmem:[%s5528_s14 + $0xb0] sm:$0xff]  ;;  %v5025_v63 = vld [vmem:[%s5528_s14 + $0xb8] sm:$0xff] }
 0x7a2   : > { %v5034_v14 = vadd.f32 %v5002_v16, %v4970_v26  ;;  %v5035_v21 = vadd.f32 %v5003_v52, %v4971_v33  ;;  %v5036_v49 = vadd.f32 %v5004_v40, %v4972_v10  ;;  %v5037_v24 = vadd.f32 %v5005_v15, %v4973_v55  ;;  %v5027_v26 = vld [vmem:[%s5528_s14 + $0xc8] sm:$0xff] }
 0x7a3   : > { %8920 = vst [vmem:[#allocation7_spill] sm:$0xff] %v8723_v31  ;;  %v5038_v47 = vadd.f32 %v5006_v23, %v4974_v4  ;;  %v5039_v53 = vadd.f32 %v5007_v18, %v4975_v41  ;;  %v5040_v56 = vadd.f32 %v5008_v25, %v4976_v1  ;;  %v5041_v20 = vadd.f32 %v5009_v8, %v4977_v51  ;;  %v5026_v31 = vld [vmem:[%s5528_s14 + $0xc0] sm:$0xff]  ;;  %v5028_v4 = vld [vmem:[%s5528_s14 + $0xd0] sm:$0xff]  ;;  %v5029_v41 = vld [vmem:[%s5528_s14 + $0xd8] sm:$0xff] }
 0x7a4   : > { %v5042_v33 = vadd.f32 %v5010_v60, %v4978_v30  ;;  %v5043_v10 = vadd.f32 %v5011_v3, %v4979_v62  ;;  %v5044_v55 = vadd.f32 %v5012_v29, %v4980_v50  ;;  %v5045_v16 = vadd.f32 %v5013_v43, %v4981_v22  ;;  %5066 = vst.msk [vmem:[%s8715_s28] sm:$0xff] %vm366_vm0, %v5034_v14  ;;  %v5030_v1 = vld [vmem:[%s5528_s14 + $0xe0] sm:$0xff]  ;;  %v5031_v22 = vld [vmem:[%s5528_s14 + $0xe8] sm:$0xff] }
 0x7a5   : > { %5067 = vst.msk [vmem:[%s8715_s28 + $0x8] sm:$0xff] %vm366_vm0, %v5035_v21  ;;  %5068 = vst.msk [vmem:[%s8715_s28 + $0x10] sm:$0xff] %vm366_vm0, %v5036_v49  ;;  %v5046_v51 = vadd.f32 %v5014_v39, %v8664_v44  ;;  %v5047_v30 = vadd.f32 %v5015_v37, %v8666_v28  ;;  %v5048_v62 = vadd.f32 %v5016_v45, %v8668_v46  ;;  %v5032_v44 = vld [vmem:[%s5528_s14 + $0xf0] sm:$0xff]  ;;  %v5033_v28 = vld [vmem:[%s5528_s14 + $0xf8] sm:$0xff] }
 0x7a6   : > { %5069 = vst.msk [vmem:[%s8715_s28 + $0x18] sm:$0xff] %vm366_vm0, %v5037_v24  ;;  %v5049_v50 = vadd.f32 %v5017_v17, %v8670_v32  ;;  %5070 = vst.msk [vmem:[%s8715_s28 + $0x20] sm:$0xff] %vm366_vm0, %v5038_v47  ;;  %v5050_v46 = vadd.f32 %v5018_v54, %v8676_v35  ;;  %v5051_v52 = vadd.f32 %v5019_v13, %v8678_v19 }
 0x7a7   : > { %5071 = vst.msk [vmem:[%s8715_s28 + $0x28] sm:$0xff] %vm366_vm0, %v5039_v53  ;;  %5072 = vst.msk [vmem:[%s8715_s28 + $0x30] sm:$0xff] %vm366_vm0, %v5040_v56  ;;  %v5052_v32 = vadd.f32 %v5020_v42, %v8680_v61  ;;  %v5053_v40 = vadd.f32 %v5021_v59, %v8682_v7  ;;  %v5054_v15 = vadd.f32 %v5022_v6, %v8688_v27 }
 0x7a8   : > { %5073 = vst.msk [vmem:[%s8715_s28 + $0x38] sm:$0xff] %vm366_vm0, %v5041_v20  ;;  %5074 = vst.msk [vmem:[%s8715_s28 + $0x40] sm:$0xff] %vm366_vm0, %v5042_v33  ;;  %v5055_v35 = vadd.f32 %v5023_v12, %v8690_v48  ;;  %v5056_v19 = vadd.f32 %v5024_v11, %v8692_v5  ;;  %v5057_v61 = vadd.f32 %v5025_v63, %v8694_v38 }
 0x7a9   : > { %5075 = vst.msk [vmem:[%s8715_s28 + $0x48] sm:$0xff] %vm366_vm0, %v5043_v10  ;;  %5076 = vst.msk [vmem:[%s8715_s28 + $0x50] sm:$0xff] %vm366_vm0, %v5044_v55  ;;  %v5058_v7 = vadd.f32 %v5026_v31, %v8699_v34  ;;  %v5059_v23 = vadd.f32 %v5027_v26, %v8701_v58  ;;  %v5060_v18 = vadd.f32 %v5028_v4, %v8703_v36 }
 0x7aa   : > { %5077 = vst.msk [vmem:[%s8715_s28 + $0x58] sm:$0xff] %vm366_vm0, %v5045_v16  ;;  %5078 = vst.msk [vmem:[%s8715_s28 + $0x60] sm:$0xff] %vm366_vm0, %v5046_v51  ;;  %v5061_v25 = vadd.f32 %v5029_v41, %v8705_v9  ;;  %v5062_v8 = vadd.f32 %v5030_v1, %v8717_v57  ;;  %v5063_v27 = vadd.f32 %v5031_v22, %v8719_v2  ;;  %v8921_v5 = vld [vmem:[#allocation7_spill] sm:$0xff] }
 0x7ab   : > { %5079 = vst.msk [vmem:[%s8715_s28 + $0x68] sm:$0xff] %vm366_vm0, %v5047_v30  ;;  %5080 = vst.msk [vmem:[%s8715_s28 + $0x70] sm:$0xff] %vm366_vm0, %v5048_v62  ;;  %v5064_v48 = vadd.f32 %v5032_v44, %v8721_v0  ;;  %v5065_v38 = vadd.f32 %v5033_v28, %v8921_v5 }
 0x7ac   : > { %5081 = vst.msk [vmem:[%s8715_s28 + $0x78] sm:$0xff] %vm366_vm0, %v5049_v50  ;;  %5082 = vst.msk [vmem:[%s8715_s28 + $0x80] sm:$0xff] %vm366_vm0, %v5050_v46 }
 0x7ad   : > { %5083 = vst.msk [vmem:[%s8715_s28 + $0x88] sm:$0xff] %vm366_vm0, %v5051_v52  ;;  %5084 = vst.msk [vmem:[%s8715_s28 + $0x90] sm:$0xff] %vm366_vm0, %v5052_v32 }
 0x7ae   : > { %5085 = vst.msk [vmem:[%s8715_s28 + $0x98] sm:$0xff] %vm366_vm0, %v5053_v40  ;;  %5086 = vst.msk [vmem:[%s8715_s28 + $0xa0] sm:$0xff] %vm366_vm0, %v5054_v15 }
 0x7af   : > { %5087 = vst.msk [vmem:[%s8715_s28 + $0xa8] sm:$0xff] %vm366_vm0, %v5055_v35  ;;  %5088 = vst.msk [vmem:[%s8715_s28 + $0xb0] sm:$0xff] %vm366_vm0, %v5056_v19 }
 0x7b0   : > { %5089 = vst.msk [vmem:[%s8715_s28 + $0xb8] sm:$0xff] %vm366_vm0, %v5057_v61  ;;  %5090 = vst.msk [vmem:[%s8715_s28 + $0xc0] sm:$0xff] %vm366_vm0, %v5058_v7 }
 0x7b1   : > { %5091 = vst.msk [vmem:[%s8715_s28 + $0xc8] sm:$0xff] %vm366_vm0, %v5059_v23  ;;  %5092 = vst.msk [vmem:[%s8715_s28 + $0xd0] sm:$0xff] %vm366_vm0, %v5060_v18 }
 0x7b2   : > { %5093 = vst.msk [vmem:[%s8715_s28 + $0xd8] sm:$0xff] %vm366_vm0, %v5061_v25  ;;  %5094 = vst.msk [vmem:[%s8715_s28 + $0xe0] sm:$0xff] %vm366_vm0, %v5062_v8 }
 0x7b3   : > { %5095 = vst.msk [vmem:[%s8715_s28 + $0xe8] sm:$0xff] %vm366_vm0, %v5063_v27  ;;  %5096 = vst.msk [vmem:[%s8715_s28 + $0xf0] sm:$0xff] %vm366_vm0, %v5064_v48 }
 0x7b4   : > { %5097 = vst.msk [vmem:[%s8715_s28 + $0xf8] sm:$0xff] %vm366_vm0, %v5065_v38 }
 0x7b5 PF: > { %s19_s30 = sadd.s32 1, %s5452_s30  }
 0x7b6   : > { %p16_p4 = scmp.ge.s32.totalorder %s19_s30, 4  }
 0x7b8   :  { %18 = sbr.rel (!%p16_p4) target bundleno = 1 (0x1), region = 89 }

</bundles_post_ra>
